<compile_context>
chip_gen: v7x
topology: tpu7x:2x2x1
jax: 0.10.0
libtpu: 0.0.40
codegen_flags: <defaults>
</compile_context>

<pallas_src>
import numpy as np
import jax
import jax.numpy as jnp
from jax.experimental import pallas as pl
from jax.experimental.pallas import tpu as pltpu

LATENT_DIM = 16
NUM_CHANNELS = 3
K = 5  # conv kernel size


# ---------------------------------------------------------------------------
# Host-side construction of GEMM-ready constants.
#
# Layout conventions:
#   image (HBM):        imgw[p, q, b, c*32 + w] = x[b, c, 4*q + p, w]   (lanes 96..127 = 0)
#   stage-1 GEMM:       rows (j1, b)   y = 4*j1 + 2*a1 + py,  y_pooled = 2*j1 + a1
#                       A1 rows kh*128 + c*32 + xw ;  cols px*128 + o*14 + x1p  (x = 2*x1p + px)
#   stage-1 pooled p1[a1]: rows (j1, b), cols o*14 + x1p                (lanes 56..127 = 0)
#   stage-2 GEMM:       rows (yy2, b)  y2 = 2*yy2 + py2
#                       A2 rows kh2*128 + c2*14 + x1 ; cols px2*128 + o2*5 + xx2 (x2 = 2*xx2 + px2)
#   stage-2 pooled:     rows (yy2, b), cols o2*5 + xx2                  (lanes 20..127 = 0)
#   fc1 weights:        rows yy2*128 + o2*5 + xx2  ->  PyTorch flatten index o2*25 + yy2*5 + xx2
# Bias+ReLU are applied after the pool maxes (valid: bias is uniform per window,
# ReLU is monotone).
# ---------------------------------------------------------------------------
def _build_constants(c1w, c1b, c2w, c2b, fc1w, fc1b, fc2w, fc2b):
    O1, C1 = c1w.shape[0], c1w.shape[1]
    O2, C2 = c2w.shape[0], c2w.shape[1]
    L = fc2w.shape[1]

    A1 = np.zeros((K * 128, 256), np.float32)
    for o in range(O1):
        for c in range(C1):
            for kh in range(K):
                for kw in range(K):
                    wv = c1w[o, c, kh, kw]
                    for px in range(2):
                        for x1p in range(14):
                            xw = 2 * x1p + px + kw
                            A1[kh * 128 + c * 32 + xw, px * 128 + o * 14 + x1p] += wv
    b1e = np.zeros((1, 128), np.float32)
    for o in range(O1):
        b1e[0, o * 14:(o + 1) * 14] = c1b[o]

    A2 = np.zeros((K * 128, 256), np.float32)
    for o2 in range(O2):
        for c2 in range(C2):
            for kh2 in range(K):
                for kw2 in range(K):
                    wv = c2w[o2, c2, kh2, kw2]
                    for px2 in range(2):
                        for xx2 in range(5):
                            x1 = 2 * xx2 + px2 + kw2
                            A2[kh2 * 128 + c2 * 14 + x1, px2 * 128 + o2 * 5 + xx2] += wv
    b2e = np.zeros((1, 128), np.float32)
    for o2 in range(O2):
        b2e[0, o2 * 5:(o2 + 1) * 5] = c2b[o2]

    fc1w_eff = np.zeros((5 * 128, 128), np.float32)
    for yy2 in range(5):
        for o2 in range(O2):
            for xx2 in range(5):
                fc1w_eff[yy2 * 128 + o2 * 5 + xx2, :100] = fc1w[o2 * 25 + yy2 * 5 + xx2, :]
    fc1b_eff = np.zeros((1, 128), np.float32)
    fc1b_eff[0, :100] = fc1b

    fc2w_eff = np.zeros((128, 128), np.float32)
    fc2w_eff[:100, :L] = fc2w
    fc2b_eff = np.zeros((1, 128), np.float32)
    fc2b_eff[0, :L] = fc2b

    return {"A1": A1, "b1": b1e, "A2": A2, "b2": b2e,
            "fc1w": fc1w_eff, "fc1b": fc1b_eff, "fc2w": fc2w_eff, "fc2b": fc2b_eff}


# ---------------------------------------------------------------------------
# Fused kernel: conv1+pool1 + conv2+pool2 + fc1 + fc2 for bt images per grid step.
# ---------------------------------------------------------------------------
def encoder_kernel(img_ref, a1_ref, b1e_ref, a2_ref, b2e_ref,
                   fc1w_ref, fc1b_ref, fc2w_ref, fc2b_ref, o_ref):
    bt = img_ref.shape[2]
    f32 = jnp.float32

    # ---- stage 1: conv1(5x5) + ReLU + 2x2 maxpool --------------------------
    a1w = a1_ref[...]                                       # (640, 256), shared by all groups

    def s1_group(py, ay):
        t0 = 2 * ay + py
        pieces = []
        for kh in range(K):
            t = t0 + kh                                     # image row = 4*j1 + t
            pieces.append(img_ref[t % 4, t // 4:t // 4 + 7, :, :])   # (7, bt, 128)
        slab = jnp.concatenate(pieces, axis=-1).reshape(7 * bt, K * 128)
        return jnp.dot(slab, a1w, preferred_element_type=f32)        # (7*bt, 256)

    b1 = b1e_ref[...]
    p1 = []
    for ay in range(2):                                     # ay = y_pooled parity
        m = jnp.maximum(s1_group(0, ay), s1_group(1, ay))   # pool over y phase
        m = jnp.maximum(m[:, :128], m[:, 128:])             # pool over x phase
        p1.append(jnp.maximum(m + b1, 0.0))                 # bias + ReLU -> (7*bt, 128)

    # ---- stage 2: conv2(5x5) + ReLU + 2x2 maxpool --------------------------
    a2w = a2_ref[...]                                       # (640, 256)

    def s2_group(py2):
        pieces = []
        for kh2 in range(K):
            t2 = py2 + kh2                                  # stage-1 pooled row = 2*yy2 + t2
            src = p1[t2 % 2]
            lo = (t2 // 2) * bt
            pieces.append(src[lo:lo + 5 * bt, :])           # (5*bt, 128)
        slab = jnp.concatenate(pieces, axis=-1)             # (5*bt, 640)
        return jnp.dot(slab, a2w, preferred_element_type=f32)        # (5*bt, 256)

    m2 = jnp.maximum(s2_group(0), s2_group(1))
    m2 = jnp.maximum(m2[:, :128], m2[:, 128:])
    pooled2 = jnp.maximum(m2 + b2e_ref[...], 0.0)           # (5*bt, 128), 20 valid lanes

    # ---- MLP: Linear(100,100) + ReLU + Linear(100,L) -----------------------
    feat = jnp.concatenate([pooled2[r * bt:(r + 1) * bt, :] for r in range(5)],
                           axis=-1)                         # (bt, 640)
    h = jnp.dot(feat, fc1w_ref[...], preferred_element_type=f32) + fc1b_ref[...]
    h = jnp.maximum(h, 0.0)                                 # (bt, 128)
    out = jnp.dot(h, fc2w_ref[...], preferred_element_type=f32) + fc2b_ref[...]
    o_ref[...] = out.astype(o_ref.dtype)                    # (bt, 128), lanes 0..L-1 valid


# ---------------------------------------------------------------------------
# pallas_call wrapper
# ---------------------------------------------------------------------------
def _encode_call(imgw, params, bt):
    bpad = imgw.shape[2]
    steps = bpad // bt
    consts = [params["A1"], params["b1"], params["A2"], params["b2"],
              params["fc1w"], params["fc1b"], params["fc2w"], params["fc2b"]]
    const_specs = [pl.BlockSpec(tuple(c.shape), (lambda i, _n=c.ndim: (0,) * _n))
                   for c in consts]

    flops = steps * (2 * (4 * 7 + 2 * 5) * bt * (K * 128) * 256
                     + 2 * bt * (K * 128) * 128 + 2 * bt * 128 * 128)
    bytes_accessed = int(imgw.size * 4 + sum(int(c.size) * 4 for c in consts)
                         + bpad * 128 * 4)

    return pl.pallas_call(
        encoder_kernel,
        out_shape=jax.ShapeDtypeStruct((bpad, 128), jnp.float32),
        grid=(steps,),
        in_specs=[pl.BlockSpec((4, 8, bt, 128), lambda i: (0, 0, i, 0))] + const_specs,
        out_specs=pl.BlockSpec((bt, 128), lambda i: (i, 0)),
        compiler_params=pltpu.CompilerParams(
            dimension_semantics=("parallel",),
            vmem_limit_bytes=48 * 1024 * 1024),
        cost_estimate=pl.CostEstimate(flops=int(flops), transcendentals=0,
                                      bytes_accessed=bytes_accessed),
    )(imgw, *consts)


def state_encoder(state, params, block_b=32):
    """state: (..., num_channels, 32, 32) -> (..., latent_dim)."""
    lead = state.shape[:-3]
    x = jnp.asarray(state, jnp.float32).reshape((-1, NUM_CHANNELS, 32, 32))
    b = x.shape[0]
    bt = min(block_b, ((b + 7) // 8) * 8)
    bt = max(8, (bt // 8) * 8)                               # multiple of 8
    bpad = ((b + bt - 1) // bt) * bt
    if bpad != b:
        x = jnp.pad(x, ((0, bpad - b), (0, 0), (0, 0), (0, 0)))

    # imgw[p, q, b, c*32 + w] = x[b, c, 4*q + p, w];  pad lanes 96..127 with zeros.
    # TODO(synk): could be folded into the kernel to avoid an extra HBM pass at huge batch.
    imgw = x.reshape(bpad, NUM_CHANNELS, 8, 4, 32)           # (b, c, q, p, w)
    imgw = jnp.transpose(imgw, (3, 2, 0, 1, 4))              # (p, q, b, c, w)
    imgw = imgw.reshape(4, 8, bpad, NUM_CHANNELS * 32)
    imgw = jnp.pad(imgw, ((0, 0), (0, 0), (0, 0), (0, 128 - NUM_CHANNELS * 32)))

    out = _encode_call(imgw, params, bt)                     # (bpad, 128)
    out = out[:b, :LATENT_DIM]
    return out.reshape(*lead, LATENT_DIM)


# ---------------------------------------------------------------------------
# Deterministic synthetic parameters (shapes follow nn.Module __init__)
# ---------------------------------------------------------------------------
def init_params(key):
    ks = jax.random.split(key, 8)
    raw = {
        "conv1_w": 0.1 * jax.random.normal(ks[0], (4, NUM_CHANNELS, K, K), jnp.float32),
        "conv1_b": 0.1 * jax.random.normal(ks[1], (4,), jnp.float32),
        "conv2_w": 0.1 * jax.random.normal(ks[2], (4, 4, K, K), jnp.float32),
        "conv2_b": 0.1 * jax.random.normal(ks[3], (4,), jnp.float32),
        "fc1_w": 0.1 * jax.random.normal(ks[4], (100, 100), jnp.float32),   # (in, out)
        "fc1_b": 0.1 * jax.random.normal(ks[5], (100,), jnp.float32),
        "fc2_w": 0.1 * jax.random.normal(ks[6], (100, LATENT_DIM), jnp.float32),
        "fc2_b": 0.1 * jax.random.normal(ks[7], (LATENT_DIM,), jnp.float32),
    }
    derived = _build_constants(*(np.asarray(raw[k], np.float32) for k in
                                 ["conv1_w", "conv1_b", "conv2_w", "conv2_b",
                                  "fc1_w", "fc1_b", "fc2_w", "fc2_b"]))
    params = {k: jnp.asarray(v) for k, v in derived.items()}
    params["raw"] = raw
    return params


# ---------------------------------------------------------------------------
# Pure numpy reference (fp64) for the numeric sanity check
# ---------------------------------------------------------------------------
def reference(state, raw):
    x = np.asarray(state, np.float64).reshape(-1, NUM_CHANNELS, 32, 32)
    w1, b1 = np.asarray(raw["conv1_w"], np.float64), np.asarray(raw["conv1_b"], np.float64)
    w2, b2 = np.asarray(raw["conv2_w"], np.float64), np.asarray(raw["conv2_b"], np.float64)
    f1w, f1b = np.asarray(raw["fc1_w"], np.float64), np.asarray(raw["fc1_b"], np.float64)
    f2w, f2b = np.asarray(raw["fc2_w"], np.float64), np.asarray(raw["fc2_b"], np.float64)

    def conv(a, w, b):
        bb, cc, hh, ww = a.shape
        ho, wo = hh - K + 1, ww - K + 1
        out = np.zeros((bb, w.shape[0], ho, wo))
        for kh in range(K):
            for kw in range(K):
                out += np.einsum('bchw,oc->bohw', a[:, :, kh:kh + ho, kw:kw + wo],
                                 w[:, :, kh, kw])
        return out + b[None, :, None, None]

    def pool(a):
        bb, cc, hh, ww = a.shape
        return a.reshape(bb, cc, hh // 2, 2, ww // 2, 2).max(axis=(3, 5))

    a = pool(np.maximum(conv(x, w1, b1), 0.0))
    a = pool(np.maximum(conv(a, w2, b2), 0.0))
    feats = a.reshape(a.shape[0], -1)                        # PyTorch flatten order
    h = np.maximum(feats @ f1w + f1b, 0.0)
    out = h @ f2w + f2b
    return out.reshape(*state.shape[:-3], LATENT_DIM)


if __name__ == "__main__":
    key = jax.random.PRNGKey(0)
    k_x, k_p = jax.random.split(key)
    B = 64                                    # 2 grid steps of 32 images each
    x = jax.random.normal(k_x, (B, NUM_CHANNELS, 32, 32), jnp.float32)
    params = init_params(k_p)

    out = jax.block_until_ready(state_encoder(x, params, block_b=32))
    assert out.shape == (B, LATENT_DIM), out.shape

    ref = reference(np.asarray(x), params["raw"])
    err = float(np.max(np.abs(np.asarray(out) - ref)))
    assert np.allclose(np.asarray(out), ref, atol=2e-3, rtol=2e-3), err
    print("KERNEL_OK")
</pallas_src>

<mosaic_0001>
module attributes {stable_mosaic.version = 11 : i64} {
  func.func @encoder_kernel(%arg0: i32, %arg1: memref<4x8x32x128xf32, #tpu.memory_space<vmem>>, %arg2: memref<640x256xf32, #tpu.memory_space<vmem>>, %arg3: memref<1x128xf32, #tpu.memory_space<vmem>>, %arg4: memref<640x256xf32, #tpu.memory_space<vmem>>, %arg5: memref<1x128xf32, #tpu.memory_space<vmem>>, %arg6: memref<640x128xf32, #tpu.memory_space<vmem>>, %arg7: memref<1x128xf32, #tpu.memory_space<vmem>>, %arg8: memref<128x128xf32, #tpu.memory_space<vmem>>, %arg9: memref<1x128xf32, #tpu.memory_space<vmem>>, %arg10: memref<32x128xf32, #tpu.memory_space<vmem>>) attributes {dimension_semantics = [#tpu.dimension_semantics<parallel>], iteration_bounds = array<i64: 2>, scalar_prefetch = 0 : i64, scratch_operands = 0 : i64, tpu.core_type = #tpu.core_type<tc>, window_params = [{transform_indices = @transform_0, window_bounds = array<i64: 4, 8, 32, 128>}, {pipeline_mode = #tpu.pipeline_mode<synchronous>, transform_indices = @transform_1, window_bounds = array<i64: 640, 256>}, {pipeline_mode = #tpu.pipeline_mode<synchronous>, transform_indices = @transform_2, window_bounds = array<i64: 1, 128>}, {pipeline_mode = #tpu.pipeline_mode<synchronous>, transform_indices = @transform_3, window_bounds = array<i64: 640, 256>}, {pipeline_mode = #tpu.pipeline_mode<synchronous>, transform_indices = @transform_4, window_bounds = array<i64: 1, 128>}, {pipeline_mode = #tpu.pipeline_mode<synchronous>, transform_indices = @transform_5, window_bounds = array<i64: 640, 128>}, {pipeline_mode = #tpu.pipeline_mode<synchronous>, transform_indices = @transform_6, window_bounds = array<i64: 1, 128>}, {pipeline_mode = #tpu.pipeline_mode<synchronous>, transform_indices = @transform_7, window_bounds = array<i64: 128, 128>}, {pipeline_mode = #tpu.pipeline_mode<synchronous>, transform_indices = @transform_8, window_bounds = array<i64: 1, 128>}, {transform_indices = @transform_9, window_bounds = array<i64: 32, 128>}]} {
    %c0 = arith.constant 0 : index
    %c0_0 = arith.constant 0 : index
    %0 = vector.load %arg2[%c0, %c0_0] : memref<640x256xf32, #tpu.memory_space<vmem>>, vector<640x256xf32>
    %c0_1 = arith.constant 0 : index
    %c0_2 = arith.constant 0 : index
    %1 = vector.load %arg3[%c0_1, %c0_2] : memref<1x128xf32, #tpu.memory_space<vmem>>, vector<1x128xf32>
    %c0_3 = arith.constant 0 : index
    %c0_4 = arith.constant 0 : index
    %c0_5 = arith.constant 0 : index
    %c0_6 = arith.constant 0 : index
    %2 = vector.load %arg1[%c0_3, %c0_4, %c0_5, %c0_6] : memref<4x8x32x128xf32, #tpu.memory_space<vmem>>, vector<1x7x32x128xf32>
    %3 = vector.shape_cast %2 : vector<1x7x32x128xf32> to vector<7x32x128xf32>
    %c1 = arith.constant 1 : index
    %c0_7 = arith.constant 0 : index
    %c0_8 = arith.constant 0 : index
    %c0_9 = arith.constant 0 : index
    %4 = vector.load %arg1[%c1, %c0_7, %c0_8, %c0_9] : memref<4x8x32x128xf32, #tpu.memory_space<vmem>>, vector<1x7x32x128xf32>
    %5 = vector.shape_cast %4 : vector<1x7x32x128xf32> to vector<7x32x128xf32>
    %c2 = arith.constant 2 : index
    %c0_10 = arith.constant 0 : index
    %c0_11 = arith.constant 0 : index
    %c0_12 = arith.constant 0 : index
    %6 = vector.load %arg1[%c2, %c0_10, %c0_11, %c0_12] : memref<4x8x32x128xf32, #tpu.memory_space<vmem>>, vector<1x7x32x128xf32>
    %7 = vector.shape_cast %6 : vector<1x7x32x128xf32> to vector<7x32x128xf32>
    %c3 = arith.constant 3 : index
    %c0_13 = arith.constant 0 : index
    %c0_14 = arith.constant 0 : index
    %c0_15 = arith.constant 0 : index
    %8 = vector.load %arg1[%c3, %c0_13, %c0_14, %c0_15] : memref<4x8x32x128xf32, #tpu.memory_space<vmem>>, vector<1x7x32x128xf32>
    %9 = vector.shape_cast %8 : vector<1x7x32x128xf32> to vector<7x32x128xf32>
    %c0_16 = arith.constant 0 : index
    %c1_17 = arith.constant 1 : index
    %c0_18 = arith.constant 0 : index
    %c0_19 = arith.constant 0 : index
    %10 = vector.load %arg1[%c0_16, %c1_17, %c0_18, %c0_19] : memref<4x8x32x128xf32, #tpu.memory_space<vmem>>, vector<1x7x32x128xf32>
    %11 = vector.shape_cast %10 : vector<1x7x32x128xf32> to vector<7x32x128xf32>
    %12 = tpu.concatenate %3, %5, %7, %9, %11 in 2 : vector<7x32x128xf32>, vector<7x32x128xf32>, vector<7x32x128xf32>, vector<7x32x128xf32>, vector<7x32x128xf32> -> vector<7x32x640xf32>
    %13 = vector.shape_cast %12 : vector<7x32x640xf32> to vector<224x640xf32>
    %cst = arith.constant dense<0.000000e+00> : vector<224x256xf32>
    %14 = tpu.matmul %13, %0, %cst {dimension_numbers = #tpu.dot_dimension_numbers<[1], [0], [0], [1], [0, 0, 1, 1], [], []>} : vector<224x640xf32>, vector<640x256xf32>, vector<224x256xf32> -> vector<224x256xf32>
    %c1_20 = arith.constant 1 : index
    %c0_21 = arith.constant 0 : index
    %c0_22 = arith.constant 0 : index
    %c0_23 = arith.constant 0 : index
    %15 = vector.load %arg1[%c1_20, %c0_21, %c0_22, %c0_23] : memref<4x8x32x128xf32, #tpu.memory_space<vmem>>, vector<1x7x32x128xf32>
    %16 = vector.shape_cast %15 : vector<1x7x32x128xf32> to vector<7x32x128xf32>
    %c2_24 = arith.constant 2 : index
    %c0_25 = arith.constant 0 : index
    %c0_26 = arith.constant 0 : index
    %c0_27 = arith.constant 0 : index
    %17 = vector.load %arg1[%c2_24, %c0_25, %c0_26, %c0_27] : memref<4x8x32x128xf32, #tpu.memory_space<vmem>>, vector<1x7x32x128xf32>
    %18 = vector.shape_cast %17 : vector<1x7x32x128xf32> to vector<7x32x128xf32>
    %c3_28 = arith.constant 3 : index
    %c0_29 = arith.constant 0 : index
    %c0_30 = arith.constant 0 : index
    %c0_31 = arith.constant 0 : index
    %19 = vector.load %arg1[%c3_28, %c0_29, %c0_30, %c0_31] : memref<4x8x32x128xf32, #tpu.memory_space<vmem>>, vector<1x7x32x128xf32>
    %20 = vector.shape_cast %19 : vector<1x7x32x128xf32> to vector<7x32x128xf32>
    %c0_32 = arith.constant 0 : index
    %c1_33 = arith.constant 1 : index
    %c0_34 = arith.constant 0 : index
    %c0_35 = arith.constant 0 : index
    %21 = vector.load %arg1[%c0_32, %c1_33, %c0_34, %c0_35] : memref<4x8x32x128xf32, #tpu.memory_space<vmem>>, vector<1x7x32x128xf32>
    %22 = vector.shape_cast %21 : vector<1x7x32x128xf32> to vector<7x32x128xf32>
    %c1_36 = arith.constant 1 : index
    %c1_37 = arith.constant 1 : index
    %c0_38 = arith.constant 0 : index
    %c0_39 = arith.constant 0 : index
    %23 = vector.load %arg1[%c1_36, %c1_37, %c0_38, %c0_39] : memref<4x8x32x128xf32, #tpu.memory_space<vmem>>, vector<1x7x32x128xf32>
    %24 = vector.shape_cast %23 : vector<1x7x32x128xf32> to vector<7x32x128xf32>
    %25 = tpu.concatenate %16, %18, %20, %22, %24 in 2 : vector<7x32x128xf32>, vector<7x32x128xf32>, vector<7x32x128xf32>, vector<7x32x128xf32>, vector<7x32x128xf32> -> vector<7x32x640xf32>
    %26 = vector.shape_cast %25 : vector<7x32x640xf32> to vector<224x640xf32>
    %cst_40 = arith.constant dense<0.000000e+00> : vector<224x256xf32>
    %27 = tpu.matmul %26, %0, %cst_40 {dimension_numbers = #tpu.dot_dimension_numbers<[1], [0], [0], [1], [0, 0, 1, 1], [], []>} : vector<224x640xf32>, vector<640x256xf32>, vector<224x256xf32> -> vector<224x256xf32>
    %28 = arith.maximumf %14, %27 : vector<224x256xf32>
    %29 = vector.extract_strided_slice %28 {offsets = [0, 0], sizes = [224, 128], strides = [1, 1]} : vector<224x256xf32> to vector<224x128xf32>
    %30 = vector.extract_strided_slice %28 {offsets = [0, 128], sizes = [224, 128], strides = [1, 1]} : vector<224x256xf32> to vector<224x128xf32>
    %31 = arith.maximumf %29, %30 : vector<224x128xf32>
    %32 = vector.broadcast %1 : vector<1x128xf32> to vector<224x128xf32>
    %33 = arith.addf %31, %32 : vector<224x128xf32>
    %cst_41 = arith.constant 0.000000e+00 : f32
    %34 = vector.broadcast %cst_41 : f32 to vector<224x128xf32>
    %35 = arith.maximumf %33, %34 : vector<224x128xf32>
    %c2_42 = arith.constant 2 : index
    %c0_43 = arith.constant 0 : index
    %c0_44 = arith.constant 0 : index
    %c0_45 = arith.constant 0 : index
    %36 = vector.load %arg1[%c2_42, %c0_43, %c0_44, %c0_45] : memref<4x8x32x128xf32, #tpu.memory_space<vmem>>, vector<1x7x32x128xf32>
    %37 = vector.shape_cast %36 : vector<1x7x32x128xf32> to vector<7x32x128xf32>
    %c3_46 = arith.constant 3 : index
    %c0_47 = arith.constant 0 : index
    %c0_48 = arith.constant 0 : index
    %c0_49 = arith.constant 0 : index
    %38 = vector.load %arg1[%c3_46, %c0_47, %c0_48, %c0_49] : memref<4x8x32x128xf32, #tpu.memory_space<vmem>>, vector<1x7x32x128xf32>
    %39 = vector.shape_cast %38 : vector<1x7x32x128xf32> to vector<7x32x128xf32>
    %c0_50 = arith.constant 0 : index
    %c1_51 = arith.constant 1 : index
    %c0_52 = arith.constant 0 : index
    %c0_53 = arith.constant 0 : index
    %40 = vector.load %arg1[%c0_50, %c1_51, %c0_52, %c0_53] : memref<4x8x32x128xf32, #tpu.memory_space<vmem>>, vector<1x7x32x128xf32>
    %41 = vector.shape_cast %40 : vector<1x7x32x128xf32> to vector<7x32x128xf32>
    %c1_54 = arith.constant 1 : index
    %c1_55 = arith.constant 1 : index
    %c0_56 = arith.constant 0 : index
    %c0_57 = arith.constant 0 : index
    %42 = vector.load %arg1[%c1_54, %c1_55, %c0_56, %c0_57] : memref<4x8x32x128xf32, #tpu.memory_space<vmem>>, vector<1x7x32x128xf32>
    %43 = vector.shape_cast %42 : vector<1x7x32x128xf32> to vector<7x32x128xf32>
    %c2_58 = arith.constant 2 : index
    %c1_59 = arith.constant 1 : index
    %c0_60 = arith.constant 0 : index
    %c0_61 = arith.constant 0 : index
    %44 = vector.load %arg1[%c2_58, %c1_59, %c0_60, %c0_61] : memref<4x8x32x128xf32, #tpu.memory_space<vmem>>, vector<1x7x32x128xf32>
    %45 = vector.shape_cast %44 : vector<1x7x32x128xf32> to vector<7x32x128xf32>
    %46 = tpu.concatenate %37, %39, %41, %43, %45 in 2 : vector<7x32x128xf32>, vector<7x32x128xf32>, vector<7x32x128xf32>, vector<7x32x128xf32>, vector<7x32x128xf32> -> vector<7x32x640xf32>
    %47 = vector.shape_cast %46 : vector<7x32x640xf32> to vector<224x640xf32>
    %cst_62 = arith.constant dense<0.000000e+00> : vector<224x256xf32>
    %48 = tpu.matmul %47, %0, %cst_62 {dimension_numbers = #tpu.dot_dimension_numbers<[1], [0], [0], [1], [0, 0, 1, 1], [], []>} : vector<224x640xf32>, vector<640x256xf32>, vector<224x256xf32> -> vector<224x256xf32>
    %c3_63 = arith.constant 3 : index
    %c0_64 = arith.constant 0 : index
    %c0_65 = arith.constant 0 : index
    %c0_66 = arith.constant 0 : index
    %49 = vector.load %arg1[%c3_63, %c0_64, %c0_65, %c0_66] : memref<4x8x32x128xf32, #tpu.memory_space<vmem>>, vector<1x7x32x128xf32>
    %50 = vector.shape_cast %49 : vector<1x7x32x128xf32> to vector<7x32x128xf32>
    %c0_67 = arith.constant 0 : index
    %c1_68 = arith.constant 1 : index
    %c0_69 = arith.constant 0 : index
    %c0_70 = arith.constant 0 : index
    %51 = vector.load %arg1[%c0_67, %c1_68, %c0_69, %c0_70] : memref<4x8x32x128xf32, #tpu.memory_space<vmem>>, vector<1x7x32x128xf32>
    %52 = vector.shape_cast %51 : vector<1x7x32x128xf32> to vector<7x32x128xf32>
    %c1_71 = arith.constant 1 : index
    %c1_72 = arith.constant 1 : index
    %c0_73 = arith.constant 0 : index
    %c0_74 = arith.constant 0 : index
    %53 = vector.load %arg1[%c1_71, %c1_72, %c0_73, %c0_74] : memref<4x8x32x128xf32, #tpu.memory_space<vmem>>, vector<1x7x32x128xf32>
    %54 = vector.shape_cast %53 : vector<1x7x32x128xf32> to vector<7x32x128xf32>
    %c2_75 = arith.constant 2 : index
    %c1_76 = arith.constant 1 : index
    %c0_77 = arith.constant 0 : index
    %c0_78 = arith.constant 0 : index
    %55 = vector.load %arg1[%c2_75, %c1_76, %c0_77, %c0_78] : memref<4x8x32x128xf32, #tpu.memory_space<vmem>>, vector<1x7x32x128xf32>
    %56 = vector.shape_cast %55 : vector<1x7x32x128xf32> to vector<7x32x128xf32>
    %c3_79 = arith.constant 3 : index
    %c1_80 = arith.constant 1 : index
    %c0_81 = arith.constant 0 : index
    %c0_82 = arith.constant 0 : index
    %57 = vector.load %arg1[%c3_79, %c1_80, %c0_81, %c0_82] : memref<4x8x32x128xf32, #tpu.memory_space<vmem>>, vector<1x7x32x128xf32>
    %58 = vector.shape_cast %57 : vector<1x7x32x128xf32> to vector<7x32x128xf32>
    %59 = tpu.concatenate %50, %52, %54, %56, %58 in 2 : vector<7x32x128xf32>, vector<7x32x128xf32>, vector<7x32x128xf32>, vector<7x32x128xf32>, vector<7x32x128xf32> -> vector<7x32x640xf32>
    %60 = vector.shape_cast %59 : vector<7x32x640xf32> to vector<224x640xf32>
    %cst_83 = arith.constant dense<0.000000e+00> : vector<224x256xf32>
    %61 = tpu.matmul %60, %0, %cst_83 {dimension_numbers = #tpu.dot_dimension_numbers<[1], [0], [0], [1], [0, 0, 1, 1], [], []>} : vector<224x640xf32>, vector<640x256xf32>, vector<224x256xf32> -> vector<224x256xf32>
    %62 = arith.maximumf %48, %61 : vector<224x256xf32>
    %63 = vector.extract_strided_slice %62 {offsets = [0, 0], sizes = [224, 128], strides = [1, 1]} : vector<224x256xf32> to vector<224x128xf32>
    %64 = vector.extract_strided_slice %62 {offsets = [0, 128], sizes = [224, 128], strides = [1, 1]} : vector<224x256xf32> to vector<224x128xf32>
    %65 = arith.maximumf %63, %64 : vector<224x128xf32>
    %66 = vector.broadcast %1 : vector<1x128xf32> to vector<224x128xf32>
    %67 = arith.addf %65, %66 : vector<224x128xf32>
    %cst_84 = arith.constant 0.000000e+00 : f32
    %68 = vector.broadcast %cst_84 : f32 to vector<224x128xf32>
    %69 = arith.maximumf %67, %68 : vector<224x128xf32>
    %c0_85 = arith.constant 0 : index
    %c0_86 = arith.constant 0 : index
    %70 = vector.load %arg4[%c0_85, %c0_86] : memref<640x256xf32, #tpu.memory_space<vmem>>, vector<640x256xf32>
    %71 = vector.extract_strided_slice %35 {offsets = [0, 0], sizes = [160, 128], strides = [1, 1]} : vector<224x128xf32> to vector<160x128xf32>
    %72 = vector.extract_strided_slice %69 {offsets = [0, 0], sizes = [160, 128], strides = [1, 1]} : vector<224x128xf32> to vector<160x128xf32>
    %73 = vector.extract_strided_slice %35 {offsets = [32, 0], sizes = [160, 128], strides = [1, 1]} : vector<224x128xf32> to vector<160x128xf32>
    %74 = vector.extract_strided_slice %69 {offsets = [32, 0], sizes = [160, 128], strides = [1, 1]} : vector<224x128xf32> to vector<160x128xf32>
    %75 = vector.extract_strided_slice %35 {offsets = [64, 0], sizes = [160, 128], strides = [1, 1]} : vector<224x128xf32> to vector<160x128xf32>
    %76 = tpu.concatenate %71, %72, %73, %74, %75 in 1 : vector<160x128xf32>, vector<160x128xf32>, vector<160x128xf32>, vector<160x128xf32>, vector<160x128xf32> -> vector<160x640xf32>
    %cst_87 = arith.constant dense<0.000000e+00> : vector<160x256xf32>
    %77 = tpu.matmul %76, %70, %cst_87 {dimension_numbers = #tpu.dot_dimension_numbers<[1], [0], [0], [1], [0, 0, 1, 1], [], []>} : vector<160x640xf32>, vector<640x256xf32>, vector<160x256xf32> -> vector<160x256xf32>
    %78 = vector.extract_strided_slice %69 {offsets = [0, 0], sizes = [160, 128], strides = [1, 1]} : vector<224x128xf32> to vector<160x128xf32>
    %79 = vector.extract_strided_slice %35 {offsets = [32, 0], sizes = [160, 128], strides = [1, 1]} : vector<224x128xf32> to vector<160x128xf32>
    %80 = vector.extract_strided_slice %69 {offsets = [32, 0], sizes = [160, 128], strides = [1, 1]} : vector<224x128xf32> to vector<160x128xf32>
    %81 = vector.extract_strided_slice %35 {offsets = [64, 0], sizes = [160, 128], strides = [1, 1]} : vector<224x128xf32> to vector<160x128xf32>
    %82 = vector.extract_strided_slice %69 {offsets = [64, 0], sizes = [160, 128], strides = [1, 1]} : vector<224x128xf32> to vector<160x128xf32>
    %83 = tpu.concatenate %78, %79, %80, %81, %82 in 1 : vector<160x128xf32>, vector<160x128xf32>, vector<160x128xf32>, vector<160x128xf32>, vector<160x128xf32> -> vector<160x640xf32>
    %cst_88 = arith.constant dense<0.000000e+00> : vector<160x256xf32>
    %84 = tpu.matmul %83, %70, %cst_88 {dimension_numbers = #tpu.dot_dimension_numbers<[1], [0], [0], [1], [0, 0, 1, 1], [], []>} : vector<160x640xf32>, vector<640x256xf32>, vector<160x256xf32> -> vector<160x256xf32>
    %85 = arith.maximumf %77, %84 : vector<160x256xf32>
    %86 = vector.extract_strided_slice %85 {offsets = [0, 0], sizes = [160, 128], strides = [1, 1]} : vector<160x256xf32> to vector<160x128xf32>
    %87 = vector.extract_strided_slice %85 {offsets = [0, 128], sizes = [160, 128], strides = [1, 1]} : vector<160x256xf32> to vector<160x128xf32>
    %88 = arith.maximumf %86, %87 : vector<160x128xf32>
    %c0_89 = arith.constant 0 : index
    %c0_90 = arith.constant 0 : index
    %89 = vector.load %arg5[%c0_89, %c0_90] : memref<1x128xf32, #tpu.memory_space<vmem>>, vector<1x128xf32>
    %90 = vector.broadcast %89 : vector<1x128xf32> to vector<160x128xf32>
    %91 = arith.addf %88, %90 : vector<160x128xf32>
    %cst_91 = arith.constant 0.000000e+00 : f32
    %92 = vector.broadcast %cst_91 : f32 to vector<160x128xf32>
    %93 = arith.maximumf %91, %92 : vector<160x128xf32>
    %94 = vector.extract_strided_slice %93 {offsets = [0, 0], sizes = [32, 128], strides = [1, 1]} : vector<160x128xf32> to vector<32x128xf32>
    %95 = vector.extract_strided_slice %93 {offsets = [32, 0], sizes = [32, 128], strides = [1, 1]} : vector<160x128xf32> to vector<32x128xf32>
    %96 = vector.extract_strided_slice %93 {offsets = [64, 0], sizes = [32, 128], strides = [1, 1]} : vector<160x128xf32> to vector<32x128xf32>
    %97 = vector.extract_strided_slice %93 {offsets = [96, 0], sizes = [32, 128], strides = [1, 1]} : vector<160x128xf32> to vector<32x128xf32>
    %98 = vector.extract_strided_slice %93 {offsets = [128, 0], sizes = [32, 128], strides = [1, 1]} : vector<160x128xf32> to vector<32x128xf32>
    %99 = tpu.concatenate %94, %95, %96, %97, %98 in 1 : vector<32x128xf32>, vector<32x128xf32>, vector<32x128xf32>, vector<32x128xf32>, vector<32x128xf32> -> vector<32x640xf32>
    %c0_92 = arith.constant 0 : index
    %c0_93 = arith.constant 0 : index
    %100 = vector.load %arg6[%c0_92, %c0_93] : memref<640x128xf32, #tpu.memory_space<vmem>>, vector<640x128xf32>
    %cst_94 = arith.constant dense<0.000000e+00> : vector<32x128xf32>
    %101 = tpu.matmul %99, %100, %cst_94 {dimension_numbers = #tpu.dot_dimension_numbers<[1], [0], [0], [1], [0, 0, 1, 1], [], []>} : vector<32x640xf32>, vector<640x128xf32>, vector<32x128xf32> -> vector<32x128xf32>
    %c0_95 = arith.constant 0 : index
    %c0_96 = arith.constant 0 : index
    %102 = vector.load %arg7[%c0_95, %c0_96] : memref<1x128xf32, #tpu.memory_space<vmem>>, vector<1x128xf32>
    %103 = vector.broadcast %102 : vector<1x128xf32> to vector<32x128xf32>
    %104 = arith.addf %101, %103 : vector<32x128xf32>
    %cst_97 = arith.constant 0.000000e+00 : f32
    %105 = vector.broadcast %cst_97 : f32 to vector<32x128xf32>
    %106 = arith.maximumf %104, %105 : vector<32x128xf32>
    %c0_98 = arith.constant 0 : index
    %c0_99 = arith.constant 0 : index
    %107 = vector.load %arg8[%c0_98, %c0_99] : memref<128x128xf32, #tpu.memory_space<vmem>>, vector<128x128xf32>
    %cst_100 = arith.constant dense<0.000000e+00> : vector<32x128xf32>
    %108 = tpu.matmul %106, %107, %cst_100 {dimension_numbers = #tpu.dot_dimension_numbers<[1], [0], [0], [1], [0, 0, 1, 1], [], []>} : vector<32x128xf32>, vector<128x128xf32>, vector<32x128xf32> -> vector<32x128xf32>
    %c0_101 = arith.constant 0 : index
    %c0_102 = arith.constant 0 : index
    %109 = vector.load %arg9[%c0_101, %c0_102] : memref<1x128xf32, #tpu.memory_space<vmem>>, vector<1x128xf32>
    %110 = vector.broadcast %109 : vector<1x128xf32> to vector<32x128xf32>
    %111 = arith.addf %108, %110 : vector<32x128xf32>
    %c0_103 = arith.constant 0 : index
    %c0_104 = arith.constant 0 : index
    %112 = vector.load %arg10[%c0_103, %c0_104] : memref<32x128xf32, #tpu.memory_space<vmem>>, vector<32x128xf32>
    tpu.vector_store %arg10[%c0_103, %c0_104], %111 {strides = array<i32>} : memref<32x128xf32, #tpu.memory_space<vmem>>, vector<32x128xf32>,
    return
  }
  func.func @transform_0(%arg0: i32) -> (i32, i32, i32, i32) {
    %c0_i32 = arith.constant 0 : i32
    %c0_i32_0 = arith.constant 0 : i32
    %c0_i32_1 = arith.constant 0 : i32
    %c0_i32_2 = arith.constant 0 : i32
    return %c0_i32, %c0_i32_0, %arg0, %c0_i32_1 : i32, i32, i32, i32
  }
  func.func @transform_1(%arg0: i32) -> (i32, i32) {
    %c0_i32 = arith.constant 0 : i32
    %c0_i32_0 = arith.constant 0 : i32
    %c0_i32_1 = arith.constant 0 : i32
    return %c0_i32, %c0_i32_0 : i32, i32
  }
  func.func @transform_2(%arg0: i32) -> (i32, i32) {
    %c0_i32 = arith.constant 0 : i32
    %c0_i32_0 = arith.constant 0 : i32
    %c0_i32_1 = arith.constant 0 : i32
    return %c0_i32, %c0_i32_0 : i32, i32
  }
  func.func @transform_3(%arg0: i32) -> (i32, i32) {
    %c0_i32 = arith.constant 0 : i32
    %c0_i32_0 = arith.constant 0 : i32
    %c0_i32_1 = arith.constant 0 : i32
    return %c0_i32, %c0_i32_0 : i32, i32
  }
  func.func @transform_4(%arg0: i32) -> (i32, i32) {
    %c0_i32 = arith.constant 0 : i32
    %c0_i32_0 = arith.constant 0 : i32
    %c0_i32_1 = arith.constant 0 : i32
    return %c0_i32, %c0_i32_0 : i32, i32
  }
  func.func @transform_5(%arg0: i32) -> (i32, i32) {
    %c0_i32 = arith.constant 0 : i32
    %c0_i32_0 = arith.constant 0 : i32
    %c0_i32_1 = arith.constant 0 : i32
    return %c0_i32, %c0_i32_0 : i32, i32
  }
  func.func @transform_6(%arg0: i32) -> (i32, i32) {
    %c0_i32 = arith.constant 0 : i32
    %c0_i32_0 = arith.constant 0 : i32
    %c0_i32_1 = arith.constant 0 : i32
    return %c0_i32, %c0_i32_0 : i32, i32
  }
  func.func @transform_7(%arg0: i32) -> (i32, i32) {
    %c0_i32 = arith.constant 0 : i32
    %c0_i32_0 = arith.constant 0 : i32
    %c0_i32_1 = arith.constant 0 : i32
    return %c0_i32, %c0_i32_0 : i32, i32
  }
  func.func @transform_8(%arg0: i32) -> (i32, i32) {
    %c0_i32 = arith.constant 0 : i32
    %c0_i32_0 = arith.constant 0 : i32
    %c0_i32_1 = arith.constant 0 : i32
    return %c0_i32, %c0_i32_0 : i32, i32
  }
  func.func @transform_9(%arg0: i32) -> (i32, i32) {
    %c0_i32 = arith.constant 0 : i32
    %c0_i32_0 = arith.constant 0 : i32
    return %arg0, %c0_i32 : i32, i32
  }
}

</mosaic_0001>

<bundles_post_ra>
// kernel: tpu_custom_call.1
= control target key start
LH: loop header
LB: loop body
LE: loop exit
PB: predicated region body
PF: predicated region fallthrough
CT: control target
= control target key end

     0   :  { %s10832_s0 = inlined_call_operand.hbm [shape: f32[4,8,64,128], index: 0, kind: input, shape index: {}]   ;;  %s10833_s1 = inlined_call_operand.hbm [shape: f32[640,256], index: 1, kind: input, shape index: {}]   ;;  %s10834_s2 = inlined_call_operand.vmem [shape: f32[1,128], index: 2, kind: input, shape index: {}]   ;;  %s10835_s3 = inlined_call_operand.hbm [shape: f32[640,256], index: 3, kind: input, shape index: {}]   ;;  %s10836_s4 = inlined_call_operand.vmem [shape: f32[1,128], index: 4, kind: input, shape index: {}]   ;;  %s10837_s5 = inlined_call_operand.hbm [shape: f32[640,128], index: 5, kind: input, shape index: {}]   ;;  %s10838_s6 = inlined_call_operand.vmem [shape: f32[1,128], index: 6, kind: input, shape index: {}]   ;;  %s10839_s7 = inlined_call_operand.hbm [shape: f32[128,128], index: 7, kind: input, shape index: {}]   ;;  %s10840_s8 = inlined_call_operand.vmem [shape: f32[1,128], index: 8, kind: input, shape index: {}]   ;;  %s10841_s9 = inlined_call_operand.hbm [shape: f32[64,128], index: 9, kind: output, shape index: {}]  }
   0x1   :  { %11030 = sst [smem:[#allocation118_spill]] %s10833_s1 }
   0x2   :  { %11031 = sst [smem:[#allocation119_spill]] %s10838_s6 }
   0x3   :  { %11032 = sst [smem:[#allocation120_spill]] %s10840_s8 }
   0x4   :  { %11033 = sst [smem:[#allocation121_spill]] %s10841_s9 }
   0x5   :  { %14 = vsyncpa [#allocation3], 0 }
   0x6   :  { %16 = vsyncpa [#allocation3 + $0x1], 0 }
   0x7   :  { %17 = vsyncpa [#allocation6], 0 }
   0x8   :  { %18 = vsyncpa [#allocation9], 0 }
   0x9   :  { %19 = vsyncpa [#allocation4], 0 }
   0xa   :  { %21 = vsyncpa [#allocation4 + $0x1], 0  ;;  %s8430_s30 = smov 0   ;;  %s8432_s10 = smov 0  }
   0xb   :  { %s8434_s11 = smov 0   ;;  %s8436_s12 = smov 0  }
   0xc LB: > { %11034 = sst [smem:[#allocation19_spill]] %s8348_s30  ;;  %s8451_s13 = sadd.s32 4294967295, %s8360_s12   ;;  %s8360_s12 = sphi %s8436_s12, %s11265_s12   ;;  %s8356_s11 = sphi %s8434_s11, %s11269_s11   ;;  %s8352_s10 = sphi %s8432_s10, %s11268_s10   ;;  %s8348_s30 = sphi %s8430_s30, %s11267_s30  }
   0xd   : > { %s5870_s14 = sadd.s32 4294967294, %s8360_s12   ;;  %s8455_s15 = sadd.s32 1, %s8360_s12  }
   0xe   : > { %11035 = sst [smem:[#allocation20_spill]] %s8455_s15  ;;  %s34_s16 = sadd.s32 1, %s8356_s11 }
   0xf   : > { %s31_s17 = ssub.s32 %s8360_s12, %s8455_s15  ;;  %p41_p0 = scmp.ne.s32.totalorder %s8356_s11, %s8352_s10 }
  0x10   : > { %p32_p1 = scmp.eq.s32.totalorder %s31_s17, 0  ;;  %p42_p2 = scmp.eq.s32.totalorder %s8360_s12, 0 }
  0x11   : > { %p47_p3 = scmp.ne.s32.totalorder %s8352_s10, %s8348_s30  ;;  %p10844_p4 = scmp.eq.s32.totalorder %s8451_s13, 0 }
  0x12   : > { %s8467_s18 = scalar_select %p32_p1, %s8356_s11, %s34_s16  }
  0x13   : > { %p8469_p5 = por %p42_p2, %p41_p0  ;;  %p8475_p6 = por %p10844_p4, %p47_p3 }
  0x14   : > { %11036 = sst [smem:[#allocation21_spill]] %s8467_s18  ;;  %p239_p7 = scmp.eq.s32.totalorder %s8451_s13, 1 }
  0x15   : > { %s11037_s19 = scalar_select %p8469_p5, 1, 0 }
  0x16   : > { %s11038_s20 = scalar_select %p8475_p6, 1, 0 }
  0x17   : > { %p245_p8 = scmp.eq.s32.totalorder %s5870_s14, 1  ;;  %p5871_p9 = scmp.ge.s32.totalorder %s8360_s12, 1 }
  0x18   : > { %p252_p10 = scmp.lt.s32.totalorder %s8360_s12, 3  ;;  %p8482_p11 = por %p239_p7, %p41_p0 }
  0x19   : > { %p8486_p12 = por %p245_p8, %p47_p3  ;;  %s8362_s24 = smov [#allocation5]  }
  0x1a   : > { %s11039_s21 = scalar_select %p8482_p11, 1, 0 }
  0x1b   : > { %s11041_s22 = scalar_select %p8486_p12, 1, 0 }
  0x1c   : > { %11040 = sst [smem:[#allocation22_spill]] %s11039_s21  ;;  %p8490_p13 = pnand %p5871_p9, %p252_p10 }
  0x1d   : > { %11042 = sst [smem:[#allocation23_spill]] %s11041_s22  ;;  %s264_s25 = sshll.u32 %s8362_s24, 4  ;;  %s265_s25 = int_to_ptr.vmem [resolvable:$true] %s264_s25 }
  0x1e   : > { %s11043_s23 = scalar_select %p8490_p13, 1, 0 }
  0x1f   : > { %p8023_p1 = pneg %p8490_p13  ;;  %s8363_s27 = smov [#allocation8]  }
  0x20   : > { %s296_s28 = sshll.u32 %s8363_s27, 4  ;;  %s11045_s1 = sld [smem:[#allocation118_spill]]  ;;  %s8502_s28 = int_to_ptr.vmem [resolvable:$true] %s296_s28 }
  0x21   : > { %p8498_p2 = pnand %p8023_p1, %p10844_p4 }
  0x23   : > { %p8512_p3 = pneg %p8498_p2 }
  0x26   : > { %s8174_s16 = scalar_lea.hbm %s11045_s1, 20480 }
  0x27   : > { %p8175_p0 = scmp.ne.s32.totalorder %s11045_s1, %s8174_s16  ;;  %p8181_p9 = scmp.lt.u32.totalorder %s8174_s16, %s11045_s1 }
  0x29   : > { %p8177_p7 = pnand %p8512_p3, %p8175_p0 }
  0x2b   : > { %p8178_p8 = pneg %p8177_p7 }
  0x2d   : > { %p8183_p10 = pnand %p8181_p9, %p8178_p8 }
  0x2f   : > { %8186 = shalt.err (!%p8183_p10)
}
  0x30   : > { %s8187_s29 = scalar_lea.vmem %s265_s25, 20480  ;;  %p8195_p11 = scmp.lt.s32.totalorder %s265_s25, %s265_s25 }
  0x31   : > { %p8188_p1 = scmp.ne.s32.totalorder %s265_s25, %s8187_s29  ;;  %p8196_p6 = scmp.lt.s32.totalorder %s8187_s29, %s8187_s29 }
  0x33   : > { %p8190_p4 = pnand %p8188_p1, %p8512_p3  ;;  %p8197_p13 = por %p8196_p6, %p8195_p11 }
  0x35   : > { %p8191_p12 = pneg %p8190_p4 }
  0x37   : > { %p8198_p5 = pnand %p8197_p13, %p8191_p12 }
  0x39   : > { %8201 = shalt.err (!%p8198_p5)
}
  0x3a   : > { %s10854_s18 = smov 256   ;;  %s10855_s14 = smov 16  }
  0x3b   : > { %8026 = dma.hbm_to_vmem [thread:$0]  (!%p8498_p2), %s11045_s1, 20480, %s265_s25, [#allocation6], %s10854_s18, %s10854_s18, %s10855_s14  }
  0x3c   : > { %s8202_s22 = scalar_lea.hbm %s10837_s5, 10240 }
  0x3d   : > { %p8203_p4 = scmp.ne.s32.totalorder %s10837_s5, %s8202_s22  ;;  %p8209_p11 = scmp.lt.u32.totalorder %s8202_s22, %s10837_s5 }
  0x3f   : > { %p8205_p5 = pnand %p8203_p4, %p8512_p3 }
  0x41   : > { %p8206_p6 = pneg %p8205_p5 }
  0x43   : > { %p8211_p12 = pnand %p8209_p11, %p8206_p6 }
  0x45   : > { %8214 = shalt.err (!%p8211_p12)
}
  0x46   : > { %s8215_s25 = scalar_lea.vmem %s8502_s28, 10240  ;;  %p8223_p8 = scmp.lt.s32.totalorder %s8502_s28, %s8502_s28 }
  0x47   : > { %p8216_p13 = scmp.ne.s32.totalorder %s8502_s28, %s8215_s25  ;;  %p8224_p9 = scmp.lt.s32.totalorder %s8215_s25, %s8215_s25 }
  0x49   : > { %p8218_p0 = pnand %p8216_p13, %p8512_p3  ;;  %p8225_p10 = por %p8224_p9, %p8223_p8 }
  0x4b   : > { %p8219_p7 = pneg %p8218_p0 }
  0x4d   : > { %p8226_p1 = pnand %p8225_p10, %p8219_p7 }
  0x4f   : > { %8229 = shalt.err (!%p8226_p1)
}
  0x50   : > { %s8366_s30 = smov 128   ;;  %s8367_s9 = smov 8  }
  0x51   : > { %8032 = dma.hbm_to_vmem [thread:$0]  (!%p8498_p2), %s10837_s5, 10240, %s8502_s28, [#allocation9], %s8366_s30, %s8366_s30, %s8367_s9  }
  0x52   : > { %s8368_s15 = smov [#allocation7]   ;;  %s8369_s17 = smov [#allocation10]  }
  0x53   : > { %s280_s16 = sshll.u32 %s8368_s15, 4  ;;  %s312_s27 = sshll.u32 %s8369_s17, 4  ;;  %s281_s16 = int_to_ptr.vmem [resolvable:$true] %s280_s16  ;;  %s313_s27 = int_to_ptr.vmem [resolvable:$true] %s312_s27 }
  0x54   : > { %s8230_s18 = scalar_lea.hbm %s10835_s3, 20480 }
  0x55   : > { %p8231_p4 = scmp.ne.s32.totalorder %s10835_s3, %s8230_s18  ;;  %p8237_p11 = scmp.lt.u32.totalorder %s8230_s18, %s10835_s3 }
  0x57   : > { %p8233_p5 = pnand %p8231_p4, %p8512_p3 }
  0x59   : > { %p8234_p6 = pneg %p8233_p5 }
  0x5b   : > { %p8239_p12 = pnand %p8237_p11, %p8234_p6 }
  0x5d   : > { %8242 = shalt.err (!%p8239_p12)
}
  0x5e   : > { %s8243_s28 = scalar_lea.vmem %s281_s16, 20480  ;;  %p8251_p8 = scmp.lt.s32.totalorder %s281_s16, %s281_s16 }
  0x5f   : > { %p8244_p13 = scmp.ne.s32.totalorder %s281_s16, %s8243_s28  ;;  %p8252_p9 = scmp.lt.s32.totalorder %s8243_s28, %s8243_s28 }
  0x61   : > { %p8246_p0 = pnand %p8244_p13, %p8512_p3  ;;  %p8253_p10 = por %p8252_p9, %p8251_p8 }
  0x63   : > { %p8247_p7 = pneg %p8246_p0 }
  0x65   : > { %p8254_p1 = pnand %p8253_p10, %p8247_p7 }
  0x67   : > { %8257 = shalt.err (!%p8254_p1)
}
  0x68   : > { %s11047_s1 = smov 16   ;;  %s11048_s14 = smov 256  }
  0x69   : > { %8029 = dma.hbm_to_vmem [thread:$0]  (!%p8498_p2), %s10835_s3, 20480, %s281_s16, [#allocation6], %s11048_s14, %s11048_s14, %s11047_s1  }
  0x6a   : > { %s8258_s22 = scalar_lea.hbm %s10839_s7, 2048 }
  0x6b   : > { %p8259_p4 = scmp.ne.s32.totalorder %s10839_s7, %s8258_s22  ;;  %p8265_p11 = scmp.lt.u32.totalorder %s8258_s22, %s10839_s7 }
  0x6d   : > { %p8261_p5 = pnand %p8259_p4, %p8512_p3 }
  0x6f   : > { %p8262_p6 = pneg %p8261_p5 }
  0x71   : > { %p8267_p12 = pnand %p8265_p11, %p8262_p6 }
  0x73   : > { %8270 = shalt.err (!%p8267_p12)
}
  0x74   : > { %s8271_s28 = scalar_lea.vmem %s313_s27, 2048  ;;  %p8279_p8 = scmp.lt.s32.totalorder %s313_s27, %s313_s27 }
  0x75   : > { %p8272_p13 = scmp.ne.s32.totalorder %s313_s27, %s8271_s28  ;;  %p8280_p9 = scmp.lt.s32.totalorder %s8271_s28, %s8271_s28 }
  0x77   : > { %p8274_p0 = pnand %p8272_p13, %p8512_p3  ;;  %p8281_p10 = por %p8280_p9, %p8279_p8 }
  0x79   : > { %p8275_p7 = pneg %p8274_p0 }
  0x7b   : > { %p8282_p1 = pnand %p8281_p10, %p8275_p7 }
  0x7d   : > { %8285 = shalt.err (!%p8282_p1)
}
  0x7e   : > { %8035 = dma.hbm_to_vmem [thread:$0]  (!%p8498_p2), %s10839_s7, 2048, %s313_s27, [#allocation9], %s8366_s30, %s8366_s30, %s8367_s9  }
  0x7f   : > { %p5876_p4 = scmp.ge.s32.totalorder %s8360_s12, 2 }
  0x81   : > { %325 = sbr.rel (%p5876_p4) target bundleno = 151 (0x97), region = 48 }
  0x88   : > { %s329_s24 = sand.u32 1, %s8356_s11   ;;  %s6094_s26 = sshll.u32 %s8360_s12, 9 }
  0x89   : > { %s5877_s14 = sshll.u32 %s329_s24, 10  ;;  %s339_s30 = scalar_lea.hbm %s10832_s0, %s6094_s26 }
  0x8a   : > { %p11049_p2 = scmp.ne.s32.totalorder %s11037_s19, 0  ;;  %s333_s27 = scalar_lea.vmem [#allocation2], %s5877_s14 }
  0x8b   : > { %s352_s18 = sshll.u32 %s333_s27, 4  ;;  %s8370_s22 = smov 1024   ;;  %s353_s18 = int_to_ptr.vmem [resolvable:$true] %s352_s18 }
  0x8c   : > { %s8004_s9 = scalar_select %p11049_p2, [#allocation0], [#allocation14] }
  0x8d   : > { %8005 = sst [smem:[#allocation13]] (%p11049_p2), %s8370_s22  ;;  %s8371_s15 = smov 512  }
  0x8e   : > { %s344_s21 = sld [smem:[%s8004_s9]]   ;;  %s8372_s17 = smov 4  }
  0x8f   : > { %8006 = sst [smem:[#allocation13 + $0x1]] (%p11049_p2), %s8371_s15  ;;  %s8373_s29 = smov 128  }
  0x90   : > { %8007 = sst [smem:[#allocation13 + $0x2]] (%p11049_p2), %s8372_s17  ;;  %s8374_s28 = smov 8  }
  0x91   : > { %8008 = sst [smem:[#allocation13 + $0x3]] (%p11049_p2), %s8373_s29  ;;  %s330_s1 = scalar_lea.sflag [#allocation3], %s329_s24 }
  0x92   : > { %8009 = sst [smem:[#allocation13 + $0x4]] (%p11049_p2), %s8373_s29  ;;  %s8375_s26 = smov [#allocation12]  }
  0x93   : > { %8010 = sst [smem:[#allocation13 + $0x5]] (%p11049_p2), %s8374_s28 }
  0x94   : > { %s5880_s25 = sshll.u32 %s344_s21, 26 }
  0x95   : > { %s5881_s16 = sadd.s32 134217728, %s5880_s25 }
  0x96   : > { %8011 = dma.general (%p11049_p2), %s339_s30, 16384, %s353_s18, %s330_s1, %s8375_s26, [#allocation13], %s5881_s16, 0  }
  0x97 PF: > { %p11050_p3 = scmp.ne.s32.totalorder %s11043_s23, 0 }
  0x99   : > { %377 = sbr.rel (%p11050_p3) target bundleno = 1924 (0x784), region = 56 }
  0xa0   : > { %s8626_s14 = sand.u32 1, %s8352_s10   ;;  %p11051_p5 = scmp.ne.s32.totalorder %s11038_s20, 0 }
  0xa1   : > { %s5883_s6 = sshll.u32 %s8626_s14, 10  ;;  %s380_s8 = scalar_lea.sflag [#allocation3], %s8626_s14 }
  0xa2   : > { %s8630_s9 = scalar_lea.vmem [#allocation2], %s5883_s6 }
  0xa3   : > { %8331 = dma.done.wait (%p11051_p5), %s380_s8, 16384  }
  0xa4   : > { %8333 = vsyncadd (%p11051_p5), %s380_s8, 4294950912  ;;  %p11052_p6 = scmp.eq.s32.totalorder %s8451_s13, 0 }
  0xa6   : > { %8335 = dma.done.wait (%p11052_p6), [#allocation6], 40960   ;;  %p11053_p11 = pmov %p11052_p6 }
  0xa7   : > { %p11054_p12 = pmov %p11052_p6 }
  0xa8   : > { %8337 = vsyncadd (%p11053_p11), [#allocation6], 4294926336 }
  0xa9   : > { %8339 = dma.done.wait (%p11054_p12), [#allocation9], 12288   ;;  %p11055_p13 = pmov %p11052_p6 }
  0xaa   : > { %v437_v0 = vld [vmem:[#allocation5 + $0x8] sm:$0xff]  ;;  %v439_v1 = vld [vmem:[#allocation5 + $0x18] sm:$0xff]  ;;  %v436_v2 = vld [vmem:[#allocation5] sm:$0xff]  ;;  %s11257_s22 = sld [smem:[#allocation119_spill]]  ;;  %s5888_s15 = sshll.u32 %s8626_s14, 5 }
  0xab   : > { %8341 = vsyncadd (%p11055_p13), [#allocation9], 4294955008  ;;  %v8644_v3 = vpack.c.bf16 %v439_v1, %v437_v0  ;;  %v438_v4 = vld [vmem:[#allocation5 + $0x10] sm:$0xff]  ;;  %v441_v5 = vld [vmem:[#allocation5 + $0x28] sm:$0xff]  ;;  %s11258_s25 = sld [smem:[#allocation120_spill]]  ;;  %s433_s28 = scalar_lea.vmem [#allocation11], %s5888_s15 }
  0xac   : > { %v443_v6 = vld [vmem:[#allocation5 + $0x38] sm:$0xff]  ;;  %v8646_v7 = vpack.c.bf16 %v438_v4, %v436_v2  ;;  %v440_v9 = vld [vmem:[#allocation5 + $0x20] sm:$0xff]  ;;  %v442_v10 = vld [vmem:[#allocation5 + $0x30] sm:$0xff]  ;;  %s11259_s16 = sld [smem:[#allocation22_spill]]  ;;  %s5759_s1 = sshll.u32 %s433_s28, 4  ;;  %s10783_s1 = int_to_ptr.vmem [resolvable:$true] %s5759_s1 }
  0xad   : > { %v8648_v8 = vpack.c.bf16 %v443_v6, %v441_v5  ;;  %v445_v11 = vld [vmem:[#allocation5 + $0x48] sm:$0xff]  ;;  %6301 = vmatprep.subr.bf16.mxu0 %v8644_v3  ;;  %6461 = vmatprep.subr.bf16.mxu1 %v8644_v3  ;;  %v447_v12 = vld [vmem:[#allocation5 + $0x58] sm:$0xff]  ;;  %v8654_v13 = vpack.c.bf16 %v442_v10, %v440_v9  ;;  %v444_v15 = vld [vmem:[#allocation5 + $0x40] sm:$0xff]  ;;  %s6095_s26 = sshll.u32 %s8451_s13, 9  ;;  %s5746_s20 = scalar_lea.sflag [#allocation4], %s8626_s14 }
  0xae   : > { %11056 = vst [vmem:[#allocation24_spill] sm:$0xff] %v8646_v7  ;;  %6303 = vmatpush1.bf16.msra.mxu0 %v8646_v7  ;;  %6463 = vmatpush1.bf16.msra.mxu1 %v8646_v7  ;;  %v8658_v14 = vpack.c.bf16 %v447_v12, %v445_v11  ;;  %v446_v16 = vld [vmem:[#allocation5 + $0x50] sm:$0xff]  ;;  %v449_v17 = vld [vmem:[#allocation5 + $0x68] sm:$0xff]  ;;  %v451_v18 = vld [vmem:[#allocation5 + $0x78] sm:$0xff]  ;;  %s8286_s23 = scalar_lea.vmem %s10783_s1, 512  ;;  %s8377_s13 = smov [#allocation11]  }
  0xaf   : > { %11057 = vst [vmem:[#allocation25_spill] sm:$0xff] %v8648_v8  ;;  %11058 = vst [vmem:[#allocation26_spill] sm:$0xff] %v8654_v13  ;;  %6305 = vmatprep.subr.bf16.mxu0 %v8648_v8  ;;  %6465 = vmatprep.subr.bf16.mxu1 %v8648_v8  ;;  %v8662_v19 = vpack.c.bf16 %v446_v16, %v444_v15  ;;  %v8666_v20 = vpack.c.bf16 %v451_v18, %v449_v17  ;;  %v448_v21 = vld [vmem:[#allocation5 + $0x60] sm:$0xff]  ;;  %v450_v22 = vld [vmem:[#allocation5 + $0x70] sm:$0xff]  ;;  %p8287_p0 = scmp.ne.s32.totalorder %s10783_s1, %s8286_s23  ;;  %s8290_s24 = sshll.u32 %s8377_s13, 4  ;;  %s8291_s24 = int_to_ptr.vmem [resolvable:$false] %s8290_s24 }
  0xb0   : > { %11059 = vst [vmem:[#allocation27_spill] sm:$0xff] %v8658_v14  ;;  %v453_v23 = vld [vmem:[#allocation5 + $0x88] sm:$0xff]  ;;  %v455_v24 = vld [vmem:[#allocation5 + $0x98] sm:$0xff]  ;;  %v8670_v25 = vpack.c.bf16 %v450_v22, %v448_v21  ;;  %v452_v27 = vld [vmem:[#allocation5 + $0x80] sm:$0xff]  ;;  %s8292_s30 = scalar_lea.vmem %s8291_s24, 1024  ;;  %p8293_p10 = scmp.lt.s32.totalorder %s10783_s1, %s8291_s24 }
  0xb1   : > { %11060 = vst [vmem:[#allocation28_spill] sm:$0xff] %v8662_v19  ;;  %11061 = vst [vmem:[#allocation29_spill] sm:$0xff] %v8666_v20  ;;  %v8674_v26 = vpack.c.bf16 %v455_v24, %v453_v23  ;;  %v454_v28 = vld [vmem:[#allocation5 + $0x90] sm:$0xff]  ;;  %v457_v29 = vld [vmem:[#allocation5 + $0xa8] sm:$0xff]  ;;  %p8294_p1 = scmp.lt.s32.totalorder %s8292_s30, %s8286_s23 }
  0xb2   : > { %6307 = vmatpush1.bf16.msra.mxu0 %v8654_v13  ;;  %6467 = vmatpush1.bf16.msra.mxu1 %v8654_v13  ;;  %11062 = vst [vmem:[#allocation30_spill] sm:$0xff] %v8670_v25  ;;  %v459_v30 = vld [vmem:[#allocation5 + $0xb8] sm:$0xff]  ;;  %v8678_v31 = vpack.c.bf16 %v454_v28, %v452_v27  ;;  %v456_v33 = vld [vmem:[#allocation5 + $0xa0] sm:$0xff]  ;;  %v458_v34 = vld [vmem:[#allocation5 + $0xb0] sm:$0xff]  ;;  %p11261_p7 = scmp.ne.s32.totalorder %s11259_s16, 0 }
  0xb3   : > { %6309 = vmatprep.subr.bf16.mxu0 %v8658_v14  ;;  %6469 = vmatprep.subr.bf16.mxu1 %v8658_v14  ;;  %11063 = vst [vmem:[#allocation31_spill] sm:$0xff] %v8674_v26  ;;  %v8682_v32 = vpack.c.bf16 %v459_v30, %v457_v29  ;;  %v461_v35 = vld [vmem:[#allocation5 + $0xc8] sm:$0xff]  ;;  %v463_v36 = vld [vmem:[#allocation5 + $0xd8] sm:$0xff]  ;;  %v8686_v37 = vpack.c.bf16 %v458_v34, %v456_v33  ;;  %v460_v38 = vld [vmem:[#allocation5 + $0xc0] sm:$0xff]  ;;  %p8295_p2 = por %p8294_p1, %p8293_p10 }
  0xb4   : > { %11064 = vst [vmem:[#allocation32_spill] sm:$0xff] %v8678_v31  ;;  %v8690_v39 = vpack.c.bf16 %v463_v36, %v461_v35  ;;  %v462_v40 = vld [vmem:[#allocation5 + $0xd0] sm:$0xff]  ;;  %v8693_v41 = vld [vmem:[%s8630_s9 + $0x100] sm:$0xff]  ;;  %v465_v43 = vld [vmem:[#allocation5 + $0xe8] sm:$0xff]  ;;  %p8288_p8 = pnand %p8287_p0, %p11261_p7 }
  0xb5   : > { %11065 = vst [vmem:[#allocation33_spill] sm:$0xff] %v8682_v32  ;;  %11066 = vst [vmem:[#allocation34_spill] sm:$0xff] %v8686_v37  ;;  %v8696_v42 = vld [vmem:[%s8630_s9 + $0x200] sm:$0xff]  ;;  %v467_v44 = vld [vmem:[#allocation5 + $0xf8] sm:$0xff]  ;;  %805 = vmatprep.mubr.f32.mxu0 %v8693_v41  ;;  %v8702_v45 = vpack.c.bf16 %v462_v40, %v460_v38 }
  0xb6   : > { %6311 = vmatpush1.bf16.msra.mxu0 %v8662_v19  ;;  %6471 = vmatpush1.bf16.msra.mxu1 %v8662_v19  ;;  %11067 = vst [vmem:[#allocation35_spill] sm:$0xff] %v8690_v39  ;;  %v8706_v46 = vpack.c.bf16 %v467_v44, %v465_v43  ;;  %v464_v47 = vld [vmem:[#allocation5 + $0xe0] sm:$0xff]  ;;  %v466_v48 = vld [vmem:[#allocation5 + $0xf0] sm:$0xff]  ;;  %v469_v49 = vld [vmem:[#allocation5 + $0x108] sm:$0xff]  ;;  %p8289_p9 = pneg %p8288_p8 }
  0xb7   : > { %6313 = vmatprep.subr.bf16.mxu0 %v8666_v20  ;;  %6473 = vmatprep.subr.bf16.mxu1 %v8666_v20  ;;  %11068 = vst [vmem:[#allocation36_spill] sm:$0xff] %v8702_v45  ;;  %v471_v50 = vld [vmem:[#allocation5 + $0x118] sm:$0xff]  ;;  %v8710_v51 = vpack.c.bf16 %v466_v48, %v464_v47  ;;  %v468_v53 = vld [vmem:[#allocation5 + $0x100] sm:$0xff]  ;;  %v470_v54 = vld [vmem:[#allocation5 + $0x110] sm:$0xff] }
  0xb8   : > { %1533 = vmatprep.mubr.f32.mxu1 %v8696_v42  ;;  %11069 = vst [vmem:[#allocation37_spill] sm:$0xff] %v8706_v46  ;;  %v8714_v52 = vpack.c.bf16 %v471_v50, %v469_v49  ;;  %v473_v55 = vld [vmem:[#allocation5 + $0x128] sm:$0xff]  ;;  %v475_v56 = vld [vmem:[#allocation5 + $0x138] sm:$0xff]  ;;  %v8718_v57 = vpack.c.bf16 %v470_v54, %v468_v53  ;;  %v472_v59 = vld [vmem:[#allocation5 + $0x120] sm:$0xff]  ;;  %p8296_p3 = pnand %p8295_p2, %p8289_p9 }
  0xb9   : > { %11070 = vst [vmem:[#allocation38_spill] sm:$0xff] %v8710_v51  ;;  %v8722_v58 = vpack.c.bf16 %v475_v56, %v473_v55  ;;  %v474_v60 = vld [vmem:[#allocation5 + $0x130] sm:$0xff]  ;;  %v477_v61 = vld [vmem:[#allocation5 + $0x148] sm:$0xff]  ;;  %v479_v62 = vld [vmem:[#allocation5 + $0x158] sm:$0xff] }
  0xba   : > { %6315 = vmatpush1.bf16.msra.mxu0 %v8670_v25  ;;  %6475 = vmatpush1.bf16.msra.mxu1 %v8670_v25  ;;  %11071 = vst [vmem:[#allocation39_spill] sm:$0xff] %v8714_v52  ;;  %11072 = vst [vmem:[#allocation40_spill] sm:$0xff] %v8718_v57  ;;  %v8726_v63 = vpack.c.bf16 %v474_v60, %v472_v59  ;;  %v8730_v0 = vpack.c.bf16 %v479_v62, %v477_v61  ;;  %v476_v1 = vld [vmem:[#allocation5 + $0x140] sm:$0xff]  ;;  %v478_v2 = vld [vmem:[#allocation5 + $0x150] sm:$0xff] }
  0xbb   : > { %6317 = vmatprep.subr.bf16.mxu0 %v8674_v26  ;;  %6477 = vmatprep.subr.bf16.mxu1 %v8674_v26  ;;  %11073 = vst [vmem:[#allocation41_spill] sm:$0xff] %v8722_v58  ;;  %v481_v4 = vld [vmem:[#allocation5 + $0x168] sm:$0xff]  ;;  %v483_v5 = vld [vmem:[#allocation5 + $0x178] sm:$0xff]  ;;  %v8734_v6 = vpack.c.bf16 %v478_v2, %v476_v1  ;;  %v480_v10 = vld [vmem:[#allocation5 + $0x160] sm:$0xff] }
  0xbc   : > { %11074 = vst [vmem:[#allocation42_spill] sm:$0xff] %v8726_v63  ;;  %11075 = vst [vmem:[#allocation43_spill] sm:$0xff] %v8730_v0  ;;  %v8738_v9 = vpack.c.bf16 %v483_v5, %v481_v4  ;;  %v482_v11 = vld [vmem:[#allocation5 + $0x170] sm:$0xff]  ;;  %v485_v12 = vld [vmem:[#allocation5 + $0x188] sm:$0xff] }
  0xbd   : > { %11076 = vst [vmem:[#allocation44_spill] sm:$0xff] %v8734_v6  ;;  %v487_v15 = vld [vmem:[#allocation5 + $0x198] sm:$0xff]  ;;  %v8742_v16 = vpack.c.bf16 %v482_v11, %v480_v10  ;;  %v484_v18 = vld [vmem:[#allocation5 + $0x180] sm:$0xff]  ;;  %v486_v21 = vld [vmem:[#allocation5 + $0x190] sm:$0xff] }
  0xbe   : > { %6319 = vmatpush1.bf16.msra.mxu0 %v8678_v31  ;;  %6479 = vmatpush1.bf16.msra.mxu1 %v8678_v31  ;;  %11077 = vst [vmem:[#allocation45_spill] sm:$0xff] %v8738_v9  ;;  %v8746_v17 = vpack.c.bf16 %v487_v15, %v485_v12  ;;  %v489_v22 = vld [vmem:[#allocation5 + $0x1a8] sm:$0xff]  ;;  %v491_v23 = vld [vmem:[#allocation5 + $0x1b8] sm:$0xff]  ;;  %v8750_v24 = vpack.c.bf16 %v486_v21, %v484_v18  ;;  %v488_v28 = vld [vmem:[#allocation5 + $0x1a0] sm:$0xff] }
  0xbf   : > { %6321 = vmatprep.subr.bf16.mxu0 %v8682_v32  ;;  %6481 = vmatprep.subr.bf16.mxu1 %v8682_v32  ;;  %11078 = vst [vmem:[#allocation46_spill] sm:$0xff] %v8742_v16  ;;  %v8754_v27 = vpack.c.bf16 %v491_v23, %v489_v22  ;;  %v490_v29 = vld [vmem:[#allocation5 + $0x1b0] sm:$0xff]  ;;  %v493_v30 = vld [vmem:[#allocation5 + $0x1c8] sm:$0xff]  ;;  %v495_v33 = vld [vmem:[#allocation5 + $0x1d8] sm:$0xff] }
  0xc0   : > { %11079 = vst [vmem:[#allocation47_spill] sm:$0xff] %v8746_v17  ;;  %11080 = vst [vmem:[#allocation48_spill] sm:$0xff] %v8750_v24  ;;  %v8758_v34 = vpack.c.bf16 %v490_v29, %v488_v28  ;;  %v8762_v35 = vpack.c.bf16 %v495_v33, %v493_v30  ;;  %v492_v36 = vld [vmem:[#allocation5 + $0x1c0] sm:$0xff]  ;;  %v494_v38 = vld [vmem:[#allocation5 + $0x1d0] sm:$0xff] }
  0xc1   : > { %11081 = vst [vmem:[#allocation49_spill] sm:$0xff] %v8754_v27  ;;  %v497_v40 = vld [vmem:[#allocation5 + $0x1e8] sm:$0xff]  ;;  %v499_v43 = vld [vmem:[#allocation5 + $0x1f8] sm:$0xff]  ;;  %v8766_v44 = vpack.c.bf16 %v494_v38, %v492_v36  ;;  %v496_v48 = vld [vmem:[#allocation5 + $0x1e0] sm:$0xff] }
  0xc2   : > { %6323 = vmatpush1.bf16.msra.mxu0 %v8686_v37  ;;  %6483 = vmatpush1.bf16.msra.mxu1 %v8686_v37  ;;  %11082 = vst [vmem:[#allocation50_spill] sm:$0xff] %v8758_v34  ;;  %11083 = vst [vmem:[#allocation51_spill] sm:$0xff] %v8762_v35  ;;  %v8770_v47 = vpack.c.bf16 %v499_v43, %v497_v40  ;;  %v498_v49 = vld [vmem:[#allocation5 + $0x1f0] sm:$0xff]  ;;  %v501_v50 = vld [vmem:[#allocation5 + $0x208] sm:$0xff] }
  0xc3   : > { %6325 = vmatprep.subr.bf16.mxu0 %v8690_v39  ;;  %6485 = vmatprep.subr.bf16.mxu1 %v8690_v39  ;;  %11084 = vst [vmem:[#allocation52_spill] sm:$0xff] %v8766_v44  ;;  %v503_v53 = vld [vmem:[#allocation5 + $0x218] sm:$0xff]  ;;  %v8774_v54 = vpack.c.bf16 %v498_v49, %v496_v48  ;;  %v500_v56 = vld [vmem:[#allocation5 + $0x200] sm:$0xff]  ;;  %v502_v59 = vld [vmem:[#allocation5 + $0x210] sm:$0xff] }
  0xc4   : > { %11085 = vst [vmem:[#allocation53_spill] sm:$0xff] %v8770_v47  ;;  %v8778_v55 = vpack.c.bf16 %v503_v53, %v501_v50  ;;  %v505_v60 = vld [vmem:[#allocation5 + $0x228] sm:$0xff]  ;;  %v507_v61 = vld [vmem:[#allocation5 + $0x238] sm:$0xff]  ;;  %v597_v62 = vld [vmem:[%s8630_s9] sm:$0xff]  ;;  %v8783_v1 = vpack.c.bf16 %v502_v59, %v500_v56 }
  0xc5   : > { %11086 = vst [vmem:[#allocation54_spill] sm:$0xff] %v8774_v54  ;;  %v5890_v2 = vld [vmem:[%s8630_s9 + $0x108] sm:$0xff]  ;;  %v8791_v5 = vpack.c.bf16 %v507_v61, %v505_v60  ;;  %v504_v10 = vld [vmem:[#allocation5 + $0x220] sm:$0xff]  ;;  %v506_v11 = vld [vmem:[#allocation5 + $0x230] sm:$0xff] }
  0xc6   : > { %6327 = vmatpush1.bf16.msra.mxu0 %v8702_v45  ;;  %6487 = vmatpush1.bf16.msra.mxu1 %v8702_v45  ;;  %11087 = vst [vmem:[#allocation55_spill] sm:$0xff] %v8778_v55  ;;  %11088 = vst [vmem:[#allocation56_spill] sm:$0xff] %v8783_v1  ;;  %v8789_v4 = vld [vmem:[%s8630_s9 + $0x208] sm:$0xff]  ;;  %v511_v15 = vld [vmem:[#allocation5 + $0x258] sm:$0xff]  ;;  %v8802_v23 = vpack.c.bf16 %v506_v11, %v504_v10 }
  0xc7   : > { %6329 = vmatprep.subr.bf16.mxu0 %v8706_v46  ;;  %6489 = vmatprep.subr.bf16.mxu1 %v8706_v46  ;;  %11089 = vst [vmem:[#allocation57_spill] sm:$0xff] %v8791_v5  ;;  %v509_v12 = vld [vmem:[#allocation5 + $0x248] sm:$0xff]  ;;  %v5891_v21 = vld [vmem:[%s8630_s9 + $0x110] sm:$0xff]  ;;  %v508_v28 = vld [vmem:[#allocation5 + $0x240] sm:$0xff] }
  0xc8   : > { %v598_v18 = vld [vmem:[%s8630_s9 + $0x8] sm:$0xff]  ;;  %v8800_v22 = vld [vmem:[%s8630_s9 + $0x210] sm:$0xff]  ;;  %11090 = vst [vmem:[#allocation58_spill] sm:$0xff] %v8802_v23  ;;  %v515_v33 = vld [vmem:[#allocation5 + $0x278] sm:$0xff] }
  0xc9   : > { %v510_v29 = vld [vmem:[#allocation5 + $0x250] sm:$0xff]  ;;  %v513_v30 = vld [vmem:[#allocation5 + $0x268] sm:$0xff]  ;;  %v5892_v38 = vld [vmem:[%s8630_s9 + $0x118] sm:$0xff] }
  0xca   : > { %6331 = vmatpush1.bf16.msra.mxu0 %v8710_v51  ;;  %6491 = vmatpush1.bf16.msra.mxu1 %v8710_v51  ;;  %v599_v36 = vld [vmem:[%s8630_s9 + $0x10] sm:$0xff]  ;;  %v8814_v40 = vld [vmem:[%s8630_s9 + $0x218] sm:$0xff]  ;;  %v8816_v43 = vpack.c.bf16 %v510_v29, %v508_v28  ;;  %v8820_v48 = vpack.c.bf16 %v515_v33, %v513_v30  ;;  %v512_v49 = vld [vmem:[#allocation5 + $0x260] sm:$0xff] }
  0xcb   : > { %6333 = vmatprep.subr.bf16.mxu0 %v8714_v52  ;;  %6493 = vmatprep.subr.bf16.mxu1 %v8714_v52  ;;  %v514_v50 = vld [vmem:[#allocation5 + $0x270] sm:$0xff]  ;;  %v517_v53 = vld [vmem:[#allocation5 + $0x288] sm:$0xff]  ;;  %v519_v56 = vld [vmem:[#allocation5 + $0x298] sm:$0xff] }
  0xcc   : > { %11092 = vst [vmem:[#allocation60_spill] sm:$0xff] %v8816_v43  ;;  %11093 = vst [vmem:[#allocation61_spill] sm:$0xff] %v8820_v48  ;;  %v600_v59 = vld [vmem:[%s8630_s9 + $0x18] sm:$0xff]  ;;  %v5893_v60 = vld [vmem:[%s8630_s9 + $0x120] sm:$0xff] }
  0xcd   : > { %v8827_v61 = vld [vmem:[%s8630_s9 + $0x220] sm:$0xff]  ;;  %v518_v11 = vld [vmem:[#allocation5 + $0x290] sm:$0xff]  ;;  %v8842_v28 = vld [vmem:[%s8630_s9 + $0x228] sm:$0xff] }
  0xce   : > { %6335 = vmatpush1.bf16.msra.mxu0 %v8718_v57  ;;  %6495 = vmatpush1.bf16.msra.mxu1 %v8718_v57  ;;  %v516_v10 = vld [vmem:[#allocation5 + $0x280] sm:$0xff]  ;;  %v9168_v51 = vld [vmem:[%s8630_s9 + $0x1c8] sm:$0xff]  ;;  %v9181_v45 = vld [vmem:[%s8630_s9 + $0x1d0] sm:$0xff] }
  0xcf   : > { %6337 = vmatprep.subr.bf16.mxu0 %v8722_v58  ;;  %6497 = vmatprep.subr.bf16.mxu1 %v8722_v58  ;;  %v8846_v29 = vpack.c.bf16 %v518_v11, %v516_v10  ;;  %v520_v33 = vld [vmem:[#allocation5 + $0x2a0] sm:$0xff]  ;;  %v526_v11 = vld [vmem:[#allocation5 + $0x2d0] sm:$0xff]  ;;  %v9145_v58 = vld [vmem:[%s8630_s9 + $0x2b8] sm:$0xff]  ;;  %11132 = vst [vmem:[#allocation100_spill] sm:$0xff] %v9168_v51 }
  0xd0   : > { %v524_v10 = vld [vmem:[#allocation5 + $0x2c0] sm:$0xff]  ;;  %v9171_v46 = vld [vmem:[%s8630_s9 + $0x2c8] sm:$0xff]  ;;  %11133 = vst [vmem:[#allocation101_spill] sm:$0xff] %v9181_v45  ;;  %v9184_v39 = vld [vmem:[%s8630_s9 + $0x2d0] sm:$0xff] }
  0xd1   : > { %11096 = vst [vmem:[#allocation64_spill] sm:$0xff] %v8846_v29  ;;  %v9155_v57 = vld [vmem:[%s8630_s9 + $0x1c0] sm:$0xff]  ;;  %v9194_v37 = vld [vmem:[%s8630_s9 + $0x1d8] sm:$0xff]  ;;  %v566_v25 = vld [vmem:[#allocation5 + $0x410] sm:$0xff] }
  0xd2   : > { %6339 = vmatpush1.bf16.msra.mxu0 %v8726_v63  ;;  %6499 = vmatpush1.bf16.msra.mxu1 %v8726_v63  ;;  %v9132_v63 = vld [vmem:[%s8630_s9 + $0x2b0] sm:$0xff]  ;;  %11131 = vst [vmem:[#allocation99_spill] sm:$0xff] %v9155_v57  ;;  %v9158_v52 = vld [vmem:[%s8630_s9 + $0x2c0] sm:$0xff]  ;;  %11134 = vst [vmem:[#allocation102_spill] sm:$0xff] %v9194_v37 }
  0xd3   : > { %6341 = vmatprep.subr.bf16.mxu0 %v8730_v0  ;;  %6501 = vmatprep.subr.bf16.mxu1 %v8730_v0  ;;  %v9129_v0 = vld [vmem:[%s8630_s9 + $0x1b0] sm:$0xff]  ;;  %v9197_v32 = vld [vmem:[%s8630_s9 + $0x2d8] sm:$0xff]  ;;  %v9207_v31 = vld [vmem:[%s8630_s9 + $0x300] sm:$0xff] }
  0xd4   : > { %11129 = vst [vmem:[#allocation97_spill] sm:$0xff] %v9129_v0  ;;  %11135 = vst [vmem:[#allocation103_spill] sm:$0xff] %v9197_v32  ;;  %v564_v26 = vld [vmem:[#allocation5 + $0x400] sm:$0xff]  ;;  %v569_v20 = vld [vmem:[#allocation5 + $0x428] sm:$0xff] }
  0xd5   : > { %11136 = vst [vmem:[#allocation104_spill] sm:$0xff] %v9207_v31  ;;  %v571_v19 = vld [vmem:[#allocation5 + $0x438] sm:$0xff]  ;;  %v9216_v14 = vld [vmem:[%s8630_s9 + $0x308] sm:$0xff]  ;;  %v568_v8 = vld [vmem:[#allocation5 + $0x420] sm:$0xff] }
  0xd6   : > { %6343 = vmatpush1.bf16.msra.mxu0 %v8734_v6  ;;  %6503 = vmatpush1.bf16.msra.mxu1 %v8734_v6  ;;  %v9116_v6 = vld [vmem:[%s8630_s9 + $0x1a8] sm:$0xff]  ;;  %11138 = vst [vmem:[#allocation106_spill] sm:$0xff] %v9216_v14  ;;  %v9218_v13 = vpack.c.bf16 %v571_v19, %v569_v20  ;;  %v570_v7 = vld [vmem:[#allocation5 + $0x430] sm:$0xff] }
  0xd7   : > { %6345 = vmatprep.subr.bf16.mxu0 %v8738_v9  ;;  %6505 = vmatprep.subr.bf16.mxu1 %v8738_v9  ;;  %v567_v9 = vld [vmem:[#allocation5 + $0x418] sm:$0xff]  ;;  %11128 = vst [vmem:[#allocation96_spill] sm:$0xff] %v9116_v6  ;;  %v9229_v19 = vpack.c.bf16 %v570_v7, %v568_v8 }
  0xd8   : > { %11139 = vst [vmem:[#allocation107_spill] sm:$0xff] %v9218_v13  ;;  %v9240_v7 = vld [vmem:[%s8630_s9 + $0x318] sm:$0xff] }
  0xd9   : > { %11140 = vst [vmem:[#allocation108_spill] sm:$0xff] %v9229_v19 }
  0xda   : > { %6347 = vmatpush1.bf16.msra.mxu0 %v8742_v16  ;;  %6507 = vmatpush1.bf16.msra.mxu1 %v8742_v16  ;;  %v565_v16 = vld [vmem:[#allocation5 + $0x408] sm:$0xff] }
  0xdb   : > { %6349 = vmatprep.subr.bf16.mxu0 %v8746_v17  ;;  %6509 = vmatprep.subr.bf16.mxu1 %v8746_v17  ;;  %v562_v17 = vld [vmem:[#allocation5 + $0x3f0] sm:$0xff] }
  0xde   : > { %6351 = vmatpush1.bf16.msra.mxu0 %v8750_v24  ;;  %6511 = vmatpush1.bf16.msra.mxu1 %v8750_v24  ;;  %v563_v24 = vld [vmem:[#allocation5 + $0x3f8] sm:$0xff] }
  0xdf   : > { %6353 = vmatprep.subr.bf16.mxu0 %v8754_v27  ;;  %6513 = vmatprep.subr.bf16.mxu1 %v8754_v27  ;;  %v561_v27 = vld [vmem:[#allocation5 + $0x3e8] sm:$0xff] }
  0xe2   : > { %6355 = vmatpush1.bf16.msra.mxu0 %v8758_v34  ;;  %6515 = vmatpush1.bf16.msra.mxu1 %v8758_v34  ;;  %v559_v34 = vld [vmem:[#allocation5 + $0x3d8] sm:$0xff] }
  0xe3   : > { %6357 = vmatprep.subr.bf16.mxu0 %v8762_v35  ;;  %6517 = vmatprep.subr.bf16.mxu1 %v8762_v35  ;;  %v8974_v35 = vld [vmem:[%s8630_s9 + $0x60] sm:$0xff] }
  0xe6   : > { %6359 = vmatpush1.bf16.msra.mxu0 %v8766_v44  ;;  %6519 = vmatpush1.bf16.msra.mxu1 %v8766_v44  ;;  %v555_v44 = vld [vmem:[#allocation5 + $0x3b8] sm:$0xff] }
  0xe7   : > { %6361 = vmatprep.subr.bf16.mxu0 %v8770_v47  ;;  %6521 = vmatprep.subr.bf16.mxu1 %v8770_v47  ;;  %v8957_v47 = vld [vmem:[%s8630_s9 + $0x58] sm:$0xff] }
  0xea   : > { %6363 = vmatpush1.bf16.msra.mxu0 %v8774_v54  ;;  %6523 = vmatpush1.bf16.msra.mxu1 %v8774_v54  ;;  %v551_v54 = vld [vmem:[#allocation5 + $0x398] sm:$0xff] }
  0xeb   : > { %6365 = vmatprep.subr.bf16.mxu0 %v8778_v55  ;;  %6525 = vmatprep.subr.bf16.mxu1 %v8778_v55  ;;  %v8940_v55 = vld [vmem:[%s8630_s9 + $0x50] sm:$0xff] }
  0xed   : > { %806 = vmatmul.mubr.f32.vlgmr.msra.gmra.mrb[0].mxu0 %v597_v62  ;;  %1534 = vmatmul.mubr.f32.vlgmr.msra.gmra.mrb[0].mxu1 %v8693_v41  ;;  %v8806_v41 = vpack.c.bf16 %v511_v15, %v509_v12  ;;  %v8830_v62 = vpack.c.bf16 %v514_v50, %v512_v49  ;;  %v521_v12 = vld [vmem:[#allocation5 + $0x2a8] sm:$0xff]  ;;  %v523_v15 = vld [vmem:[#allocation5 + $0x2b8] sm:$0xff] }
  0xee   : > { %6367 = vmatpush1.bf16.msra.mxu0 %v8783_v1  ;;  %6527 = vmatpush1.bf16.msra.mxu1 %v8783_v1  ;;  %v8850_v30 = vpack.c.bf16 %v523_v15, %v521_v12  ;;  %v527_v49 = vld [vmem:[#allocation5 + $0x2d8] sm:$0xff]  ;;  %v8855_v50 = vld [vmem:[%s8630_s9 + $0x28] sm:$0xff] }
  0xef   : > { %811 = vmatprep.mubr.f32.mxu0 %v5890_v2  ;;  %1539 = vmatprep.mubr.f32.mxu1 %v8789_v4  ;;  %11091 = vst [vmem:[#allocation59_spill] sm:$0xff] %v8806_v41  ;;  %11094 = vst [vmem:[#allocation62_spill] sm:$0xff] %v8830_v62  ;;  %v529_v12 = vld [vmem:[#allocation5 + $0x2e8] sm:$0xff]  ;;  %v531_v15 = vld [vmem:[#allocation5 + $0x2f8] sm:$0xff] }
  0xf0   : > { %6369 = vmatprep.subr.bf16.mxu0 %v8791_v5  ;;  %6529 = vmatprep.subr.bf16.mxu1 %v8791_v5  ;;  %11097 = vst [vmem:[#allocation65_spill] sm:$0xff] %v8850_v30  ;;  %v8923_v5 = vld [vmem:[%s8630_s9 + $0x48] sm:$0xff]  ;;  %v547_v1 = vld [vmem:[#allocation5 + $0x378] sm:$0xff] }
  0xf1   : > { %812 = vmatmul.mubr.f32.gmra.mrb[2].mxu0 %v598_v18  ;;  %1540 = vmatmul.mubr.f32.gmra.mrb[2].mxu1 %v5890_v2  ;;  %v8834_v2 = vpack.c.bf16 %v519_v56, %v517_v53  ;;  %v8838_v18 = vld [vmem:[%s8630_s9 + $0x20] sm:$0xff]  ;;  %v5895_v53 = vld [vmem:[%s8630_s9 + $0x130] sm:$0xff] }
  0xf2   : > { %817 = vmatprep.mubr.f32.mxu0 %v5891_v21  ;;  %1545 = vmatprep.mubr.f32.mxu1 %v8800_v22  ;;  %v8859_v56 = vld [vmem:[%s8630_s9 + $0x230] sm:$0xff] }
  0xf3   : > { %6371 = vmatpush1.bf16.msra.mxu0 %v8802_v23  ;;  %6531 = vmatpush1.bf16.msra.mxu1 %v8802_v23  ;;  %11095 = vst [vmem:[#allocation63_spill] sm:$0xff] %v8834_v2  ;;  %v543_v23 = vld [vmem:[#allocation5 + $0x358] sm:$0xff] }
  0xf4   : > { %6373 = vmatprep.subr.bf16.mxu0 %v8806_v41  ;;  %6533 = vmatprep.subr.bf16.mxu1 %v8806_v41  ;;  %v8906_v41 = vld [vmem:[%s8630_s9 + $0x40] sm:$0xff] }
  0xf5   : > { %818 = vmatmul.mubr.f32.gmra.mrb[4].mxu0 %v599_v36  ;;  %1546 = vmatmul.mubr.f32.gmra.mrb[4].mxu1 %v5891_v21  ;;  %v5894_v21 = vld [vmem:[%s8630_s9 + $0x128] sm:$0xff]  ;;  %v522_v36 = vld [vmem:[#allocation5 + $0x2b0] sm:$0xff] }
  0xf6   : > { %823 = vmatprep.mubr.f32.mxu0 %v5892_v38  ;;  %1551 = vmatprep.mubr.f32.mxu1 %v8814_v40 }
  0xf7   : > { %6375 = vmatpush1.bf16.msra.mxu0 %v8816_v43  ;;  %6535 = vmatpush1.bf16.msra.mxu1 %v8816_v43  ;;  %v539_v43 = vld [vmem:[#allocation5 + $0x338] sm:$0xff] }
  0xf8   : > { %6377 = vmatprep.subr.bf16.mxu0 %v8820_v48  ;;  %6537 = vmatprep.subr.bf16.mxu1 %v8820_v48  ;;  %v8889_v48 = vld [vmem:[%s8630_s9 + $0x38] sm:$0xff] }
  0xf9   : > { %824 = vmatmul.mubr.f32.gmra.mrb[6].mxu0 %v600_v59  ;;  %1552 = vmatmul.mubr.f32.gmra.mrb[6].mxu1 %v5892_v38  ;;  %v525_v38 = vld [vmem:[#allocation5 + $0x2c8] sm:$0xff]  ;;  %v8863_v59 = vpack.c.bf16 %v522_v36, %v520_v33  ;;  %v5896_v33 = vld [vmem:[%s8630_s9 + $0x138] sm:$0xff] }
  0xfa   : > { %829 = vmatprep.mubr.f32.mxu0 %v5893_v60  ;;  %1557 = vmatprep.mubr.f32.mxu1 %v8827_v61  ;;  %v8876_v36 = vld [vmem:[%s8630_s9 + $0x238] sm:$0xff] }
  0xfb   : > { %6379 = vmatpush1.bf16.msra.mxu0 %v8830_v62  ;;  %6539 = vmatpush1.bf16.msra.mxu1 %v8830_v62  ;;  %11098 = vst [vmem:[#allocation66_spill] sm:$0xff] %v8863_v59  ;;  %v535_v62 = vld [vmem:[#allocation5 + $0x318] sm:$0xff] }
  0xfc   : > { %6381 = vmatprep.subr.bf16.mxu0 %v8834_v2  ;;  %6541 = vmatprep.subr.bf16.mxu1 %v8834_v2  ;;  %v8872_v2 = vld [vmem:[%s8630_s9 + $0x30] sm:$0xff] }
  0xfd   : > { %830 = vmatmul.mubr.f32.gmra.mrb[8].mxu0 %v8838_v18  ;;  %1558 = vmatmul.mubr.f32.gmra.mrb[8].mxu1 %v5893_v60  ;;  %v8867_v60 = vpack.c.bf16 %v527_v49, %v525_v38  ;;  %v8880_v38 = vpack.c.bf16 %v526_v11, %v524_v10  ;;  %v528_v49 = vld [vmem:[#allocation5 + $0x2e0] sm:$0xff] }
  0xfe   : > { %835 = vmatprep.mubr.f32.mxu0 %v5894_v21  ;;  %1563 = vmatprep.mubr.f32.mxu1 %v8842_v28  ;;  %v5897_v10 = vld [vmem:[%s8630_s9 + $0x140] sm:$0xff] }
  0xff   : > { %6383 = vmatpush1.bf16.msra.mxu0 %v8846_v29  ;;  %6543 = vmatpush1.bf16.msra.mxu1 %v8846_v29  ;;  %11099 = vst [vmem:[#allocation67_spill] sm:$0xff] %v8867_v60  ;;  %11100 = vst [vmem:[#allocation68_spill] sm:$0xff] %v8880_v38  ;;  %v533_v29 = vld [vmem:[#allocation5 + $0x308] sm:$0xff]  ;;  %v8893_v11 = vld [vmem:[%s8630_s9 + $0x240] sm:$0xff] }
 0x100   : > { %6385 = vmatprep.subr.bf16.mxu0 %v8850_v30  ;;  %6545 = vmatprep.subr.bf16.mxu1 %v8850_v30  ;;  %v530_v30 = vld [vmem:[#allocation5 + $0x2f0] sm:$0xff] }
 0x101   : > { %836 = vmatmul.mubr.f32.gmra.mrb[10].mxu0 %v8855_v50  ;;  %1564 = vmatmul.mubr.f32.gmra.mrb[10].mxu1 %v5894_v21  ;;  %v8884_v21 = vpack.c.bf16 %v531_v15, %v529_v12  ;;  %v8897_v12 = vpack.c.bf16 %v530_v30, %v528_v49  ;;  %v532_v15 = vld [vmem:[#allocation5 + $0x300] sm:$0xff]  ;;  %v5898_v30 = vld [vmem:[%s8630_s9 + $0x148] sm:$0xff] }
 0x102   : > { %841 = vmatprep.mubr.f32.mxu0 %v5895_v53  ;;  %1569 = vmatprep.mubr.f32.mxu1 %v8859_v56  ;;  %v8910_v49 = vld [vmem:[%s8630_s9 + $0x248] sm:$0xff] }
 0x103   : > { %6387 = vmatpush1.bf16.msra.mxu0 %v8863_v59  ;;  %6547 = vmatpush1.bf16.msra.mxu1 %v8863_v59  ;;  %11101 = vst [vmem:[#allocation69_spill] sm:$0xff] %v8884_v21  ;;  %11102 = vst [vmem:[#allocation70_spill] sm:$0xff] %v8897_v12  ;;  %v537_v59 = vld [vmem:[#allocation5 + $0x328] sm:$0xff] }
 0x104   : > { %6389 = vmatprep.subr.bf16.mxu0 %v8867_v60  ;;  %6549 = vmatprep.subr.bf16.mxu1 %v8867_v60  ;;  %v534_v60 = vld [vmem:[#allocation5 + $0x310] sm:$0xff] }
 0x105   : > { %842 = vmatmul.mubr.f32.gmra.mrb[12].mxu0 %v8872_v2  ;;  %1570 = vmatmul.mubr.f32.gmra.mrb[12].mxu1 %v5895_v53  ;;  %v8901_v53 = vpack.c.bf16 %v535_v62, %v533_v29  ;;  %v8914_v62 = vpack.c.bf16 %v534_v60, %v532_v15  ;;  %v8918_v29 = vpack.c.bf16 %v539_v43, %v537_v59  ;;  %v5899_v60 = vld [vmem:[%s8630_s9 + $0x150] sm:$0xff] }
 0x106   : > { %847 = vmatprep.mubr.f32.mxu0 %v5896_v33  ;;  %1575 = vmatprep.mubr.f32.mxu1 %v8876_v36  ;;  %v8927_v15 = vld [vmem:[%s8630_s9 + $0x250] sm:$0xff] }
 0x107   : > { %6391 = vmatpush1.bf16.msra.mxu0 %v8880_v38  ;;  %6551 = vmatpush1.bf16.msra.mxu1 %v8880_v38  ;;  %11103 = vst [vmem:[#allocation71_spill] sm:$0xff] %v8901_v53  ;;  %11104 = vst [vmem:[#allocation72_spill] sm:$0xff] %v8914_v62  ;;  %v541_v38 = vld [vmem:[#allocation5 + $0x348] sm:$0xff] }
 0x108   : > { %6393 = vmatprep.subr.bf16.mxu0 %v8884_v21  ;;  %6553 = vmatprep.subr.bf16.mxu1 %v8884_v21  ;;  %11105 = vst [vmem:[#allocation73_spill] sm:$0xff] %v8918_v29  ;;  %v538_v21 = vld [vmem:[#allocation5 + $0x330] sm:$0xff]  ;;  %v8935_v59 = vpack.c.bf16 %v543_v23, %v541_v38 }
 0x109   : > { %848 = vmatmul.mubr.f32.gmra.mrb[14].mxu0 %v8889_v48  ;;  %1576 = vmatmul.mubr.f32.gmra.mrb[14].mxu1 %v5896_v33  ;;  %v536_v33 = vld [vmem:[#allocation5 + $0x320] sm:$0xff] }
 0x10a   : > { %853 = vmatprep.mubr.f32.mxu0 %v5897_v10  ;;  %1581 = vmatprep.mubr.f32.mxu1 %v8893_v11  ;;  %v8931_v43 = vpack.c.bf16 %v538_v21, %v536_v33  ;;  %11107 = vst [vmem:[#allocation75_spill] sm:$0xff] %v8935_v59  ;;  %v5900_v21 = vld [vmem:[%s8630_s9 + $0x158] sm:$0xff] }
 0x10b   : > { %6395 = vmatpush1.bf16.msra.mxu0 %v8897_v12  ;;  %6555 = vmatpush1.bf16.msra.mxu1 %v8897_v12  ;;  %v545_v12 = vld [vmem:[#allocation5 + $0x368] sm:$0xff]  ;;  %v8944_v33 = vld [vmem:[%s8630_s9 + $0x258] sm:$0xff] }
 0x10c   : > { %6397 = vmatprep.subr.bf16.mxu0 %v8901_v53  ;;  %6557 = vmatprep.subr.bf16.mxu1 %v8901_v53  ;;  %11106 = vst [vmem:[#allocation74_spill] sm:$0xff] %v8931_v43  ;;  %v542_v53 = vld [vmem:[#allocation5 + $0x350] sm:$0xff]  ;;  %v8952_v38 = vpack.c.bf16 %v547_v1, %v545_v12 }
 0x10d   : > { %854 = vmatmul.mubr.f32.gmra.mrb[16].mxu0 %v8906_v41  ;;  %1582 = vmatmul.mubr.f32.gmra.mrb[16].mxu1 %v5897_v10  ;;  %v540_v10 = vld [vmem:[#allocation5 + $0x340] sm:$0xff] }
 0x10e   : > { %859 = vmatprep.mubr.f32.mxu0 %v5898_v30  ;;  %1587 = vmatprep.mubr.f32.mxu1 %v8910_v49  ;;  %v8948_v23 = vpack.c.bf16 %v542_v53, %v540_v10  ;;  %11109 = vst [vmem:[#allocation77_spill] sm:$0xff] %v8952_v38  ;;  %v5901_v53 = vld [vmem:[%s8630_s9 + $0x160] sm:$0xff] }
 0x10f   : > { %6399 = vmatpush1.bf16.msra.mxu0 %v8914_v62  ;;  %6559 = vmatpush1.bf16.msra.mxu1 %v8914_v62  ;;  %v549_v62 = vld [vmem:[#allocation5 + $0x388] sm:$0xff]  ;;  %v8961_v10 = vld [vmem:[%s8630_s9 + $0x260] sm:$0xff] }
 0x110   : > { %6401 = vmatprep.subr.bf16.mxu0 %v8918_v29  ;;  %6561 = vmatprep.subr.bf16.mxu1 %v8918_v29  ;;  %11108 = vst [vmem:[#allocation76_spill] sm:$0xff] %v8948_v23  ;;  %v546_v29 = vld [vmem:[#allocation5 + $0x370] sm:$0xff]  ;;  %v8969_v12 = vpack.c.bf16 %v551_v54, %v549_v62 }
 0x111   : > { %860 = vmatmul.mubr.f32.gmra.mrb[18].mxu0 %v8923_v5  ;;  %1588 = vmatmul.mubr.f32.gmra.mrb[18].mxu1 %v5898_v30  ;;  %v544_v30 = vld [vmem:[#allocation5 + $0x360] sm:$0xff] }
 0x112   : > { %865 = vmatprep.mubr.f32.mxu0 %v5899_v60  ;;  %1593 = vmatprep.mubr.f32.mxu1 %v8927_v15  ;;  %v8965_v1 = vpack.c.bf16 %v546_v29, %v544_v30  ;;  %11111 = vst [vmem:[#allocation79_spill] sm:$0xff] %v8969_v12  ;;  %v8977_v29 = vld [vmem:[%s8630_s9 + $0x168] sm:$0xff] }
 0x113   : > { %6403 = vmatpush1.bf16.msra.mxu0 %v8931_v43  ;;  %6563 = vmatpush1.bf16.msra.mxu1 %v8931_v43  ;;  %v553_v43 = vld [vmem:[#allocation5 + $0x3a8] sm:$0xff]  ;;  %11112 = vst [vmem:[#allocation80_spill] sm:$0xff] %v8977_v29 }
 0x114   : > { %6405 = vmatprep.subr.bf16.mxu0 %v8935_v59  ;;  %6565 = vmatprep.subr.bf16.mxu1 %v8935_v59  ;;  %11110 = vst [vmem:[#allocation78_spill] sm:$0xff] %v8965_v1  ;;  %v550_v59 = vld [vmem:[#allocation5 + $0x390] sm:$0xff]  ;;  %v8980_v30 = vld [vmem:[%s8630_s9 + $0x268] sm:$0xff]  ;;  %v8988_v62 = vpack.c.bf16 %v555_v44, %v553_v43 }
 0x115   : > { %866 = vmatmul.mubr.f32.gmra.mrb[20].mxu0 %v8940_v55  ;;  %1594 = vmatmul.mubr.f32.gmra.mrb[20].mxu1 %v5899_v60  ;;  %v548_v60 = vld [vmem:[#allocation5 + $0x380] sm:$0xff] }
 0x116   : > { %871 = vmatprep.mubr.f32.mxu0 %v5900_v21  ;;  %1599 = vmatprep.mubr.f32.mxu1 %v8944_v33  ;;  %v8984_v54 = vpack.c.bf16 %v550_v59, %v548_v60  ;;  %11114 = vst [vmem:[#allocation82_spill] sm:$0xff] %v8988_v62  ;;  %v8997_v59 = vld [vmem:[%s8630_s9 + $0x170] sm:$0xff] }
 0x117   : > { %6407 = vmatpush1.bf16.msra.mxu0 %v8948_v23  ;;  %6567 = vmatpush1.bf16.msra.mxu1 %v8948_v23  ;;  %v557_v23 = vld [vmem:[#allocation5 + $0x3c8] sm:$0xff]  ;;  %11115 = vst [vmem:[#allocation83_spill] sm:$0xff] %v8997_v59  ;;  %v9000_v60 = vld [vmem:[%s8630_s9 + $0x270] sm:$0xff] }
 0x118   : > { %6409 = vmatprep.subr.bf16.mxu0 %v8952_v38  ;;  %6569 = vmatprep.subr.bf16.mxu1 %v8952_v38  ;;  %11113 = vst [vmem:[#allocation81_spill] sm:$0xff] %v8984_v54  ;;  %v554_v38 = vld [vmem:[#allocation5 + $0x3b0] sm:$0xff]  ;;  %v9008_v43 = vpack.c.bf16 %v559_v34, %v557_v23  ;;  %v9029_v23 = vpack.c.bf16 %v563_v24, %v561_v27  ;;  %v9042_v24 = vld [vmem:[%s8630_s9 + $0x280] sm:$0xff] }
 0x119   : > { %872 = vmatmul.mubr.f32.gmra.mrb[22].mxu0 %v8957_v47  ;;  %1600 = vmatmul.mubr.f32.gmra.mrb[22].mxu1 %v5900_v21  ;;  %v552_v21 = vld [vmem:[#allocation5 + $0x3a0] sm:$0xff] }
 0x11a   : > { %877 = vmatprep.mubr.f32.mxu0 %v5901_v53  ;;  %1605 = vmatprep.mubr.f32.mxu1 %v8961_v10  ;;  %v9004_v44 = vpack.c.bf16 %v554_v38, %v552_v21  ;;  %11117 = vst [vmem:[#allocation85_spill] sm:$0xff] %v9008_v43  ;;  %v9015_v38 = vld [vmem:[%s8630_s9 + $0x70] sm:$0xff]  ;;  %v9018_v21 = vld [vmem:[%s8630_s9 + $0x178] sm:$0xff]  ;;  %11120 = vst [vmem:[#allocation88_spill] sm:$0xff] %v9029_v23 }
 0x11b   : > { %6411 = vmatpush1.bf16.msra.mxu0 %v8965_v1  ;;  %6571 = vmatpush1.bf16.msra.mxu1 %v8965_v1  ;;  %v8994_v1 = vld [vmem:[%s8630_s9 + $0x68] sm:$0xff]  ;;  %11118 = vst [vmem:[#allocation86_spill] sm:$0xff] %v9018_v21 }
 0x11c   : > { %6413 = vmatprep.subr.bf16.mxu0 %v8969_v12  ;;  %6573 = vmatprep.subr.bf16.mxu1 %v8969_v12  ;;  %11116 = vst [vmem:[#allocation84_spill] sm:$0xff] %v9004_v44  ;;  %v558_v12 = vld [vmem:[#allocation5 + $0x3d0] sm:$0xff] }
 0x11d   : > { %878 = vmatmul.mubr.f32.gmra.mrb[24].mxu0 %v8974_v35  ;;  %1606 = vmatmul.mubr.f32.gmra.mrb[24].mxu1 %v5901_v53  ;;  %v556_v53 = vld [vmem:[#allocation5 + $0x3c0] sm:$0xff] }
 0x11e   : > { %883 = vmatprep.mubr.f32.mxu0 %v8977_v29  ;;  %1611 = vmatprep.mubr.f32.mxu1 %v8980_v30  ;;  %v9025_v34 = vpack.c.bf16 %v558_v12, %v556_v53  ;;  %v9036_v12 = vld [vmem:[%s8630_s9 + $0x78] sm:$0xff]  ;;  %v9039_v53 = vld [vmem:[%s8630_s9 + $0x180] sm:$0xff] }
 0x11f   : > { %6415 = vmatpush1.bf16.msra.mxu0 %v8984_v54  ;;  %6575 = vmatpush1.bf16.msra.mxu1 %v8984_v54  ;;  %v560_v54 = vld [vmem:[#allocation5 + $0x3e0] sm:$0xff]  ;;  %11121 = vst [vmem:[#allocation89_spill] sm:$0xff] %v9039_v53 }
 0x120   : > { %6417 = vmatprep.subr.bf16.mxu0 %v8988_v62  ;;  %6577 = vmatprep.subr.bf16.mxu1 %v8988_v62  ;;  %v9021_v62 = vld [vmem:[%s8630_s9 + $0x278] sm:$0xff]  ;;  %11119 = vst [vmem:[#allocation87_spill] sm:$0xff] %v9025_v34  ;;  %v9046_v27 = vpack.c.bf16 %v562_v17, %v560_v54  ;;  %v9060_v17 = vld [vmem:[%s8630_s9 + $0x188] sm:$0xff] }
 0x121   : > { %884 = vmatmul.mubr.f32.gmra.mrb[26].mxu0 %v8994_v1  ;;  %1612 = vmatmul.mubr.f32.gmra.mrb[26].mxu1 %v8977_v29  ;;  %11124 = vst [vmem:[#allocation92_spill] sm:$0xff] %v9060_v17  ;;  %v9063_v54 = vld [vmem:[%s8630_s9 + $0x288] sm:$0xff]  ;;  %v9142_v29 = vld [vmem:[%s8630_s9 + $0x1b8] sm:$0xff] }
 0x122   : > { %889 = vmatprep.mubr.f32.mxu0 %v8997_v59  ;;  %1617 = vmatprep.mubr.f32.mxu1 %v9000_v60  ;;  %11122 = vst [vmem:[#allocation90_spill] sm:$0xff] %v9046_v27  ;;  %11130 = vst [vmem:[#allocation98_spill] sm:$0xff] %v9142_v29 }
 0x123   : > { %6419 = vmatpush1.bf16.msra.mxu0 %v9004_v44  ;;  %6579 = vmatpush1.bf16.msra.mxu1 %v9004_v44  ;;  %v9093_v44 = vld [vmem:[%s8630_s9 + $0x298] sm:$0xff] }
 0x124   : > { %6421 = vmatprep.subr.bf16.mxu0 %v9008_v43  ;;  %6581 = vmatprep.subr.bf16.mxu1 %v9008_v43  ;;  %v9050_v43 = vpack.c.bf16 %v567_v9, %v565_v16  ;;  %v9074_v9 = vld [vmem:[%s8630_s9 + $0x88] sm:$0xff]  ;;  %v9077_v16 = vld [vmem:[%s8630_s9 + $0x190] sm:$0xff] }
 0x125   : > { %890 = vmatmul.mubr.f32.gmra.mrb[28].mxu0 %v9015_v38  ;;  %1618 = vmatmul.mubr.f32.gmra.mrb[28].mxu1 %v8997_v59  ;;  %11125 = vst [vmem:[#allocation93_spill] sm:$0xff] %v9077_v16  ;;  %v9119_v59 = vld [vmem:[%s8630_s9 + $0x2a8] sm:$0xff] }
 0x126   : > { %895 = vmatprep.mubr.f32.mxu0 %v9018_v21  ;;  %1623 = vmatprep.mubr.f32.mxu1 %v9021_v62  ;;  %11123 = vst [vmem:[#allocation91_spill] sm:$0xff] %v9050_v43 }
 0x127   : > { %6423 = vmatpush1.bf16.msra.mxu0 %v9025_v34  ;;  %6583 = vmatpush1.bf16.msra.mxu1 %v9025_v34  ;;  %v9057_v34 = vld [vmem:[%s8630_s9 + $0x80] sm:$0xff] }
 0x128   : > { %6425 = vmatprep.subr.bf16.mxu0 %v9029_v23  ;;  %6585 = vmatprep.subr.bf16.mxu1 %v9029_v23  ;;  %v9090_v23 = vld [vmem:[%s8630_s9 + $0x198] sm:$0xff] }
 0x129   : > { %896 = vmatmul.mubr.f32.gmra.mrb[30].mxu0 %v9036_v12  ;;  %1624 = vmatmul.mubr.f32.gmra.mrb[30].mxu1 %v9018_v21  ;;  %11126 = vst [vmem:[#allocation94_spill] sm:$0xff] %v9090_v23  ;;  %v9106_v21 = vld [vmem:[%s8630_s9 + $0x2a0] sm:$0xff] }
 0x12a   : > { %901 = vmatprep.mubr.f32.mxu0 %v9039_v53  ;;  %1629 = vmatprep.mubr.f32.mxu1 %v9042_v24 }
 0x12b   : > { %6427 = vmatpush1.bf16.msra.mxu0 %v9046_v27  ;;  %6587 = vmatpush1.bf16.msra.mxu1 %v9046_v27  ;;  %v9080_v27 = vld [vmem:[%s8630_s9 + $0x290] sm:$0xff] }
 0x12c   : > { %6429 = vmatprep.subr.bf16.mxu0 %v9050_v43  ;;  %6589 = vmatprep.subr.bf16.mxu1 %v9050_v43  ;;  %v9087_v43 = vld [vmem:[%s8630_s9 + $0x90] sm:$0xff] }
 0x12d   : > { %902 = vmatmul.mubr.f32.gmra.mrb[32].mxu0 %v9057_v34  ;;  %1630 = vmatmul.mubr.f32.gmra.mrb[32].mxu1 %v9039_v53  ;;  %v9103_v53 = vld [vmem:[%s8630_s9 + $0x1a0] sm:$0xff] }
 0x12e   : > { %907 = vmatprep.mubr.f32.mxu0 %v9060_v17  ;;  %1635 = vmatprep.mubr.f32.mxu1 %v9063_v54  ;;  %11127 = vst [vmem:[#allocation95_spill] sm:$0xff] %v9103_v53 }
 0x131   : > { %908 = vmatmul.mubr.f32.gmra.mrb[34].mxu0 %v9074_v9  ;;  %1636 = vmatmul.mubr.f32.gmra.mrb[34].mxu1 %v9060_v17  ;;  %v9100_v17 = vld [vmem:[%s8630_s9 + $0x98] sm:$0xff] }
 0x132   : > { %913 = vmatprep.mubr.f32.mxu0 %v9077_v16  ;;  %1641 = vmatprep.mubr.f32.mxu1 %v9080_v27 }
 0x135   : > { %914 = vmatmul.mubr.f32.gmra.mrb[36].mxu0 %v9087_v43  ;;  %1642 = vmatmul.mubr.f32.gmra.mrb[36].mxu1 %v9077_v16  ;;  %v9113_v16 = vld [vmem:[%s8630_s9 + $0xa0] sm:$0xff] }
 0x136   : > { %919 = vmatprep.mubr.f32.mxu0 %v9090_v23  ;;  %1647 = vmatprep.mubr.f32.mxu1 %v9093_v44 }
 0x139   : > { %920 = vmatmul.mubr.f32.gmra.mrb[38].mxu0 %v9100_v17  ;;  %1648 = vmatmul.mubr.f32.gmra.mrb[38].mxu1 %v9090_v23  ;;  %v9126_v23 = vld [vmem:[%s8630_s9 + $0xa8] sm:$0xff] }
 0x13a   : > { %925 = vmatprep.mubr.f32.mxu0 %v9103_v53  ;;  %1653 = vmatprep.mubr.f32.mxu1 %v9106_v21 }
 0x13d   : > { %926 = vmatmul.mubr.f32.gmra.mrb[40].mxu0 %v9113_v16  ;;  %1654 = vmatmul.mubr.f32.gmra.mrb[40].mxu1 %v9103_v53  ;;  %v9139_v53 = vld [vmem:[%s8630_s9 + $0xb0] sm:$0xff] }
 0x13e   : > { %931 = vmatprep.mubr.f32.mxu0 %v9116_v6  ;;  %1659 = vmatprep.mubr.f32.mxu1 %v9119_v59 }
 0x141   : > { %932 = vmatmul.mubr.f32.gmra.mrb[42].mxu0 %v9126_v23  ;;  %1660 = vmatmul.mubr.f32.gmra.mrb[42].mxu1 %v9116_v6  ;;  %v9152_v6 = vld [vmem:[%s8630_s9 + $0xb8] sm:$0xff] }
 0x142   : > { %937 = vmatprep.mubr.f32.mxu0 %v9129_v0  ;;  %1665 = vmatprep.mubr.f32.mxu1 %v9132_v63 }
 0x145   : > { %938 = vmatmul.mubr.f32.gmra.mrb[44].mxu0 %v9139_v53  ;;  %1666 = vmatmul.mubr.f32.gmra.mrb[44].mxu1 %v9129_v0  ;;  %v9165_v0 = vld [vmem:[%s8630_s9 + $0xc0] sm:$0xff] }
 0x146   : > { %943 = vmatprep.mubr.f32.mxu0 %v9142_v29  ;;  %1671 = vmatprep.mubr.f32.mxu1 %v9145_v58 }
 0x149   : > { %944 = vmatmul.mubr.f32.gmra.mrb[46].mxu0 %v9152_v6  ;;  %1672 = vmatmul.mubr.f32.gmra.mrb[46].mxu1 %v9142_v29  ;;  %v9178_v29 = vld [vmem:[%s8630_s9 + $0xc8] sm:$0xff] }
 0x14a   : > { %949 = vmatprep.mubr.f32.mxu0 %v9155_v57  ;;  %1677 = vmatprep.mubr.f32.mxu1 %v9158_v52 }
 0x14d   : > { %950 = vmatmul.mubr.f32.gmra.mrb[48].mxu0 %v9165_v0  ;;  %1678 = vmatmul.mubr.f32.gmra.mrb[48].mxu1 %v9155_v57  ;;  %v9191_v57 = vld [vmem:[%s8630_s9 + $0xd0] sm:$0xff] }
 0x14e   : > { %955 = vmatprep.mubr.f32.mxu0 %v9168_v51  ;;  %1683 = vmatprep.mubr.f32.mxu1 %v9171_v46 }
 0x151   : > { %956 = vmatmul.mubr.f32.gmra.mrb[50].mxu0 %v9178_v29  ;;  %1684 = vmatmul.mubr.f32.gmra.mrb[50].mxu1 %v9168_v51  ;;  %v9204_v51 = vld [vmem:[%s8630_s9 + $0xd8] sm:$0xff] }
 0x152   : > { %961 = vmatprep.mubr.f32.mxu0 %v9181_v45  ;;  %1689 = vmatprep.mubr.f32.mxu1 %v9184_v39 }
 0x155   : > { %962 = vmatmul.mubr.f32.gmra.mrb[52].mxu0 %v9191_v57  ;;  %1690 = vmatmul.mubr.f32.gmra.mrb[52].mxu1 %v9181_v45  ;;  %v9213_v45 = vpack.c.bf16 %v566_v25, %v564_v26  ;;  %v9227_v25 = vld [vmem:[%s8630_s9 + $0x310] sm:$0xff]  ;;  %v572_v26 = vld [vmem:[#allocation5 + $0x440] sm:$0xff] }
 0x156   : > { %967 = vmatprep.mubr.f32.mxu0 %v9194_v37  ;;  %1695 = vmatprep.mubr.f32.mxu1 %v9197_v32  ;;  %v575_v32 = vld [vmem:[#allocation5 + $0x458] sm:$0xff] }
 0x157   : > { %11137 = vst [vmem:[#allocation105_spill] sm:$0xff] %v9213_v45 }
 0x159   : > { %968 = vmatmul.mubr.f32.gmra.mrb[54].mxu0 %v9204_v51  ;;  %1696 = vmatmul.mubr.f32.gmra.mrb[54].mxu1 %v9194_v37  ;;  %v573_v37 = vld [vmem:[#allocation5 + $0x448] sm:$0xff] }
 0x15a   : > { %1038 = vmatprep.mubr.f32.mxu0 %v9207_v31  ;;  %1766 = vmatprep.mubr.f32.mxu1 %v8838_v18  ;;  %v9233_v20 = vpack.c.bf16 %v575_v32, %v573_v37  ;;  %v576_v37 = vld [vmem:[#allocation5 + $0x460] sm:$0xff] }
 0x15c   : > { %11141 = vst [vmem:[#allocation109_spill] sm:$0xff] %v9233_v20 }
 0x15d   : > { %1039 = vmatmul.mubr.f32.vlgmr.msra.gmra.mrb[0].mxu0 %v8696_v42  ;;  %1767 = vmatmul.mubr.f32.vlgmr.msra.gmra.mrb[0].mxu1 %v9207_v31  ;;  %v574_v42 = vld [vmem:[#allocation5 + $0x450] sm:$0xff]  ;;  %v579_v31 = vld [vmem:[#allocation5 + $0x478] sm:$0xff] }
 0x15e   : > { %6431 = vmatpush1.bf16.msra.mxu0 %v9213_v45  ;;  %6591 = vmatpush1.bf16.msra.mxu1 %v9213_v45  ;;  %v577_v45 = vld [vmem:[#allocation5 + $0x468] sm:$0xff]  ;;  %v9244_v8 = vpack.c.bf16 %v574_v42, %v572_v26  ;;  %v9255_v26 = vld [vmem:[%s8630_s9 + $0x320] sm:$0xff]  ;;  %v582_v42 = vld [vmem:[#allocation5 + $0x490] sm:$0xff] }
 0x15f   : > { %1044 = vmatprep.mubr.f32.mxu0 %v9216_v14  ;;  %1772 = vmatprep.mubr.f32.mxu1 %v8855_v50  ;;  %v9248_v32 = vpack.c.bf16 %v579_v31, %v577_v45 }
 0x160   : > { %6433 = vmatprep.subr.bf16.mxu0 %v9218_v13  ;;  %6593 = vmatprep.subr.bf16.mxu1 %v9218_v13  ;;  %11142 = vst [vmem:[#allocation110_spill] sm:$0xff] %v9244_v8  ;;  %v581_v13 = vld [vmem:[#allocation5 + $0x488] sm:$0xff] }
 0x161   : > { %1045 = vmatmul.mubr.f32.gmra.mrb[2].mxu0 %v8789_v4  ;;  %1773 = vmatmul.mubr.f32.gmra.mrb[2].mxu1 %v9216_v14  ;;  %11143 = vst [vmem:[#allocation111_spill] sm:$0xff] %v9248_v32  ;;  %v578_v4 = vld [vmem:[#allocation5 + $0x470] sm:$0xff]  ;;  %v583_v14 = vld [vmem:[#allocation5 + $0x498] sm:$0xff] }
 0x162   : > { %1050 = vmatprep.mubr.f32.mxu0 %v9227_v25  ;;  %1778 = vmatprep.mubr.f32.mxu1 %v8872_v2  ;;  %v9259_v31 = vpack.c.bf16 %v578_v4, %v576_v37  ;;  %v9263_v45 = vpack.c.bf16 %v583_v14, %v581_v13  ;;  %v9270_v37 = vld [vmem:[%s8630_s9 + $0x328] sm:$0xff]  ;;  %v586_v4 = vld [vmem:[#allocation5 + $0x4b0] sm:$0xff] }
 0x163   : > { %6435 = vmatpush1.bf16.msra.mxu0 %v9229_v19  ;;  %6595 = vmatpush1.bf16.msra.mxu1 %v9229_v19  ;;  %v587_v19 = vld [vmem:[#allocation5 + $0x4b8] sm:$0xff] }
 0x164   : > { %6437 = vmatprep.subr.bf16.mxu0 %v9233_v20  ;;  %6597 = vmatprep.subr.bf16.mxu1 %v9233_v20  ;;  %11144 = vst [vmem:[#allocation112_spill] sm:$0xff] %v9259_v31  ;;  %11145 = vst [vmem:[#allocation113_spill] sm:$0xff] %v9263_v45  ;;  %v585_v20 = vld [vmem:[#allocation5 + $0x4a8] sm:$0xff] }
 0x165   : > { %1051 = vmatmul.mubr.f32.gmra.mrb[4].mxu0 %v8800_v22  ;;  %1779 = vmatmul.mubr.f32.gmra.mrb[4].mxu1 %v9227_v25  ;;  %v580_v22 = vld [vmem:[#allocation5 + $0x480] sm:$0xff]  ;;  %v9278_v14 = vpack.c.bf16 %v587_v19, %v585_v20 }
 0x166   : > { %1056 = vmatprep.mubr.f32.mxu0 %v9240_v7  ;;  %1784 = vmatprep.mubr.f32.mxu1 %v8889_v48  ;;  %v9274_v13 = vpack.c.bf16 %v582_v42, %v580_v22  ;;  %v9285_v22 = vld [vmem:[%s8630_s9 + $0x330] sm:$0xff]  ;;  %v588_v20 = vld [vmem:[#allocation5 + $0x4c0] sm:$0xff] }
 0x167   : > { %6439 = vmatpush1.bf16.msra.mxu0 %v9244_v8  ;;  %6599 = vmatpush1.bf16.msra.mxu1 %v9244_v8  ;;  %v591_v8 = vld [vmem:[#allocation5 + $0x4d8] sm:$0xff]  ;;  %v590_v42 = vld [vmem:[#allocation5 + $0x4d0] sm:$0xff] }
 0x168   : > { %6441 = vmatprep.subr.bf16.mxu0 %v9248_v32  ;;  %6601 = vmatprep.subr.bf16.mxu1 %v9248_v32  ;;  %v589_v32 = vld [vmem:[#allocation5 + $0x4c8] sm:$0xff] }
 0x169   : > { %1057 = vmatmul.mubr.f32.gmra.mrb[6].mxu0 %v8814_v40  ;;  %1785 = vmatmul.mubr.f32.gmra.mrb[6].mxu1 %v9240_v7  ;;  %v584_v40 = vld [vmem:[#allocation5 + $0x4a0] sm:$0xff] }
 0x16a   : > { %1062 = vmatprep.mubr.f32.mxu0 %v9255_v26  ;;  %1790 = vmatprep.mubr.f32.mxu1 %v8906_v41  ;;  %v9289_v19 = vpack.c.bf16 %v586_v4, %v584_v40  ;;  %v9300_v40 = vld [vmem:[%s8630_s9 + $0x338] sm:$0xff]  ;;  %v594_v4 = vld [vmem:[#allocation5 + $0x4f0] sm:$0xff] }
 0x16b   : > { %6443 = vmatpush1.bf16.msra.mxu0 %v9259_v31  ;;  %6603 = vmatpush1.bf16.msra.mxu1 %v9259_v31  ;;  %v595_v31 = vld [vmem:[#allocation5 + $0x4f8] sm:$0xff] }
 0x16c   : > { %6445 = vmatprep.subr.bf16.mxu0 %v9263_v45  ;;  %6605 = vmatprep.subr.bf16.mxu1 %v9263_v45  ;;  %11146 = vst [vmem:[#allocation114_spill] sm:$0xff] %v9289_v19  ;;  %v593_v45 = vld [vmem:[#allocation5 + $0x4e8] sm:$0xff] }
 0x16d   : > { %1063 = vmatmul.mubr.f32.gmra.mrb[8].mxu0 %v8827_v61  ;;  %1791 = vmatmul.mubr.f32.gmra.mrb[8].mxu1 %v9255_v26  ;;  %v9293_v61 = vpack.c.bf16 %v591_v8, %v589_v32  ;;  %v9304_v8 = vpack.c.bf16 %v590_v42, %v588_v20  ;;  %v592_v32 = vld [vmem:[#allocation5 + $0x4e0] sm:$0xff]  ;;  %v9470_v42 = vld [vmem:[%s8630_s9 + $0xf8] sm:$0xff] }
 0x16e   : > { %1068 = vmatprep.mubr.f32.mxu0 %v9270_v37  ;;  %1796 = vmatprep.mubr.f32.mxu1 %v8923_v5  ;;  %v9319_v20 = vpack.c.bf16 %v594_v4, %v592_v32  ;;  %v11028_v32 = vmov 0.0   ;;  %v9481_v4 = vld [vmem:[%s8630_s9 + $0x120] sm:$0xff] }
 0x16f   : > { %6447 = vmatpush1.bf16.msra.mxu0 %v9274_v13  ;;  %6607 = vmatpush1.bf16.msra.mxu1 %v9274_v13  ;;  %11147 = vst [vmem:[#allocation115_spill] sm:$0xff] %v9304_v8 }
 0x170   : > { %6449 = vmatprep.subr.bf16.mxu0 %v9278_v14  ;;  %6609 = vmatprep.subr.bf16.mxu1 %v9278_v14  ;;  %11149 = vst [vmem:[#allocation117_spill] sm:$0xff] %v9319_v20 }
 0x171   : > { %1069 = vmatmul.mubr.f32.gmra.mrb[10].mxu0 %v8842_v28  ;;  %1797 = vmatmul.mubr.f32.gmra.mrb[10].mxu1 %v9270_v37  ;;  %v9308_v28 = vpack.c.bf16 %v595_v31, %v593_v45  ;;  %v9450_v31 = vld [vmem:[%s8630_s9 + $0xe8] sm:$0xff]  ;;  %v9460_v45 = vld [vmem:[%s8630_s9 + $0xf0] sm:$0xff] }
 0x172   : > { %1074 = vmatprep.mubr.f32.mxu0 %v9285_v22  ;;  %1802 = vmatprep.mubr.f32.mxu1 %v8940_v55 }
 0x173   : > { %6451 = vmatpush1.bf16.msra.mxu0 %v9289_v19  ;;  %6611 = vmatpush1.bf16.msra.mxu1 %v9289_v19  ;;  %11148 = vst [vmem:[#allocation116_spill] sm:$0xff] %v9308_v28  ;;  %v9315_v19 = vld [vmem:[%s8630_s9 + $0x340] sm:$0xff] }
 0x174   : > { %6453 = vmatprep.subr.bf16.mxu0 %v9293_v61  ;;  %6613 = vmatprep.subr.bf16.mxu1 %v9293_v61 }
 0x175   : > { %1075 = vmatmul.mubr.f32.gmra.mrb[12].mxu0 %v8859_v56  ;;  %1803 = vmatmul.mubr.f32.gmra.mrb[12].mxu1 %v9285_v22  ;;  %v9328_v56 = vld [vmem:[%s8630_s9 + $0x348] sm:$0xff] }
 0x176   : > { %1080 = vmatprep.mubr.f32.mxu0 %v9300_v40  ;;  %1808 = vmatprep.mubr.f32.mxu1 %v8957_v47 }
 0x177   : > { %6455 = vmatpush1.bf16.msra.mxu0 %v9304_v8  ;;  %6615 = vmatpush1.bf16.msra.mxu1 %v9304_v8  ;;  %v11166_v8 = vld [vmem:[#allocation39_spill] sm:$0xff] }
 0x178   : > { %6457 = vmatprep.subr.bf16.mxu0 %v9308_v28  ;;  %6617 = vmatprep.subr.bf16.mxu1 %v9308_v28  ;;  %v11154_v28 = vld [vmem:[#allocation27_spill] sm:$0xff] }
 0x179   : > { %1081 = vmatmul.mubr.f32.gmra.mrb[14].mxu0 %v8876_v36  ;;  %1809 = vmatmul.mubr.f32.gmra.mrb[14].mxu1 %v9300_v40  ;;  %v9339_v36 = vld [vmem:[%s8630_s9 + $0x350] sm:$0xff] }
 0x17a   : > { %1086 = vmatprep.mubr.f32.mxu0 %v9315_v19  ;;  %1814 = vmatprep.mubr.f32.mxu1 %v8974_v35 }
 0x17b   : > { %6459 = vmatpush1.bf16.msra.mxu0 %v9319_v20  ;;  %6619 = vmatpush1.bf16.msra.mxu1 %v9319_v20  ;;  %v9488_v20 = vld [vmem:[%s8630_s9 + $0x128] sm:$0xff] }
 0x17c   : > { %6621 = vmatprep.subr.bf16.mxu0 %v8644_v3  ;;  %6781 = vmatprep.subr.bf16.mxu1 %v8644_v3  ;;  %v9346_v3 = vld [vmem:[%s8630_s9 + $0x358] sm:$0xff] }
 0x17d   : > { %1087 = vmatmul.mubr.f32.gmra.mrb[16].mxu0 %v8893_v11  ;;  %1815 = vmatmul.mubr.f32.gmra.mrb[16].mxu1 %v9315_v19  ;;  %v9353_v11 = vld [vmem:[%s8630_s9 + $0x360] sm:$0xff] }
 0x17e   : > { %1092 = vmatprep.mubr.f32.mxu0 %v9328_v56  ;;  %1820 = vmatprep.mubr.f32.mxu1 %v8994_v1 }
 0x181   : > { %1093 = vmatmul.mubr.f32.gmra.mrb[18].mxu0 %v8910_v49  ;;  %1821 = vmatmul.mubr.f32.gmra.mrb[18].mxu1 %v9328_v56  ;;  %v9360_v49 = vld [vmem:[%s8630_s9 + $0x368] sm:$0xff] }
 0x182   : > { %1098 = vmatprep.mubr.f32.mxu0 %v9339_v36  ;;  %1826 = vmatprep.mubr.f32.mxu1 %v9015_v38 }
 0x185   : > { %1099 = vmatmul.mubr.f32.gmra.mrb[20].mxu0 %v8927_v15  ;;  %1827 = vmatmul.mubr.f32.gmra.mrb[20].mxu1 %v9339_v36  ;;  %v9367_v15 = vld [vmem:[%s8630_s9 + $0x370] sm:$0xff] }
 0x186   : > { %1104 = vmatprep.mubr.f32.mxu0 %v9346_v3  ;;  %1832 = vmatprep.mubr.f32.mxu1 %v9036_v12 }
 0x189   : > { %1105 = vmatmul.mubr.f32.gmra.mrb[22].mxu0 %v8944_v33  ;;  %1833 = vmatmul.mubr.f32.gmra.mrb[22].mxu1 %v9346_v3  ;;  %v9374_v33 = vld [vmem:[%s8630_s9 + $0x378] sm:$0xff] }
 0x18a   : > { %1110 = vmatprep.mubr.f32.mxu0 %v9353_v11  ;;  %1838 = vmatprep.mubr.f32.mxu1 %v9057_v34 }
 0x18d   : > { %1111 = vmatmul.mubr.f32.gmra.mrb[24].mxu0 %v8961_v10  ;;  %1839 = vmatmul.mubr.f32.gmra.mrb[24].mxu1 %v9353_v11  ;;  %v9381_v10 = vld [vmem:[%s8630_s9 + $0x380] sm:$0xff] }
 0x18e   : > { %1116 = vmatprep.mubr.f32.mxu0 %v9360_v49  ;;  %1844 = vmatprep.mubr.f32.mxu1 %v9074_v9 }
 0x191   : > { %1117 = vmatmul.mubr.f32.gmra.mrb[26].mxu0 %v8980_v30  ;;  %1845 = vmatmul.mubr.f32.gmra.mrb[26].mxu1 %v9360_v49  ;;  %v9388_v30 = vld [vmem:[%s8630_s9 + $0x388] sm:$0xff] }
 0x192   : > { %1122 = vmatprep.mubr.f32.mxu0 %v9367_v15  ;;  %1850 = vmatprep.mubr.f32.mxu1 %v9087_v43 }
 0x195   : > { %1123 = vmatmul.mubr.f32.gmra.mrb[28].mxu0 %v9000_v60  ;;  %1851 = vmatmul.mubr.f32.gmra.mrb[28].mxu1 %v9367_v15  ;;  %v9395_v60 = vld [vmem:[%s8630_s9 + $0x390] sm:$0xff] }
 0x196   : > { %1128 = vmatprep.mubr.f32.mxu0 %v9374_v33  ;;  %1856 = vmatprep.mubr.f32.mxu1 %v9100_v17 }
 0x199   : > { %1129 = vmatmul.mubr.f32.gmra.mrb[30].mxu0 %v9021_v62  ;;  %1857 = vmatmul.mubr.f32.gmra.mrb[30].mxu1 %v9374_v33  ;;  %v9402_v62 = vld [vmem:[%s8630_s9 + $0x398] sm:$0xff] }
 0x19a   : > { %1134 = vmatprep.mubr.f32.mxu0 %v9381_v10  ;;  %1862 = vmatprep.mubr.f32.mxu1 %v9113_v16 }
 0x19d   : > { %1135 = vmatmul.mubr.f32.gmra.mrb[32].mxu0 %v9042_v24  ;;  %1863 = vmatmul.mubr.f32.gmra.mrb[32].mxu1 %v9381_v10  ;;  %v9409_v24 = vld [vmem:[%s8630_s9 + $0x3a0] sm:$0xff] }
 0x19e   : > { %1140 = vmatprep.mubr.f32.mxu0 %v9388_v30  ;;  %1868 = vmatprep.mubr.f32.mxu1 %v9126_v23 }
 0x1a1   : > { %1141 = vmatmul.mubr.f32.gmra.mrb[34].mxu0 %v9063_v54  ;;  %1869 = vmatmul.mubr.f32.gmra.mrb[34].mxu1 %v9388_v30  ;;  %v9416_v54 = vld [vmem:[%s8630_s9 + $0x3a8] sm:$0xff] }
 0x1a2   : > { %1146 = vmatprep.mubr.f32.mxu0 %v9395_v60  ;;  %1874 = vmatprep.mubr.f32.mxu1 %v9139_v53 }
 0x1a5   : > { %1147 = vmatmul.mubr.f32.gmra.mrb[36].mxu0 %v9080_v27  ;;  %1875 = vmatmul.mubr.f32.gmra.mrb[36].mxu1 %v9395_v60  ;;  %v9423_v27 = vld [vmem:[%s8630_s9 + $0x3b0] sm:$0xff] }
 0x1a6   : > { %1152 = vmatprep.mubr.f32.mxu0 %v9402_v62  ;;  %1880 = vmatprep.mubr.f32.mxu1 %v9152_v6 }
 0x1a9   : > { %1153 = vmatmul.mubr.f32.gmra.mrb[38].mxu0 %v9093_v44  ;;  %1881 = vmatmul.mubr.f32.gmra.mrb[38].mxu1 %v9402_v62  ;;  %v9430_v44 = vld [vmem:[%s8630_s9 + $0x3b8] sm:$0xff] }
 0x1aa   : > { %1158 = vmatprep.mubr.f32.mxu0 %v9409_v24  ;;  %1886 = vmatprep.mubr.f32.mxu1 %v9165_v0 }
 0x1ad   : > { %1159 = vmatmul.mubr.f32.gmra.mrb[40].mxu0 %v9106_v21  ;;  %1887 = vmatmul.mubr.f32.gmra.mrb[40].mxu1 %v9409_v24  ;;  %v9440_v21 = vld [vmem:[%s8630_s9 + $0xe0] sm:$0xff] }
 0x1ae   : > { %1164 = vmatprep.mubr.f32.mxu0 %v9416_v54  ;;  %1892 = vmatprep.mubr.f32.mxu1 %v9178_v29 }
 0x1b1   : > { %1165 = vmatmul.mubr.f32.gmra.mrb[42].mxu0 %v9119_v59  ;;  %1893 = vmatmul.mubr.f32.gmra.mrb[42].mxu1 %v9416_v54  ;;  %v9437_v59 = vld [vmem:[%s8630_s9 + $0x3c0] sm:$0xff] }
 0x1b2   : > { %1170 = vmatprep.mubr.f32.mxu0 %v9423_v27  ;;  %1898 = vmatprep.mubr.f32.mxu1 %v9191_v57 }
 0x1b5   : > { %1171 = vmatmul.mubr.f32.gmra.mrb[44].mxu0 %v9132_v63  ;;  %1899 = vmatmul.mubr.f32.gmra.mrb[44].mxu1 %v9423_v27  ;;  %v9447_v63 = vld [vmem:[%s8630_s9 + $0x3c8] sm:$0xff] }
 0x1b6   : > { %1176 = vmatprep.mubr.f32.mxu0 %v9430_v44  ;;  %1904 = vmatprep.mubr.f32.mxu1 %v9204_v51 }
 0x1b9   : > { %1177 = vmatmul.mubr.f32.gmra.mrb[46].mxu0 %v9145_v58  ;;  %1905 = vmatmul.mubr.f32.gmra.mrb[46].mxu1 %v9430_v44  ;;  %v9457_v58 = vld [vmem:[%s8630_s9 + $0x3d0] sm:$0xff] }
 0x1ba   : > { %1182 = vmatprep.mubr.f32.mxu0 %v9437_v59  ;;  %1910 = vmatprep.mubr.f32.mxu1 %v9440_v21 }
 0x1bd   : > { %1183 = vmatmul.mubr.f32.gmra.mrb[48].mxu0 %v9158_v52  ;;  %1911 = vmatmul.mubr.f32.gmra.mrb[48].mxu1 %v9437_v59  ;;  %v9467_v52 = vld [vmem:[%s8630_s9 + $0x3d8] sm:$0xff] }
 0x1be   : > { %1188 = vmatprep.mubr.f32.mxu0 %v9447_v63  ;;  %1916 = vmatprep.mubr.f32.mxu1 %v9450_v31 }
 0x1c1   : > { %1189 = vmatmul.mubr.f32.gmra.mrb[50].mxu0 %v9171_v46  ;;  %1917 = vmatmul.mubr.f32.gmra.mrb[50].mxu1 %v9447_v63  ;;  %v11150_v46 = vld [vmem:[#allocation103_spill] sm:$0xff] }
 0x1c2   : > { %1194 = vmatprep.mubr.f32.mxu0 %v9457_v58  ;;  %1922 = vmatprep.mubr.f32.mxu1 %v9460_v45 }
 0x1c5   : > { %1195 = vmatmul.mubr.f32.gmra.mrb[52].mxu0 %v9184_v39  ;;  %1923 = vmatmul.mubr.f32.gmra.mrb[52].mxu1 %v9457_v58  ;;  %v11151_v39 = vld [vmem:[#allocation24_spill] sm:$0xff] }
 0x1c6   : > { %1200 = vmatprep.mubr.f32.mxu0 %v9467_v52  ;;  %1928 = vmatprep.mubr.f32.mxu1 %v9470_v42 }
 0x1c9   : > { %1201 = vmatmul.mubr.f32.gmra.mrb[54].mxu0 %v11150_v46  ;;  %1929 = vmatmul.mubr.f32.gmra.mrb[54].mxu1 %v9467_v52  ;;  %v11152_v46 = vld [vmem:[#allocation25_spill] sm:$0xff] }
 0x1ca   : > { %1271 = vmatprep.mubr.f32.mxu0 %v11028_v32  ;;  %1999 = vmatprep.mubr.f32.mxu1 %v11028_v32 }
 0x1cd   : > { %1272 = vmatmul.mubr.f32.vlgmr.msra.gmra.mrb[0].mxu0 %v8838_v18  ;;  %2000 = vmatmul.mubr.f32.vlgmr.msra.gmra.mrb[0].mxu1 %v9481_v4  ;;  %v9499_v18 = vld [vmem:[%s8630_s9 + $0x130] sm:$0xff] }
 0x1ce   : > { %6623 = vmatpush1.bf16.msra.mxu0 %v11151_v39  ;;  %6783 = vmatpush1.bf16.msra.mxu1 %v11151_v39  ;;  %v11153_v39 = vld [vmem:[#allocation26_spill] sm:$0xff] }
 0x1cf   : > { %1277 = vmatprep.mubr.f32.mxu0 %v11028_v32  ;;  %2005 = vmatprep.mubr.f32.mxu1 %v11028_v32 }
 0x1d0   : > { %6625 = vmatprep.subr.bf16.mxu0 %v11152_v46  ;;  %6785 = vmatprep.subr.bf16.mxu1 %v11152_v46  ;;  %v11155_v46 = vld [vmem:[#allocation28_spill] sm:$0xff] }
 0x1d1   : > { %1278 = vmatmul.mubr.f32.gmra.mrb[2].mxu0 %v8855_v50  ;;  %2006 = vmatmul.mubr.f32.gmra.mrb[2].mxu1 %v9488_v20  ;;  %v9510_v50 = vld [vmem:[%s8630_s9 + $0x138] sm:$0xff] }
 0x1d2   : > { %1283 = vmatprep.mubr.f32.mxu0 %v11028_v32  ;;  %2011 = vmatprep.mubr.f32.mxu1 %v11028_v32 }
 0x1d3   : > { %6627 = vmatpush1.bf16.msra.mxu0 %v11153_v39  ;;  %6787 = vmatpush1.bf16.msra.mxu1 %v11153_v39  ;;  %v11156_v39 = vld [vmem:[#allocation29_spill] sm:$0xff] }
 0x1d4   : > { %6629 = vmatprep.subr.bf16.mxu0 %v11154_v28  ;;  %6789 = vmatprep.subr.bf16.mxu1 %v11154_v28  ;;  %v11157_v28 = vld [vmem:[#allocation30_spill] sm:$0xff] }
 0x1d5   : > { %1284 = vmatmul.mubr.f32.gmra.mrb[4].mxu0 %v8872_v2  ;;  %2012 = vmatmul.mubr.f32.gmra.mrb[4].mxu1 %v9499_v18  ;;  %v9521_v2 = vld [vmem:[%s8630_s9 + $0x140] sm:$0xff] }
 0x1d6   : > { %1289 = vmatprep.mubr.f32.mxu0 %v11028_v32  ;;  %2017 = vmatprep.mubr.f32.mxu1 %v11028_v32 }
 0x1d7   : > { %6631 = vmatpush1.bf16.msra.mxu0 %v11155_v46  ;;  %6791 = vmatpush1.bf16.msra.mxu1 %v11155_v46  ;;  %v11158_v46 = vld [vmem:[#allocation31_spill] sm:$0xff] }
 0x1d8   : > { %6633 = vmatprep.subr.bf16.mxu0 %v11156_v39  ;;  %6793 = vmatprep.subr.bf16.mxu1 %v11156_v39  ;;  %v11159_v39 = vld [vmem:[#allocation32_spill] sm:$0xff] }
 0x1d9   : > { %1290 = vmatmul.mubr.f32.gmra.mrb[6].mxu0 %v8889_v48  ;;  %2018 = vmatmul.mubr.f32.gmra.mrb[6].mxu1 %v9510_v50  ;;  %v9532_v48 = vld [vmem:[%s8630_s9 + $0x148] sm:$0xff] }
 0x1da   : > { %1295 = vmatprep.mubr.f32.mxu0 %v11028_v32  ;;  %2023 = vmatprep.mubr.f32.mxu1 %v11028_v32 }
 0x1db   : > { %6635 = vmatpush1.bf16.msra.mxu0 %v11157_v28  ;;  %6795 = vmatpush1.bf16.msra.mxu1 %v11157_v28  ;;  %v11160_v28 = vld [vmem:[#allocation33_spill] sm:$0xff] }
 0x1dc   : > { %6637 = vmatprep.subr.bf16.mxu0 %v11158_v46  ;;  %6797 = vmatprep.subr.bf16.mxu1 %v11158_v46  ;;  %v11161_v46 = vld [vmem:[#allocation34_spill] sm:$0xff] }
 0x1dd   : > { %1296 = vmatmul.mubr.f32.gmra.mrb[8].mxu0 %v8906_v41  ;;  %2024 = vmatmul.mubr.f32.gmra.mrb[8].mxu1 %v9521_v2  ;;  %v9543_v41 = vld [vmem:[%s8630_s9 + $0x150] sm:$0xff] }
 0x1de   : > { %1301 = vmatprep.mubr.f32.mxu0 %v11028_v32  ;;  %2029 = vmatprep.mubr.f32.mxu1 %v11028_v32 }
 0x1df   : > { %6639 = vmatpush1.bf16.msra.mxu0 %v11159_v39  ;;  %6799 = vmatpush1.bf16.msra.mxu1 %v11159_v39  ;;  %v11162_v39 = vld [vmem:[#allocation35_spill] sm:$0xff] }
 0x1e0   : > { %6641 = vmatprep.subr.bf16.mxu0 %v11160_v28  ;;  %6801 = vmatprep.subr.bf16.mxu1 %v11160_v28  ;;  %v11163_v28 = vld [vmem:[#allocation36_spill] sm:$0xff] }
 0x1e1   : > { %1302 = vmatmul.mubr.f32.gmra.mrb[10].mxu0 %v8923_v5  ;;  %2030 = vmatmul.mubr.f32.gmra.mrb[10].mxu1 %v9532_v48  ;;  %v9554_v5 = vld [vmem:[%s8630_s9 + $0x158] sm:$0xff] }
 0x1e2   : > { %1307 = vmatprep.mubr.f32.mxu0 %v11028_v32  ;;  %2035 = vmatprep.mubr.f32.mxu1 %v11028_v32 }
 0x1e3   : > { %6643 = vmatpush1.bf16.msra.mxu0 %v11161_v46  ;;  %6803 = vmatpush1.bf16.msra.mxu1 %v11161_v46  ;;  %v11164_v46 = vld [vmem:[#allocation37_spill] sm:$0xff] }
 0x1e4   : > { %6645 = vmatprep.subr.bf16.mxu0 %v11162_v39  ;;  %6805 = vmatprep.subr.bf16.mxu1 %v11162_v39  ;;  %v11165_v39 = vld [vmem:[#allocation38_spill] sm:$0xff] }
 0x1e5   : > { %1308 = vmatmul.mubr.f32.gmra.mrb[12].mxu0 %v8940_v55  ;;  %2036 = vmatmul.mubr.f32.gmra.mrb[12].mxu1 %v9543_v41  ;;  %v9565_v55 = vld [vmem:[%s8630_s9 + $0x160] sm:$0xff] }
 0x1e6   : > { %1313 = vmatprep.mubr.f32.mxu0 %v11028_v32  ;;  %2041 = vmatprep.mubr.f32.mxu1 %v11028_v32 }
 0x1e7   : > { %6647 = vmatpush1.bf16.msra.mxu0 %v11163_v28  ;;  %6807 = vmatpush1.bf16.msra.mxu1 %v11163_v28  ;;  %v11168_v28 = vld [vmem:[#allocation41_spill] sm:$0xff] }
 0x1e8   : > { %6649 = vmatprep.subr.bf16.mxu0 %v11164_v46  ;;  %6809 = vmatprep.subr.bf16.mxu1 %v11164_v46  ;;  %v11169_v46 = vld [vmem:[#allocation80_spill] sm:$0xff] }
 0x1e9   : > { %1314 = vmatmul.mubr.f32.gmra.mrb[14].mxu0 %v8957_v47  ;;  %2042 = vmatmul.mubr.f32.gmra.mrb[14].mxu1 %v9554_v5  ;;  %v11167_v47 = vld [vmem:[#allocation40_spill] sm:$0xff] }
 0x1ea   : > { %1319 = vmatprep.mubr.f32.mxu0 %v11028_v32  ;;  %2047 = vmatprep.mubr.f32.mxu1 %v11028_v32 }
 0x1eb   : > { %6651 = vmatpush1.bf16.msra.mxu0 %v11165_v39  ;;  %6811 = vmatpush1.bf16.msra.mxu1 %v11165_v39  ;;  %v11172_v39 = vld [vmem:[#allocation83_spill] sm:$0xff] }
 0x1ec   : > { %6653 = vmatprep.subr.bf16.mxu0 %v11166_v8  ;;  %6813 = vmatprep.subr.bf16.mxu1 %v11166_v8  ;;  %v11171_v8 = vld [vmem:[#allocation43_spill] sm:$0xff] }
 0x1ed   : > { %1320 = vmatmul.mubr.f32.gmra.mrb[16].mxu0 %v8974_v35  ;;  %2048 = vmatmul.mubr.f32.gmra.mrb[16].mxu1 %v9565_v55  ;;  %v11170_v35 = vld [vmem:[#allocation42_spill] sm:$0xff] }
 0x1ee   : > { %1325 = vmatprep.mubr.f32.mxu0 %v11028_v32  ;;  %2053 = vmatprep.mubr.f32.mxu1 %v11028_v32 }
 0x1ef   : > { %6655 = vmatpush1.bf16.msra.mxu0 %v11167_v47  ;;  %6815 = vmatpush1.bf16.msra.mxu1 %v11167_v47  ;;  %v11174_v47 = vld [vmem:[#allocation45_spill] sm:$0xff] }
 0x1f0   : > { %6657 = vmatprep.subr.bf16.mxu0 %v11168_v28  ;;  %6817 = vmatprep.subr.bf16.mxu1 %v11168_v28  ;;  %v11175_v28 = vld [vmem:[#allocation86_spill] sm:$0xff] }
 0x1f1   : > { %1326 = vmatmul.mubr.f32.gmra.mrb[18].mxu0 %v8994_v1  ;;  %2054 = vmatmul.mubr.f32.gmra.mrb[18].mxu1 %v11169_v46  ;;  %v11173_v1 = vld [vmem:[#allocation44_spill] sm:$0xff]  ;;  %v11177_v46 = vld [vmem:[#allocation47_spill] sm:$0xff] }
 0x1f2   : > { %1331 = vmatprep.mubr.f32.mxu0 %v11028_v32  ;;  %2059 = vmatprep.mubr.f32.mxu1 %v11028_v32 }
 0x1f3   : > { %6659 = vmatpush1.bf16.msra.mxu0 %v11170_v35  ;;  %6819 = vmatpush1.bf16.msra.mxu1 %v11170_v35  ;;  %v11178_v35 = vld [vmem:[#allocation89_spill] sm:$0xff] }
 0x1f4   : > { %6661 = vmatprep.subr.bf16.mxu0 %v11171_v8  ;;  %6821 = vmatprep.subr.bf16.mxu1 %v11171_v8  ;;  %v11180_v8 = vld [vmem:[#allocation49_spill] sm:$0xff] }
 0x1f5   : > { %1332 = vmatmul.mubr.f32.gmra.mrb[20].mxu0 %v9015_v38  ;;  %2060 = vmatmul.mubr.f32.gmra.mrb[20].mxu1 %v11172_v39  ;;  %v11176_v38 = vld [vmem:[#allocation46_spill] sm:$0xff]  ;;  %v11181_v39 = vld [vmem:[#allocation92_spill] sm:$0xff] }
 0x1f6   : > { %1337 = vmatprep.mubr.f32.mxu0 %v11028_v32  ;;  %2065 = vmatprep.mubr.f32.mxu1 %v11028_v32 }
 0x1f7   : > { %6663 = vmatpush1.bf16.msra.mxu0 %v11173_v1  ;;  %6823 = vmatpush1.bf16.msra.mxu1 %v11173_v1  ;;  %v11183_v1 = vld [vmem:[#allocation51_spill] sm:$0xff] }
 0x1f8   : > { %6665 = vmatprep.subr.bf16.mxu0 %v11174_v47  ;;  %6825 = vmatprep.subr.bf16.mxu1 %v11174_v47  ;;  %v11184_v47 = vld [vmem:[#allocation93_spill] sm:$0xff] }
 0x1f9   : > { %1338 = vmatmul.mubr.f32.gmra.mrb[22].mxu0 %v9036_v12  ;;  %2066 = vmatmul.mubr.f32.gmra.mrb[22].mxu1 %v11175_v28  ;;  %v11179_v12 = vld [vmem:[#allocation48_spill] sm:$0xff]  ;;  %v11186_v28 = vld [vmem:[#allocation53_spill] sm:$0xff] }
 0x1fa   : > { %1343 = vmatprep.mubr.f32.mxu0 %v11028_v32  ;;  %2071 = vmatprep.mubr.f32.mxu1 %v11028_v32 }
 0x1fb   : > { %6667 = vmatpush1.bf16.msra.mxu0 %v11176_v38  ;;  %6827 = vmatpush1.bf16.msra.mxu1 %v11176_v38  ;;  %v11187_v38 = vld [vmem:[#allocation94_spill] sm:$0xff] }
 0x1fc   : > { %6669 = vmatprep.subr.bf16.mxu0 %v11177_v46  ;;  %6829 = vmatprep.subr.bf16.mxu1 %v11177_v46  ;;  %v11189_v46 = vld [vmem:[#allocation55_spill] sm:$0xff] }
 0x1fd   : > { %1344 = vmatmul.mubr.f32.gmra.mrb[24].mxu0 %v9057_v34  ;;  %2072 = vmatmul.mubr.f32.gmra.mrb[24].mxu1 %v11178_v35  ;;  %v11182_v34 = vld [vmem:[#allocation50_spill] sm:$0xff]  ;;  %v11190_v35 = vld [vmem:[#allocation95_spill] sm:$0xff] }
 0x1fe   : > { %1349 = vmatprep.mubr.f32.mxu0 %v11028_v32  ;;  %2077 = vmatprep.mubr.f32.mxu1 %v11028_v32 }
 0x1ff   : > { %6671 = vmatpush1.bf16.msra.mxu0 %v11179_v12  ;;  %6831 = vmatpush1.bf16.msra.mxu1 %v11179_v12  ;;  %v11192_v12 = vld [vmem:[#allocation97_spill] sm:$0xff] }
 0x200   : > { %6673 = vmatprep.subr.bf16.mxu0 %v11180_v8  ;;  %6833 = vmatprep.subr.bf16.mxu1 %v11180_v8  ;;  %v6028_v8 = vld [vmem:[%s8630_s9 + $0x1f8] sm:$0xff] }
 0x201   : > { %1350 = vmatmul.mubr.f32.gmra.mrb[26].mxu0 %v9074_v9  ;;  %2078 = vmatmul.mubr.f32.gmra.mrb[26].mxu1 %v11181_v39  ;;  %v11185_v9 = vld [vmem:[#allocation52_spill] sm:$0xff] }
 0x202   : > { %1355 = vmatprep.mubr.f32.mxu0 %v11028_v32  ;;  %2083 = vmatprep.mubr.f32.mxu1 %v11028_v32  ;;  %v11198_v39 = vld [vmem:[#allocation104_spill] sm:$0xff] }
 0x203   : > { %6675 = vmatpush1.bf16.msra.mxu0 %v11182_v34  ;;  %6835 = vmatpush1.bf16.msra.mxu1 %v11182_v34  ;;  %v9683_v34 = vld [vmem:[%s8630_s9 + $0x20] sm:$0xff] }
 0x204   : > { %6677 = vmatprep.subr.bf16.mxu0 %v11183_v1  ;;  %6837 = vmatprep.subr.bf16.mxu1 %v11183_v1  ;;  %v8099_v1 = vld [vmem:[%s8630_s9 + $0x200] sm:$0xff] }
 0x205   : > { %1356 = vmatmul.mubr.f32.gmra.mrb[28].mxu0 %v9087_v43  ;;  %2084 = vmatmul.mubr.f32.gmra.mrb[28].mxu1 %v11184_v47  ;;  %v11188_v43 = vld [vmem:[#allocation54_spill] sm:$0xff]  ;;  %v11199_v47 = vld [vmem:[#allocation56_spill] sm:$0xff] }
 0x206   : > { %1361 = vmatprep.mubr.f32.mxu0 %v11028_v32  ;;  %2089 = vmatprep.mubr.f32.mxu1 %v11028_v32 }
 0x207   : > { %6679 = vmatpush1.bf16.msra.mxu0 %v11185_v9  ;;  %6839 = vmatpush1.bf16.msra.mxu1 %v11185_v9  ;;  %v11200_v9 = vld [vmem:[#allocation106_spill] sm:$0xff] }
 0x208   : > { %6681 = vmatprep.subr.bf16.mxu0 %v11186_v28  ;;  %6841 = vmatprep.subr.bf16.mxu1 %v11186_v28  ;;  %v9692_v28 = vld [vmem:[%s8630_s9 + $0x28] sm:$0xff] }
 0x209   : > { %1362 = vmatmul.mubr.f32.gmra.mrb[30].mxu0 %v9100_v17  ;;  %2090 = vmatmul.mubr.f32.gmra.mrb[30].mxu1 %v11187_v38  ;;  %v11191_v17 = vld [vmem:[#allocation96_spill] sm:$0xff]  ;;  %v11201_v38 = vld [vmem:[#allocation57_spill] sm:$0xff] }
 0x20a   : > { %1367 = vmatprep.mubr.f32.mxu0 %v11028_v32  ;;  %2095 = vmatprep.mubr.f32.mxu1 %v11028_v32 }
 0x20b   : > { %6683 = vmatpush1.bf16.msra.mxu0 %v11188_v43  ;;  %6843 = vmatpush1.bf16.msra.mxu1 %v11188_v43  ;;  %v8101_v43 = vld [vmem:[%s8630_s9 + $0x208] sm:$0xff] }
 0x20c   : > { %6685 = vmatprep.subr.bf16.mxu0 %v11189_v46  ;;  %6845 = vmatprep.subr.bf16.mxu1 %v11189_v46  ;;  %v9701_v46 = vld [vmem:[%s8630_s9 + $0x30] sm:$0xff] }
 0x20d   : > { %1368 = vmatmul.mubr.f32.gmra.mrb[32].mxu0 %v9113_v16  ;;  %2096 = vmatmul.mubr.f32.gmra.mrb[32].mxu1 %v11190_v35  ;;  %v11193_v16 = vld [vmem:[#allocation98_spill] sm:$0xff] }
 0x20e   : > { %1373 = vmatprep.mubr.f32.mxu0 %v11028_v32  ;;  %2101 = vmatprep.mubr.f32.mxu1 %v11028_v32  ;;  %v11202_v35 = vld [vmem:[#allocation58_spill] sm:$0xff] }
 0x211   : > { %1374 = vmatmul.mubr.f32.gmra.mrb[34].mxu0 %v9126_v23  ;;  %2102 = vmatmul.mubr.f32.gmra.mrb[34].mxu1 %v11191_v17  ;;  %v11194_v23 = vld [vmem:[#allocation99_spill] sm:$0xff] }
 0x212   : > { %1379 = vmatprep.mubr.f32.mxu0 %v11028_v32  ;;  %2107 = vmatprep.mubr.f32.mxu1 %v11028_v32  ;;  %v11203_v17 = vld [vmem:[#allocation59_spill] sm:$0xff] }
 0x215   : > { %1380 = vmatmul.mubr.f32.gmra.mrb[36].mxu0 %v9139_v53  ;;  %2108 = vmatmul.mubr.f32.gmra.mrb[36].mxu1 %v11192_v12  ;;  %v11195_v53 = vld [vmem:[#allocation100_spill] sm:$0xff]  ;;  %v8103_v12 = vld [vmem:[%s8630_s9 + $0x210] sm:$0xff] }
 0x216   : > { %1385 = vmatprep.mubr.f32.mxu0 %v11028_v32  ;;  %2113 = vmatprep.mubr.f32.mxu1 %v11028_v32 }
 0x219   : > { %1386 = vmatmul.mubr.f32.gmra.mrb[38].mxu0 %v9152_v6  ;;  %2114 = vmatmul.mubr.f32.gmra.mrb[38].mxu1 %v11193_v16  ;;  %v11196_v6 = vld [vmem:[#allocation101_spill] sm:$0xff]  ;;  %v9712_v16 = vld [vmem:[%s8630_s9 + $0x38] sm:$0xff] }
 0x21a   : > { %1391 = vmatprep.mubr.f32.mxu0 %v11028_v32  ;;  %2119 = vmatprep.mubr.f32.mxu1 %v11028_v32 }
 0x21d   : > { %1392 = vmatmul.mubr.f32.gmra.mrb[40].mxu0 %v9165_v0  ;;  %2120 = vmatmul.mubr.f32.gmra.mrb[40].mxu1 %v11194_v23  ;;  %v11197_v0 = vld [vmem:[#allocation102_spill] sm:$0xff]  ;;  %v11204_v23 = vld [vmem:[#allocation60_spill] sm:$0xff] }
 0x21e   : > { %1397 = vmatprep.mubr.f32.mxu0 %v11028_v32  ;;  %2125 = vmatprep.mubr.f32.mxu1 %v11028_v32 }
 0x221   : > { %1398 = vmatmul.mubr.f32.gmra.mrb[42].mxu0 %v9178_v29  ;;  %2126 = vmatmul.mubr.f32.gmra.mrb[42].mxu1 %v11195_v53  ;;  %v6025_v29 = vld [vmem:[%s8630_s9 + $0x1e0] sm:$0xff]  ;;  %v11205_v53 = vld [vmem:[#allocation61_spill] sm:$0xff] }
 0x222   : > { %1403 = vmatprep.mubr.f32.mxu0 %v11028_v32  ;;  %2131 = vmatprep.mubr.f32.mxu1 %v11028_v32 }
 0x225   : > { %1404 = vmatmul.mubr.f32.gmra.mrb[44].mxu0 %v9191_v57  ;;  %2132 = vmatmul.mubr.f32.gmra.mrb[44].mxu1 %v11196_v6  ;;  %v6026_v57 = vld [vmem:[%s8630_s9 + $0x1e8] sm:$0xff]  ;;  %v8105_v6 = vld [vmem:[%s8630_s9 + $0x218] sm:$0xff] }
 0x226   : > { %1409 = vmatprep.mubr.f32.mxu0 %v11028_v32  ;;  %2137 = vmatprep.mubr.f32.mxu1 %v11028_v32 }
 0x229   : > { %1410 = vmatmul.mubr.f32.gmra.mrb[46].mxu0 %v9204_v51  ;;  %2138 = vmatmul.mubr.f32.gmra.mrb[46].mxu1 %v11197_v0  ;;  %v6027_v51 = vld [vmem:[%s8630_s9 + $0x1f0] sm:$0xff] }
 0x22a   : > { %1415 = vmatprep.mubr.f32.mxu0 %v11028_v32  ;;  %2143 = vmatprep.mubr.f32.mxu1 %v11028_v32  ;;  %v11206_v0 = vld [vmem:[#allocation62_spill] sm:$0xff] }
 0x22d   : > { %1416 = vmatmul.mubr.f32.gmra.mrb[48].mxu0 %v9440_v21  ;;  %2144 = vmatmul.mubr.f32.gmra.mrb[48].mxu1 %v6025_v29  ;;  %v11207_v29 = vld [vmem:[#allocation63_spill] sm:$0xff] }
 0x22e   : > { %1421 = vmatprep.mubr.f32.mxu0 %v11028_v32  ;;  %2149 = vmatprep.mubr.f32.mxu1 %v11028_v32 }
 0x231   : > { %1422 = vmatmul.mubr.f32.gmra.mrb[50].mxu0 %v9450_v31  ;;  %2150 = vmatmul.mubr.f32.gmra.mrb[50].mxu1 %v6026_v57  ;;  %v8107_v57 = vld [vmem:[%s8630_s9 + $0x220] sm:$0xff] }
 0x232   : > { %1427 = vmatprep.mubr.f32.mxu0 %v11028_v32  ;;  %2155 = vmatprep.mubr.f32.mxu1 %v11028_v32 }
 0x235   : > { %1428 = vmatmul.mubr.f32.gmra.mrb[52].mxu0 %v9460_v45  ;;  %2156 = vmatmul.mubr.f32.gmra.mrb[52].mxu1 %v6027_v51  ;;  %v11208_v51 = vld [vmem:[#allocation64_spill] sm:$0xff] }
 0x236   : > { %1433 = vmatprep.mubr.f32.mxu0 %v11028_v32  ;;  %2161 = vmatprep.mubr.f32.mxu1 %v11028_v32 }
 0x239   : > { %1434 = vmatmul.mubr.f32.gmra.mrb[54].mxu0 %v9470_v42  ;;  %2162 = vmatmul.mubr.f32.gmra.mrb[54].mxu1 %v6028_v8  ;;  %v11209_v8 = vld [vmem:[#allocation65_spill] sm:$0xff] }
 0x23a   : > { %2407 = vmatprep.mubr.f32.mxu0 %v11198_v39  ;;  %3135 = vmatprep.mubr.f32.mxu1 %v9683_v34 }
 0x23d   : > { %2408 = vmatmul.mubr.f32.vlgmr.msra.gmra.mrb[56].mxu0 %v8099_v1  ;;  %3136 = vmatmul.mubr.f32.vlgmr.msra.gmra.mrb[56].mxu1 %v11198_v39  ;;  %v8109_v39 = vld [vmem:[%s8630_s9 + $0x228] sm:$0xff]  ;;  %v11210_v1 = vld [vmem:[#allocation66_spill] sm:$0xff] }
 0x23e   : > { %6687 = vmatpush1.bf16.msra.mxu0 %v11199_v47  ;;  %6847 = vmatpush1.bf16.msra.mxu1 %v11199_v47  ;;  %v11211_v47 = vld [vmem:[#allocation67_spill] sm:$0xff] }
 0x23f   : > { %2413 = vmatprep.mubr.f32.mxu0 %v11200_v9  ;;  %3141 = vmatprep.mubr.f32.mxu1 %v9692_v28 }
 0x240   : > { %6689 = vmatprep.subr.bf16.mxu0 %v11201_v38  ;;  %6849 = vmatprep.subr.bf16.mxu1 %v11201_v38  ;;  %v11212_v38 = vld [vmem:[#allocation68_spill] sm:$0xff] }
 0x241   : > { %2414 = vmatmul.mubr.f32.gmra.mrb[58].mxu0 %v8101_v43  ;;  %3142 = vmatmul.mubr.f32.gmra.mrb[58].mxu1 %v11200_v9  ;;  %v8111_v9 = vld [vmem:[%s8630_s9 + $0x230] sm:$0xff]  ;;  %v11213_v43 = vld [vmem:[#allocation69_spill] sm:$0xff] }
 0x242   : > { %2419 = vmatprep.mubr.f32.mxu0 %v9227_v25  ;;  %3147 = vmatprep.mubr.f32.mxu1 %v9701_v46 }
 0x243   : > { %6691 = vmatpush1.bf16.msra.mxu0 %v11202_v35  ;;  %6851 = vmatpush1.bf16.msra.mxu1 %v11202_v35  ;;  %v8113_v35 = vld [vmem:[%s8630_s9 + $0x238] sm:$0xff] }
 0x244   : > { %6693 = vmatprep.subr.bf16.mxu0 %v11203_v17  ;;  %6853 = vmatprep.subr.bf16.mxu1 %v11203_v17  ;;  %v11214_v17 = vld [vmem:[#allocation70_spill] sm:$0xff] }
 0x245   : > { %2420 = vmatmul.mubr.f32.gmra.mrb[60].mxu0 %v8103_v12  ;;  %3148 = vmatmul.mubr.f32.gmra.mrb[60].mxu1 %v9227_v25  ;;  %v9723_v25 = vld [vmem:[%s8630_s9 + $0x40] sm:$0xff]  ;;  %v11215_v12 = vld [vmem:[#allocation71_spill] sm:$0xff] }
 0x246   : > { %2425 = vmatprep.mubr.f32.mxu0 %v9240_v7  ;;  %3153 = vmatprep.mubr.f32.mxu1 %v9712_v16 }
 0x247   : > { %6695 = vmatpush1.bf16.msra.mxu0 %v11204_v23  ;;  %6855 = vmatpush1.bf16.msra.mxu1 %v11204_v23  ;;  %v8115_v23 = vld [vmem:[%s8630_s9 + $0x240] sm:$0xff] }
 0x248   : > { %6697 = vmatprep.subr.bf16.mxu0 %v11205_v53  ;;  %6857 = vmatprep.subr.bf16.mxu1 %v11205_v53  ;;  %v11216_v53 = vld [vmem:[#allocation72_spill] sm:$0xff] }
 0x249   : > { %2426 = vmatmul.mubr.f32.gmra.mrb[62].mxu0 %v8105_v6  ;;  %3154 = vmatmul.mubr.f32.gmra.mrb[62].mxu1 %v9240_v7  ;;  %v9734_v7 = vld [vmem:[%s8630_s9 + $0x48] sm:$0xff] }
 0x24a   : > { %2431 = vmatprep.mubr.f32.mxu0 %v9255_v26  ;;  %3159 = vmatprep.mubr.f32.mxu1 %v9723_v25  ;;  %v11217_v6 = vld [vmem:[#allocation73_spill] sm:$0xff] }
 0x24b   : > { %6699 = vmatpush1.bf16.msra.mxu0 %v11206_v0  ;;  %6859 = vmatpush1.bf16.msra.mxu1 %v11206_v0  ;;  %v8117_v0 = vld [vmem:[%s8630_s9 + $0x248] sm:$0xff] }
 0x24c   : > { %6701 = vmatprep.subr.bf16.mxu0 %v11207_v29  ;;  %6861 = vmatprep.subr.bf16.mxu1 %v11207_v29  ;;  %v11218_v29 = vld [vmem:[#allocation74_spill] sm:$0xff] }
 0x24d   : > { %2432 = vmatmul.mubr.f32.gmra.mrb[64].mxu0 %v8107_v57  ;;  %3160 = vmatmul.mubr.f32.gmra.mrb[64].mxu1 %v9255_v26  ;;  %v9745_v26 = vld [vmem:[%s8630_s9 + $0x50] sm:$0xff]  ;;  %v11219_v57 = vld [vmem:[#allocation75_spill] sm:$0xff] }
 0x24e   : > { %2437 = vmatprep.mubr.f32.mxu0 %v9270_v37  ;;  %3165 = vmatprep.mubr.f32.mxu1 %v9734_v7 }
 0x24f   : > { %6703 = vmatpush1.bf16.msra.mxu0 %v11208_v51  ;;  %6863 = vmatpush1.bf16.msra.mxu1 %v11208_v51  ;;  %v8119_v51 = vld [vmem:[%s8630_s9 + $0x250] sm:$0xff] }
 0x250   : > { %6705 = vmatprep.subr.bf16.mxu0 %v11209_v8  ;;  %6865 = vmatprep.subr.bf16.mxu1 %v11209_v8  ;;  %v11220_v8 = vld [vmem:[#allocation76_spill] sm:$0xff] }
 0x251   : > { %2438 = vmatmul.mubr.f32.gmra.mrb[66].mxu0 %v8109_v39  ;;  %3166 = vmatmul.mubr.f32.gmra.mrb[66].mxu1 %v9270_v37  ;;  %v9756_v37 = vld [vmem:[%s8630_s9 + $0x58] sm:$0xff]  ;;  %v11221_v39 = vld [vmem:[#allocation77_spill] sm:$0xff] }
 0x252   : > { %2443 = vmatprep.mubr.f32.mxu0 %v9285_v22  ;;  %3171 = vmatprep.mubr.f32.mxu1 %v9745_v26 }
 0x253   : > { %6707 = vmatpush1.bf16.msra.mxu0 %v11210_v1  ;;  %6867 = vmatpush1.bf16.msra.mxu1 %v11210_v1  ;;  %v8121_v1 = vld [vmem:[%s8630_s9 + $0x258] sm:$0xff] }
 0x254   : > { %6709 = vmatprep.subr.bf16.mxu0 %v11211_v47  ;;  %6869 = vmatprep.subr.bf16.mxu1 %v11211_v47  ;;  %v11222_v47 = vld [vmem:[#allocation78_spill] sm:$0xff] }
 0x255   : > { %2444 = vmatmul.mubr.f32.gmra.mrb[68].mxu0 %v8111_v9  ;;  %3172 = vmatmul.mubr.f32.gmra.mrb[68].mxu1 %v9285_v22  ;;  %v9767_v22 = vld [vmem:[%s8630_s9 + $0x60] sm:$0xff]  ;;  %v11223_v9 = vld [vmem:[#allocation79_spill] sm:$0xff] }
 0x256   : > { %2449 = vmatprep.mubr.f32.mxu0 %v9300_v40  ;;  %3177 = vmatprep.mubr.f32.mxu1 %v9756_v37 }
 0x257   : > { %6711 = vmatpush1.bf16.msra.mxu0 %v11212_v38  ;;  %6871 = vmatpush1.bf16.msra.mxu1 %v11212_v38  ;;  %v8123_v38 = vld [vmem:[%s8630_s9 + $0x260] sm:$0xff] }
 0x258   : > { %6713 = vmatprep.subr.bf16.mxu0 %v11213_v43  ;;  %6873 = vmatprep.subr.bf16.mxu1 %v11213_v43  ;;  %v11224_v43 = vld [vmem:[#allocation81_spill] sm:$0xff] }
 0x259   : > { %2450 = vmatmul.mubr.f32.gmra.mrb[70].mxu0 %v8113_v35  ;;  %3178 = vmatmul.mubr.f32.gmra.mrb[70].mxu1 %v9300_v40  ;;  %v9778_v40 = vld [vmem:[%s8630_s9 + $0x68] sm:$0xff]  ;;  %v11225_v35 = vld [vmem:[#allocation82_spill] sm:$0xff] }
 0x25a   : > { %2455 = vmatprep.mubr.f32.mxu0 %v9315_v19  ;;  %3183 = vmatprep.mubr.f32.mxu1 %v9767_v22 }
 0x25b   : > { %6715 = vmatpush1.bf16.msra.mxu0 %v11214_v17  ;;  %6875 = vmatpush1.bf16.msra.mxu1 %v11214_v17  ;;  %v8125_v17 = vld [vmem:[%s8630_s9 + $0x268] sm:$0xff] }
 0x25c   : > { %6717 = vmatprep.subr.bf16.mxu0 %v11215_v12  ;;  %6877 = vmatprep.subr.bf16.mxu1 %v11215_v12  ;;  %v11226_v12 = vld [vmem:[#allocation84_spill] sm:$0xff] }
 0x25d   : > { %2456 = vmatmul.mubr.f32.gmra.mrb[72].mxu0 %v8115_v23  ;;  %3184 = vmatmul.mubr.f32.gmra.mrb[72].mxu1 %v9315_v19  ;;  %v9789_v19 = vld [vmem:[%s8630_s9 + $0x70] sm:$0xff]  ;;  %v11227_v23 = vld [vmem:[#allocation85_spill] sm:$0xff] }
 0x25e   : > { %2461 = vmatprep.mubr.f32.mxu0 %v9328_v56  ;;  %3189 = vmatprep.mubr.f32.mxu1 %v9778_v40 }
 0x25f   : > { %6719 = vmatpush1.bf16.msra.mxu0 %v11216_v53  ;;  %6879 = vmatpush1.bf16.msra.mxu1 %v11216_v53  ;;  %v8127_v53 = vld [vmem:[%s8630_s9 + $0x270] sm:$0xff] }
 0x260   : > { %6721 = vmatprep.subr.bf16.mxu0 %v11217_v6  ;;  %6881 = vmatprep.subr.bf16.mxu1 %v11217_v6  ;;  %v11228_v6 = vld [vmem:[#allocation87_spill] sm:$0xff] }
 0x261   : > { %2462 = vmatmul.mubr.f32.gmra.mrb[74].mxu0 %v8117_v0  ;;  %3190 = vmatmul.mubr.f32.gmra.mrb[74].mxu1 %v9328_v56  ;;  %v9800_v56 = vld [vmem:[%s8630_s9 + $0x78] sm:$0xff]  ;;  %v11229_v0 = vld [vmem:[#allocation88_spill] sm:$0xff] }
 0x262   : > { %2467 = vmatprep.mubr.f32.mxu0 %v9339_v36  ;;  %3195 = vmatprep.mubr.f32.mxu1 %v9789_v19 }
 0x263   : > { %6723 = vmatpush1.bf16.msra.mxu0 %v11218_v29  ;;  %6883 = vmatpush1.bf16.msra.mxu1 %v11218_v29  ;;  %v8129_v29 = vld [vmem:[%s8630_s9 + $0x278] sm:$0xff] }
 0x264   : > { %6725 = vmatprep.subr.bf16.mxu0 %v11219_v57  ;;  %6885 = vmatprep.subr.bf16.mxu1 %v11219_v57  ;;  %v11230_v57 = vld [vmem:[#allocation90_spill] sm:$0xff] }
 0x265   : > { %2468 = vmatmul.mubr.f32.gmra.mrb[76].mxu0 %v8119_v51  ;;  %3196 = vmatmul.mubr.f32.gmra.mrb[76].mxu1 %v9339_v36  ;;  %v9811_v36 = vld [vmem:[%s8630_s9 + $0x80] sm:$0xff]  ;;  %v11231_v51 = vld [vmem:[#allocation91_spill] sm:$0xff] }
 0x266   : > { %2473 = vmatprep.mubr.f32.mxu0 %v9346_v3  ;;  %3201 = vmatprep.mubr.f32.mxu1 %v9800_v56 }
 0x267   : > { %6727 = vmatpush1.bf16.msra.mxu0 %v11220_v8  ;;  %6887 = vmatpush1.bf16.msra.mxu1 %v11220_v8  ;;  %v8131_v8 = vld [vmem:[%s8630_s9 + $0x280] sm:$0xff] }
 0x268   : > { %6729 = vmatprep.subr.bf16.mxu0 %v11221_v39  ;;  %6889 = vmatprep.subr.bf16.mxu1 %v11221_v39  ;;  %v8133_v39 = vld [vmem:[%s8630_s9 + $0x288] sm:$0xff] }
 0x269   : > { %2474 = vmatmul.mubr.f32.gmra.mrb[78].mxu0 %v8121_v1  ;;  %3202 = vmatmul.mubr.f32.gmra.mrb[78].mxu1 %v9346_v3  ;;  %v9822_v3 = vld [vmem:[%s8630_s9 + $0x88] sm:$0xff]  ;;  %v9873_v1 = vld [vmem:[%s8630_s9 + $0xb0] sm:$0xff] }
 0x26a   : > { %2479 = vmatprep.mubr.f32.mxu0 %v9353_v11  ;;  %3207 = vmatprep.mubr.f32.mxu1 %v9811_v36 }
 0x26b   : > { %6731 = vmatpush1.bf16.msra.mxu0 %v11222_v47  ;;  %6891 = vmatpush1.bf16.msra.mxu1 %v11222_v47  ;;  %v9880_v47 = vld [vmem:[%s8630_s9 + $0xb8] sm:$0xff] }
 0x26c   : > { %6733 = vmatprep.subr.bf16.mxu0 %v11223_v9  ;;  %6893 = vmatprep.subr.bf16.mxu1 %v11223_v9  ;;  %v9887_v9 = vld [vmem:[%s8630_s9 + $0xc0] sm:$0xff] }
 0x26d   : > { %2480 = vmatmul.mubr.f32.gmra.mrb[80].mxu0 %v8123_v38  ;;  %3208 = vmatmul.mubr.f32.gmra.mrb[80].mxu1 %v9353_v11  ;;  %v9833_v11 = vld [vmem:[%s8630_s9 + $0x90] sm:$0xff]  ;;  %v9894_v38 = vld [vmem:[%s8630_s9 + $0xc8] sm:$0xff] }
 0x26e   : > { %2485 = vmatprep.mubr.f32.mxu0 %v9360_v49  ;;  %3213 = vmatprep.mubr.f32.mxu1 %v9822_v3 }
 0x26f   : > { %6735 = vmatpush1.bf16.msra.mxu0 %v11224_v43  ;;  %6895 = vmatpush1.bf16.msra.mxu1 %v11224_v43  ;;  %v9901_v43 = vld [vmem:[%s8630_s9 + $0xd0] sm:$0xff] }
 0x270   : > { %6737 = vmatprep.subr.bf16.mxu0 %v11225_v35  ;;  %6897 = vmatprep.subr.bf16.mxu1 %v11225_v35  ;;  %v8143_v35 = vld [vmem:[%s8630_s9 + $0x2b0] sm:$0xff] }
 0x271   : > { %2486 = vmatmul.mubr.f32.gmra.mrb[82].mxu0 %v8125_v17  ;;  %3214 = vmatmul.mubr.f32.gmra.mrb[82].mxu1 %v9360_v49  ;;  %v9844_v49 = vld [vmem:[%s8630_s9 + $0x98] sm:$0xff] }
 0x272   : > { %2491 = vmatprep.mubr.f32.mxu0 %v9367_v15  ;;  %3219 = vmatprep.mubr.f32.mxu1 %v9833_v11  ;;  %v8145_v17 = vld [vmem:[%s8630_s9 + $0x2b8] sm:$0xff] }
 0x273   : > { %6739 = vmatpush1.bf16.msra.mxu0 %v11226_v12  ;;  %6899 = vmatpush1.bf16.msra.mxu1 %v11226_v12 }
 0x274   : > { %6741 = vmatprep.subr.bf16.mxu0 %v11227_v23  ;;  %6901 = vmatprep.subr.bf16.mxu1 %v11227_v23 }
 0x275   : > { %2492 = vmatmul.mubr.f32.gmra.mrb[84].mxu0 %v8127_v53  ;;  %3220 = vmatmul.mubr.f32.gmra.mrb[84].mxu1 %v9367_v15  ;;  %v9855_v15 = vld [vmem:[%s8630_s9 + $0xa0] sm:$0xff] }
 0x276   : > { %2497 = vmatprep.mubr.f32.mxu0 %v9374_v33  ;;  %3225 = vmatprep.mubr.f32.mxu1 %v9844_v49 }
 0x277   : > { %6743 = vmatpush1.bf16.msra.mxu0 %v11228_v6  ;;  %6903 = vmatpush1.bf16.msra.mxu1 %v11228_v6 }
 0x278   : > { %6745 = vmatprep.subr.bf16.mxu0 %v11229_v0  ;;  %6905 = vmatprep.subr.bf16.mxu1 %v11229_v0  ;;  %v8147_v0 = vld [vmem:[%s8630_s9 + $0x2c8] sm:$0xff] }
 0x279   : > { %2498 = vmatmul.mubr.f32.gmra.mrb[86].mxu0 %v8129_v29  ;;  %3226 = vmatmul.mubr.f32.gmra.mrb[86].mxu1 %v9374_v33  ;;  %v9866_v33 = vld [vmem:[%s8630_s9 + $0xa8] sm:$0xff] }
 0x27a   : > { %2503 = vmatprep.mubr.f32.mxu0 %v9381_v10  ;;  %3231 = vmatprep.mubr.f32.mxu1 %v9855_v15 }
 0x27b   : > { %6747 = vmatpush1.bf16.msra.mxu0 %v11230_v57  ;;  %6907 = vmatpush1.bf16.msra.mxu1 %v11230_v57 }
 0x27c   : > { %6749 = vmatprep.subr.bf16.mxu0 %v11231_v51  ;;  %6909 = vmatprep.subr.bf16.mxu1 %v11231_v51 }
 0x27d   : > { %2504 = vmatmul.mubr.f32.gmra.mrb[88].mxu0 %v8131_v8  ;;  %3232 = vmatmul.mubr.f32.gmra.mrb[88].mxu1 %v9381_v10  ;;  %v8135_v10 = vld [vmem:[%s8630_s9 + $0x290] sm:$0xff] }
 0x27e   : > { %2509 = vmatprep.mubr.f32.mxu0 %v9388_v30  ;;  %3237 = vmatprep.mubr.f32.mxu1 %v9866_v33  ;;  %v8148_v8 = vld [vmem:[%s8630_s9 + $0x2d0] sm:$0xff] }
 0x281   : > { %2510 = vmatmul.mubr.f32.gmra.mrb[90].mxu0 %v8133_v39  ;;  %3238 = vmatmul.mubr.f32.gmra.mrb[90].mxu1 %v9388_v30  ;;  %v8137_v30 = vld [vmem:[%s8630_s9 + $0x298] sm:$0xff] }
 0x282   : > { %2515 = vmatprep.mubr.f32.mxu0 %v9395_v60  ;;  %3243 = vmatprep.mubr.f32.mxu1 %v9873_v1 }
 0x285   : > { %2516 = vmatmul.mubr.f32.gmra.mrb[92].mxu0 %v8135_v10  ;;  %3244 = vmatmul.mubr.f32.gmra.mrb[92].mxu1 %v9395_v60  ;;  %v8139_v60 = vld [vmem:[%s8630_s9 + $0x2a0] sm:$0xff] }
 0x286   : > { %2521 = vmatprep.mubr.f32.mxu0 %v9402_v62  ;;  %3249 = vmatprep.mubr.f32.mxu1 %v9880_v47 }
 0x289   : > { %2522 = vmatmul.mubr.f32.gmra.mrb[94].mxu0 %v8137_v30  ;;  %3250 = vmatmul.mubr.f32.gmra.mrb[94].mxu1 %v9402_v62  ;;  %v8141_v62 = vld [vmem:[%s8630_s9 + $0x2a8] sm:$0xff] }
 0x28a   : > { %2527 = vmatprep.mubr.f32.mxu0 %v9409_v24  ;;  %3255 = vmatprep.mubr.f32.mxu1 %v9887_v9 }
 0x28d   : > { %2528 = vmatmul.mubr.f32.gmra.mrb[96].mxu0 %v8139_v60  ;;  %3256 = vmatmul.mubr.f32.gmra.mrb[96].mxu1 %v9409_v24  ;;  %v9908_v24 = vld [vmem:[%s8630_s9 + $0xd8] sm:$0xff] }
 0x28e   : > { %2533 = vmatprep.mubr.f32.mxu0 %v9416_v54  ;;  %3261 = vmatprep.mubr.f32.mxu1 %v9894_v38 }
 0x291   : > { %2534 = vmatmul.mubr.f32.gmra.mrb[98].mxu0 %v8141_v62  ;;  %3262 = vmatmul.mubr.f32.gmra.mrb[98].mxu1 %v9416_v54  ;;  %v8146_v54 = vld [vmem:[%s8630_s9 + $0x2c0] sm:$0xff] }
 0x292   : > { %2539 = vmatprep.mubr.f32.mxu0 %v9423_v27  ;;  %3267 = vmatprep.mubr.f32.mxu1 %v9901_v43 }
 0x295   : > { %2540 = vmatmul.mubr.f32.gmra.mrb[100].mxu0 %v8143_v35  ;;  %3268 = vmatmul.mubr.f32.gmra.mrb[100].mxu1 %v9423_v27 }
 0x296   : > { %2545 = vmatprep.mubr.f32.mxu0 %v9430_v44  ;;  %3273 = vmatprep.mubr.f32.mxu1 %v9908_v24 }
 0x299   : > { %2546 = vmatmul.mubr.f32.gmra.mrb[102].mxu0 %v8145_v17  ;;  %3274 = vmatmul.mubr.f32.gmra.mrb[102].mxu1 %v9430_v44  ;;  %v8149_v17 = vld [vmem:[%s8630_s9 + $0x2d8] sm:$0xff] }
 0x29a   : > { %2551 = vmatprep.mubr.f32.mxu0 %v9437_v59  ;;  %3279 = vmatprep.mubr.f32.mxu1 %v9440_v21 }
 0x29d   : > { %2552 = vmatmul.mubr.f32.gmra.mrb[104].mxu0 %v8146_v54  ;;  %3280 = vmatmul.mubr.f32.gmra.mrb[104].mxu1 %v9437_v59 }
 0x29e   : > { %2557 = vmatprep.mubr.f32.mxu0 %v9447_v63  ;;  %3285 = vmatprep.mubr.f32.mxu1 %v9450_v31 }
 0x2a0   : > { %v1273_v27 = vpop.f32.mrb[0].mxu0  ;;  %v2001_v12 = vpop.f32.mrb[0].mxu1 }
 0x2a1   : > { %v2168_v23 = vmax.f32 %v1273_v27, %v2001_v12  ;;  %v1275_v53 = vpop.f32.mrb[1].mxu0  ;;  %v2003_v6 = vpop.f32.mrb[1].mxu1  ;;  %2558 = vmatmul.mubr.f32.gmra.mrb[106].mxu0 %v8147_v0  ;;  %3286 = vmatmul.mubr.f32.gmra.mrb[106].mxu1 %v9447_v63  ;;  %v9930_v63 = vld [vmem:[%s8630_s9 + $0x220] sm:$0xff]  ;;  %v9941_v12 = vld [vmem:[%s8630_s9 + $0x228] sm:$0xff] }
 0x2a2   : > { %v2169_v44 = vmax.f32 %v1275_v53, %v2003_v6  ;;  %2563 = vmatprep.mubr.f32.mxu0 %v9457_v58  ;;  %3291 = vmatprep.mubr.f32.mxu1 %v9460_v45  ;;  %v11232_v0 = vld [vmem:[#allocation105_spill] sm:$0xff] }
 0x2a4   : > { %v9923_v59 = vmax.f32 %v2168_v23, %v2169_v44  ;;  %v1279_v21 = vpop.f32.mrb[2].mxu0  ;;  %v2007_v31 = vpop.f32.mrb[2].mxu1  ;;  %v9950_v44 = vld [vmem:[%s8630_s9 + $0x230] sm:$0xff] }
 0x2a5   : > { %v2170_v29 = vmax.f32 %v1279_v21, %v2007_v31  ;;  %v1281_v57 = vpop.f32.mrb[3].mxu0  ;;  %v2009_v51 = vpop.f32.mrb[3].mxu1  ;;  %2564 = vmatmul.mubr.f32.gmra.mrb[108].mxu0 %v8148_v8  ;;  %3292 = vmatmul.mubr.f32.gmra.mrb[108].mxu1 %v9457_v58 }
 0x2a6   : > { %v2171_v39 = vmax.f32 %v1281_v57, %v2009_v51  ;;  %2569 = vmatprep.mubr.f32.mxu0 %v9467_v52  ;;  %3297 = vmatprep.mubr.f32.mxu1 %v9470_v42  ;;  %v11233_v57 = vld [vmem:[#allocation107_spill] sm:$0xff] }
 0x2a8   : > { %v9932_v45 = vmax.f32 %v2170_v29, %v2171_v39  ;;  %v1285_v10 = vpop.f32.mrb[4].mxu0  ;;  %v2013_v30 = vpop.f32.mrb[4].mxu1  ;;  %v9961_v39 = vld [vmem:[%s8630_s9 + $0x238] sm:$0xff] }
 0x2a9   : > { %v2172_v60 = vmax.f32 %v1285_v10, %v2013_v30  ;;  %v1287_v62 = vpop.f32.mrb[5].mxu0  ;;  %v2015_v35 = vpop.f32.mrb[5].mxu1  ;;  %2570 = vmatmul.mubr.f32.gmra.mrb[110].mxu0 %v8149_v17  ;;  %3298 = vmatmul.mubr.f32.gmra.mrb[110].mxu1 %v9467_v52  ;;  %v11234_v10 = vld [vmem:[#allocation108_spill] sm:$0xff] }
 0x2aa   : > { %v2173_v58 = vmax.f32 %v1287_v62, %v2015_v35  ;;  %2640 = vmatprep.mubr.f32.mxu0 %v9481_v4  ;;  %3368 = vmatprep.mubr.f32.mxu1 %v9930_v63  ;;  %v11235_v35 = vld [vmem:[#allocation109_spill] sm:$0xff] }
 0x2ac   : > { %v9938_v42 = vmax.f32 %v2172_v60, %v2173_v58  ;;  %v1291_v54 = vpop.f32.mrb[6].mxu0  ;;  %v2019_v27 = vpop.f32.mrb[6].mxu1 }
 0x2ad   : > { %v2174_v23 = vmax.f32 %v1291_v54, %v2019_v27  ;;  %v1293_v53 = vpop.f32.mrb[7].mxu0  ;;  %v2021_v6 = vpop.f32.mrb[7].mxu1  ;;  %2641 = vmatmul.mubr.f32.vlgmr.msra.gmra.mrb[56].mxu0 %v9683_v34  ;;  %3369 = vmatmul.mubr.f32.vlgmr.msra.gmra.mrb[56].mxu1 %v9481_v4  ;;  %v9974_v54 = vld [vmem:[%s8630_s9 + $0x240] sm:$0xff]  ;;  %v11236_v27 = vld [vmem:[#allocation110_spill] sm:$0xff] }
 0x2ae   : > { %v2175_v52 = vmax.f32 %v1293_v53, %v2021_v6  ;;  %6751 = vmatpush1.bf16.msra.mxu0 %v11232_v0  ;;  %6911 = vmatpush1.bf16.msra.mxu1 %v11232_v0 }
 0x2af   : > { %2646 = vmatprep.mubr.f32.mxu0 %v9488_v20  ;;  %3374 = vmatprep.mubr.f32.mxu1 %v9941_v12 }
 0x2b0   : > { %v9952_v21 = vmax.f32 %v2174_v23, %v2175_v52  ;;  %v1297_v31 = vpop.f32.mrb[8].mxu0  ;;  %v2025_v29 = vpop.f32.mrb[8].mxu1  ;;  %6753 = vmatprep.subr.bf16.mxu0 %v11233_v57  ;;  %6913 = vmatprep.subr.bf16.mxu1 %v11233_v57  ;;  %v11237_v52 = vld [vmem:[#allocation111_spill] sm:$0xff]  ;;  %v11238_v57 = vld [vmem:[#allocation112_spill] sm:$0xff] }
 0x2b1   : > { %v2176_v4 = vmax.f32 %v1297_v31, %v2025_v29  ;;  %v1299_v34 = vpop.f32.mrb[9].mxu0  ;;  %v2027_v51 = vpop.f32.mrb[9].mxu1  ;;  %2647 = vmatmul.mubr.f32.gmra.mrb[58].mxu0 %v9692_v28  ;;  %3375 = vmatmul.mubr.f32.gmra.mrb[58].mxu1 %v9488_v20  ;;  %v9987_v29 = vld [vmem:[%s8630_s9 + $0x248] sm:$0xff] }
 0x2b2   : > { %v2177_v8 = vmax.f32 %v1299_v34, %v2027_v51  ;;  %2652 = vmatprep.mubr.f32.mxu0 %v9499_v18  ;;  %3380 = vmatprep.mubr.f32.mxu1 %v9950_v44 }
 0x2b3   : > { %6755 = vmatpush1.bf16.msra.mxu0 %v11234_v10  ;;  %6915 = vmatpush1.bf16.msra.mxu1 %v11234_v10 }
 0x2b4   : > { %v9965_v30 = vmax.f32 %v2176_v4, %v2177_v8  ;;  %v1303_v60 = vpop.f32.mrb[10].mxu0  ;;  %v2031_v62 = vpop.f32.mrb[10].mxu1  ;;  %6757 = vmatprep.subr.bf16.mxu0 %v11235_v35  ;;  %6917 = vmatprep.subr.bf16.mxu1 %v11235_v35  ;;  %v11239_v8 = vld [vmem:[#allocation113_spill] sm:$0xff] }
 0x2b5   : > { %v2178_v20 = vmax.f32 %v1303_v60, %v2031_v62  ;;  %v1305_v28 = vpop.f32.mrb[11].mxu0  ;;  %v2033_v17 = vpop.f32.mrb[11].mxu1  ;;  %2653 = vmatmul.mubr.f32.gmra.mrb[60].mxu0 %v9701_v46  ;;  %3381 = vmatmul.mubr.f32.gmra.mrb[60].mxu1 %v9499_v18  ;;  %v10000_v62 = vld [vmem:[%s8630_s9 + $0x250] sm:$0xff] }
 0x2b6   : > { %v2179_v58 = vmax.f32 %v1305_v28, %v2033_v17  ;;  %2658 = vmatprep.mubr.f32.mxu0 %v9510_v50  ;;  %3386 = vmatprep.mubr.f32.mxu1 %v9961_v39 }
 0x2b7   : > { %6759 = vmatpush1.bf16.msra.mxu0 %v11236_v27  ;;  %6919 = vmatpush1.bf16.msra.mxu1 %v11236_v27  ;;  %v11240_v27 = vld [vmem:[#allocation114_spill] sm:$0xff] }
 0x2b8   : > { %v9978_v23 = vmax.f32 %v2178_v20, %v2179_v58  ;;  %v1309_v53 = vpop.f32.mrb[12].mxu0  ;;  %v2037_v6 = vpop.f32.mrb[12].mxu1  ;;  %6761 = vmatprep.subr.bf16.mxu0 %v11237_v52  ;;  %6921 = vmatprep.subr.bf16.mxu1 %v11237_v52 }
 0x2b9   : > { %v2180_v18 = vmax.f32 %v1309_v53, %v2037_v6  ;;  %v1311_v46 = vpop.f32.mrb[13].mxu0  ;;  %v2039_v0 = vpop.f32.mrb[13].mxu1  ;;  %2659 = vmatmul.mubr.f32.gmra.mrb[62].mxu0 %v9712_v16  ;;  %3387 = vmatmul.mubr.f32.gmra.mrb[62].mxu1 %v9510_v50 }
 0x2ba   : > { %v2181_v31 = vmax.f32 %v1311_v46, %v2039_v0  ;;  %2664 = vmatprep.mubr.f32.mxu0 %v9521_v2  ;;  %3392 = vmatprep.mubr.f32.mxu1 %v9974_v54  ;;  %v10026_v46 = vld [vmem:[%s8630_s9 + $0x260] sm:$0xff]  ;;  %v11241_v0 = vld [vmem:[#allocation115_spill] sm:$0xff] }
 0x2bb   : > { %6763 = vmatpush1.bf16.msra.mxu0 %v11238_v57  ;;  %6923 = vmatpush1.bf16.msra.mxu1 %v11238_v57 }
 0x2bc   : > { %v9991_v4 = vmax.f32 %v2180_v18, %v2181_v31  ;;  %v1315_v34 = vpop.f32.mrb[14].mxu0  ;;  %v2043_v51 = vpop.f32.mrb[14].mxu1  ;;  %6765 = vmatprep.subr.bf16.mxu0 %v11239_v8  ;;  %6925 = vmatprep.subr.bf16.mxu1 %v11239_v8 }
 0x2bd   : > { %v2182_v50 = vmax.f32 %v1315_v34, %v2043_v51  ;;  %v1317_v16 = vpop.f32.mrb[15].mxu0  ;;  %v2045_v10 = vpop.f32.mrb[15].mxu1  ;;  %2665 = vmatmul.mubr.f32.gmra.mrb[64].mxu0 %v9723_v25  ;;  %3393 = vmatmul.mubr.f32.gmra.mrb[64].mxu1 %v9521_v2  ;;  %v11242_v34 = vld [vmem:[#allocation116_spill] sm:$0xff] }
 0x2be   : > { %v2183_v60 = vmax.f32 %v1317_v16, %v2045_v10  ;;  %2670 = vmatprep.mubr.f32.mxu0 %v9532_v48  ;;  %3398 = vmatprep.mubr.f32.mxu1 %v9987_v29  ;;  %v11243_v16 = vld [vmem:[#allocation117_spill] sm:$0xff] }
 0x2bf   : > { %6767 = vmatpush1.bf16.msra.mxu0 %v9274_v13  ;;  %6927 = vmatpush1.bf16.msra.mxu1 %v9274_v13  ;;  %v10013_v13 = vld [vmem:[%s8630_s9 + $0x258] sm:$0xff] }
 0x2c0   : > { %v10004_v35 = vmax.f32 %v2182_v50, %v2183_v60  ;;  %v1321_v20 = vpop.f32.mrb[16].mxu0  ;;  %v2049_v28 = vpop.f32.mrb[16].mxu1  ;;  %6769 = vmatprep.subr.bf16.mxu0 %v9278_v14  ;;  %6929 = vmatprep.subr.bf16.mxu1 %v9278_v14  ;;  %v10039_v50 = vld [vmem:[%s8630_s9 + $0x268] sm:$0xff] }
 0x2c1   : > { %v2184_v2 = vmax.f32 %v1321_v20, %v2049_v28  ;;  %v1323_v25 = vpop.f32.mrb[17].mxu0  ;;  %v2051_v17 = vpop.f32.mrb[17].mxu1  ;;  %2671 = vmatmul.mubr.f32.gmra.mrb[66].mxu0 %v9734_v7  ;;  %3399 = vmatmul.mubr.f32.gmra.mrb[66].mxu1 %v9532_v48 }
 0x2c2   : > { %v2185_v58 = vmax.f32 %v1323_v25, %v2051_v17  ;;  %2676 = vmatprep.mubr.f32.mxu0 %v9543_v41  ;;  %3404 = vmatprep.mubr.f32.mxu1 %v10000_v62  ;;  %v8150_v25 = vld [vmem:[%s8630_s9 + $0x168] sm:$0xff]  ;;  %v10050_v17 = vld [vmem:[%s8630_s9 + $0x270] sm:$0xff] }
 0x2c3   : > { %6771 = vmatpush1.bf16.msra.mxu0 %v11240_v27  ;;  %6931 = vmatpush1.bf16.msra.mxu1 %v11240_v27 }
 0x2c4   : > { %v10017_v14 = vmax.f32 %v2184_v2, %v2185_v58  ;;  %v1327_v53 = vpop.f32.mrb[18].mxu0  ;;  %v2055_v6 = vpop.f32.mrb[18].mxu1  ;;  %6773 = vmatprep.subr.bf16.mxu0 %v9293_v61  ;;  %6933 = vmatprep.subr.bf16.mxu1 %v9293_v61 }
 0x2c5   : > { %v2186_v48 = vmax.f32 %v1327_v53, %v2055_v6  ;;  %v1329_v7 = vpop.f32.mrb[19].mxu0  ;;  %v2057_v52 = vpop.f32.mrb[19].mxu1  ;;  %2677 = vmatmul.mubr.f32.gmra.mrb[68].mxu0 %v9745_v26  ;;  %3405 = vmatmul.mubr.f32.gmra.mrb[68].mxu1 %v9543_v41 }
 0x2c6   : > { %v2187_v18 = vmax.f32 %v1329_v7, %v2057_v52  ;;  %2682 = vmatprep.mubr.f32.mxu0 %v9554_v5  ;;  %3410 = vmatprep.mubr.f32.mxu1 %v10013_v13  ;;  %v10058_v52 = vld [vmem:[%s8630_s9 + $0x278] sm:$0xff] }
 0x2c7   : > { %6775 = vmatpush1.bf16.msra.mxu0 %v11241_v0  ;;  %6935 = vmatpush1.bf16.msra.mxu1 %v11241_v0 }
 0x2c8   : > { %v10030_v61 = vmax.f32 %v2186_v48, %v2187_v18  ;;  %v1333_v31 = vpop.f32.mrb[20].mxu0  ;;  %v2061_v57 = vpop.f32.mrb[20].mxu1  ;;  %6777 = vmatprep.subr.bf16.mxu0 %v11242_v34  ;;  %6937 = vmatprep.subr.bf16.mxu1 %v11242_v34 }
 0x2c9   : > { %v2188_v41 = vmax.f32 %v1333_v31, %v2061_v57  ;;  %v1335_v26 = vpop.f32.mrb[21].mxu0  ;;  %v2063_v51 = vpop.f32.mrb[21].mxu1  ;;  %2683 = vmatmul.mubr.f32.gmra.mrb[70].mxu0 %v9756_v37  ;;  %3411 = vmatmul.mubr.f32.gmra.mrb[70].mxu1 %v9554_v5 }
 0x2ca   : > { %v2189_v8 = vmax.f32 %v1335_v26, %v2063_v51  ;;  %2688 = vmatprep.mubr.f32.mxu0 %v9565_v55  ;;  %3416 = vmatprep.mubr.f32.mxu1 %v10026_v46  ;;  %v8152_v26 = vld [vmem:[%s8630_s9 + $0x178] sm:$0xff]  ;;  %v10066_v51 = vld [vmem:[%s8630_s9 + $0x280] sm:$0xff] }
 0x2cb   : > { %6779 = vmatpush1.bf16.msra.mxu0 %v11243_v16  ;;  %6939 = vmatpush1.bf16.msra.mxu1 %v11243_v16 }
 0x2cc   : > { %v10043_v10 = vmax.f32 %v2188_v41, %v2189_v8  ;;  %v1339_v60 = vpop.f32.mrb[22].mxu0  ;;  %v2067_v20 = vpop.f32.mrb[22].mxu1 }
 0x2cd   : > { %v2190_v37 = vmax.f32 %v1339_v60, %v2067_v20  ;;  %v1341_v28 = vpop.f32.mrb[23].mxu0  ;;  %v2069_v5 = vpop.f32.mrb[23].mxu1  ;;  %2689 = vmatmul.mubr.f32.gmra.mrb[72].mxu0 %v9767_v22  ;;  %3417 = vmatmul.mubr.f32.gmra.mrb[72].mxu1 %v9565_v55  ;;  %v8151_v22 = vld [vmem:[%s8630_s9 + $0x170] sm:$0xff] }
 0x2ce   : > { %v2191_v2 = vmax.f32 %v1341_v28, %v2069_v5  ;;  %2694 = vmatprep.mubr.f32.mxu0 %v8150_v25  ;;  %3422 = vmatprep.mubr.f32.mxu1 %v10039_v50  ;;  %v8153_v5 = vld [vmem:[%s8630_s9 + $0x180] sm:$0xff] }
 0x2d0   : > { %v10052_v58 = vmax.f32 %v2190_v37, %v2191_v2  ;;  %v1345_v27 = vpop.f32.mrb[24].mxu0  ;;  %v2073_v53 = vpop.f32.mrb[24].mxu1  ;;  %v10074_v2 = vld [vmem:[%s8630_s9 + $0x288] sm:$0xff] }
 0x2d1   : > { %v2192_v6 = vmax.f32 %v1345_v27, %v2073_v53  ;;  %v1347_v48 = vpop.f32.mrb[25].mxu0  ;;  %v2075_v7 = vpop.f32.mrb[25].mxu1  ;;  %2695 = vmatmul.mubr.f32.gmra.mrb[74].mxu0 %v9778_v40  ;;  %3423 = vmatmul.mubr.f32.gmra.mrb[74].mxu1 %v8150_v25 }
 0x2d2   : > { %v2193_v55 = vmax.f32 %v1347_v48, %v2075_v7  ;;  %2700 = vmatprep.mubr.f32.mxu0 %v8151_v22  ;;  %3428 = vmatprep.mubr.f32.mxu1 %v10050_v17 }
 0x2d4   : > { %v10060_v18 = vmax.f32 %v2192_v6, %v2193_v55  ;;  %v1351_v0 = vpop.f32.mrb[26].mxu0  ;;  %v2079_v31 = vpop.f32.mrb[26].mxu1  ;;  %v8154_v55 = vld [vmem:[%s8630_s9 + $0x188] sm:$0xff] }
 0x2d5   : > { %v2194_v57 = vmax.f32 %v1351_v0, %v2079_v31  ;;  %v1353_v34 = vpop.f32.mrb[27].mxu0  ;;  %v2081_v41 = vpop.f32.mrb[27].mxu1  ;;  %2701 = vmatmul.mubr.f32.gmra.mrb[76].mxu0 %v9789_v19  ;;  %3429 = vmatmul.mubr.f32.gmra.mrb[76].mxu1 %v8151_v22  ;;  %v10082_v22 = vld [vmem:[%s8630_s9 + $0x290] sm:$0xff] }
 0x2d6   : > { %v2195_v40 = vmax.f32 %v1353_v34, %v2081_v41  ;;  %2706 = vmatprep.mubr.f32.mxu0 %v8152_v26  ;;  %3434 = vmatprep.mubr.f32.mxu1 %v10058_v52 }
 0x2d8   : > { %v10068_v8 = vmax.f32 %v2194_v57, %v2195_v40  ;;  %v1357_v16 = vpop.f32.mrb[28].mxu0  ;;  %v2085_v60 = vpop.f32.mrb[28].mxu1 }
 0x2d9   : > { %v2196_v20 = vmax.f32 %v1357_v16, %v2085_v60  ;;  %v1359_v37 = vpop.f32.mrb[29].mxu0  ;;  %v2087_v28 = vpop.f32.mrb[29].mxu1  ;;  %2707 = vmatmul.mubr.f32.gmra.mrb[78].mxu0 %v9800_v56  ;;  %3435 = vmatmul.mubr.f32.gmra.mrb[78].mxu1 %v8152_v26  ;;  %v8155_v26 = vld [vmem:[%s8630_s9 + $0x190] sm:$0xff]  ;;  %v10090_v16 = vld [vmem:[%s8630_s9 + $0x298] sm:$0xff] }
 0x2da   : > { %v2197_v19 = vmax.f32 %v1359_v37, %v2087_v28  ;;  %2712 = vmatprep.mubr.f32.mxu0 %v8153_v5  ;;  %3440 = vmatprep.mubr.f32.mxu1 %v10066_v51 }
 0x2dc   : > { %v10076_v25 = vmax.f32 %v2196_v20, %v2197_v19  ;;  %v1363_v27 = vpop.f32.mrb[30].mxu0  ;;  %v2091_v53 = vpop.f32.mrb[30].mxu1 }
 0x2dd   : > { %v2198_v6 = vmax.f32 %v1363_v27, %v2091_v53  ;;  %v1365_v48 = vpop.f32.mrb[31].mxu0  ;;  %v2093_v7 = vpop.f32.mrb[31].mxu1  ;;  %2713 = vmatmul.mubr.f32.gmra.mrb[80].mxu0 %v9811_v36  ;;  %3441 = vmatmul.mubr.f32.gmra.mrb[80].mxu1 %v8153_v5  ;;  %v8156_v27 = vld [vmem:[%s8630_s9 + $0x198] sm:$0xff]  ;;  %v10098_v53 = vld [vmem:[%s8630_s9 + $0x2a0] sm:$0xff] }
 0x2de   : > { %v2199_v56 = vmax.f32 %v1365_v48, %v2093_v7  ;;  %2718 = vmatprep.mubr.f32.mxu0 %v8154_v55  ;;  %3446 = vmatprep.mubr.f32.mxu1 %v10074_v2 }
 0x2e0   : > { %v10084_v0 = vmax.f32 %v2198_v6, %v2199_v56  ;;  %v1369_v31 = vpop.f32.mrb[32].mxu0  ;;  %v2097_v57 = vpop.f32.mrb[32].mxu1 }
 0x2e1   : > { %v2200_v34 = vmax.f32 %v1369_v31, %v2097_v57  ;;  %v1371_v41 = vpop.f32.mrb[33].mxu0  ;;  %v2099_v40 = vpop.f32.mrb[33].mxu1  ;;  %2719 = vmatmul.mubr.f32.gmra.mrb[82].mxu0 %v9822_v3  ;;  %3447 = vmatmul.mubr.f32.gmra.mrb[82].mxu1 %v8154_v55  ;;  %v8157_v57 = vld [vmem:[%s8630_s9 + $0x1a0] sm:$0xff] }
 0x2e2   : > { %v2201_v36 = vmax.f32 %v1371_v41, %v2099_v40  ;;  %2724 = vmatprep.mubr.f32.mxu0 %v8155_v26  ;;  %3452 = vmatprep.mubr.f32.mxu1 %v10082_v22 }
 0x2e4   : > { %v10092_v60 = vmax.f32 %v2200_v34, %v2201_v36  ;;  %v1375_v20 = vpop.f32.mrb[34].mxu0  ;;  %v2103_v37 = vpop.f32.mrb[34].mxu1  ;;  %v10106_v34 = vld [vmem:[%s8630_s9 + $0x2a8] sm:$0xff] }
 0x2e5   : > { %v2202_v28 = vmax.f32 %v1375_v20, %v2103_v37  ;;  %v1377_v19 = vpop.f32.mrb[35].mxu0  ;;  %v2105_v5 = vpop.f32.mrb[35].mxu1  ;;  %2725 = vmatmul.mubr.f32.gmra.mrb[84].mxu0 %v9833_v11  ;;  %3453 = vmatmul.mubr.f32.gmra.mrb[84].mxu1 %v8155_v26 }
 0x2e6   : > { %v2203_v3 = vmax.f32 %v1377_v19, %v2105_v5  ;;  %2730 = vmatprep.mubr.f32.mxu0 %v8156_v27  ;;  %3458 = vmatprep.mubr.f32.mxu1 %v10090_v16  ;;  %v10114_v19 = vld [vmem:[%s8630_s9 + $0x2b0] sm:$0xff] }
 0x2e8   : > { %v10100_v6 = vmax.f32 %v2202_v28, %v2203_v3  ;;  %v1381_v48 = vpop.f32.mrb[36].mxu0  ;;  %v2109_v7 = vpop.f32.mrb[36].mxu1  ;;  %v8158_v28 = vld [vmem:[%s8630_s9 + $0x1a8] sm:$0xff] }
 0x2e9   : > { %v2204_v56 = vmax.f32 %v1381_v48, %v2109_v7  ;;  %v1383_v55 = vpop.f32.mrb[37].mxu0  ;;  %v2111_v31 = vpop.f32.mrb[37].mxu1  ;;  %2731 = vmatmul.mubr.f32.gmra.mrb[86].mxu0 %v9844_v49  ;;  %3459 = vmatmul.mubr.f32.gmra.mrb[86].mxu1 %v8156_v27 }
 0x2ea   : > { %v2205_v11 = vmax.f32 %v1383_v55, %v2111_v31  ;;  %2736 = vmatprep.mubr.f32.mxu0 %v8157_v57  ;;  %3464 = vmatprep.mubr.f32.mxu1 %v10098_v53  ;;  %v8159_v55 = vld [vmem:[%s8630_s9 + $0x1b0] sm:$0xff]  ;;  %v10122_v31 = vld [vmem:[%s8630_s9 + $0x2b8] sm:$0xff] }
 0x2ec   : > { %v10108_v41 = vmax.f32 %v2204_v56, %v2205_v11  ;;  %v1387_v40 = vpop.f32.mrb[38].mxu0  ;;  %v2115_v36 = vpop.f32.mrb[38].mxu1 }
 0x2ed   : > { %v2206_v26 = vmax.f32 %v1387_v40, %v2115_v36  ;;  %v1389_v20 = vpop.f32.mrb[39].mxu0  ;;  %v2117_v37 = vpop.f32.mrb[39].mxu1  ;;  %2737 = vmatmul.mubr.f32.gmra.mrb[88].mxu0 %v9855_v15  ;;  %3465 = vmatmul.mubr.f32.gmra.mrb[88].mxu1 %v8157_v57 }
 0x2ee   : > { %v2207_v49 = vmax.f32 %v1389_v20, %v2117_v37  ;;  %2742 = vmatprep.mubr.f32.mxu0 %v8158_v28  ;;  %3470 = vmatprep.mubr.f32.mxu1 %v10106_v34  ;;  %v8160_v37 = vld [vmem:[%s8630_s9 + $0x1b8] sm:$0xff] }
 0x2f0   : > { %v10116_v5 = vmax.f32 %v2206_v26, %v2207_v49  ;;  %v1393_v3 = vpop.f32.mrb[40].mxu0  ;;  %v2121_v27 = vpop.f32.mrb[40].mxu1  ;;  %v10130_v49 = vld [vmem:[%s8630_s9 + $0x2c0] sm:$0xff] }
 0x2f1   : > { %v2208_v48 = vmax.f32 %v1393_v3, %v2121_v27  ;;  %v1395_v7 = vpop.f32.mrb[41].mxu0  ;;  %v2123_v56 = vpop.f32.mrb[41].mxu1  ;;  %2743 = vmatmul.mubr.f32.gmra.mrb[90].mxu0 %v9866_v33  ;;  %3471 = vmatmul.mubr.f32.gmra.mrb[90].mxu1 %v8158_v28 }
 0x2f2   : > { %v2209_v15 = vmax.f32 %v1395_v7, %v2123_v56  ;;  %2748 = vmatprep.mubr.f32.mxu0 %v8159_v55  ;;  %3476 = vmatprep.mubr.f32.mxu1 %v10114_v19 }
 0x2f4   : > { %v10124_v11 = vmax.f32 %v2208_v48, %v2209_v15  ;;  %v1399_v57 = vpop.f32.mrb[42].mxu0  ;;  %v2127_v40 = vpop.f32.mrb[42].mxu1  ;;  %v8161_v15 = vld [vmem:[%s8630_s9 + $0x1c0] sm:$0xff] }
 0x2f5   : > { %v2210_v36 = vmax.f32 %v1399_v57, %v2127_v40  ;;  %v1401_v26 = vpop.f32.mrb[43].mxu0  ;;  %v2129_v20 = vpop.f32.mrb[43].mxu1  ;;  %2749 = vmatmul.mubr.f32.gmra.mrb[92].mxu0 %v9873_v1  ;;  %3477 = vmatmul.mubr.f32.gmra.mrb[92].mxu1 %v8159_v55  ;;  %v10138_v55 = vld [vmem:[%s8630_s9 + $0x2c8] sm:$0xff] }
 0x2f6   : > { %v2211_v33 = vmax.f32 %v1401_v26, %v2129_v20  ;;  %2754 = vmatprep.mubr.f32.mxu0 %v8160_v37  ;;  %3482 = vmatprep.mubr.f32.mxu1 %v10122_v31 }
 0x2f8   : > { %v10132_v28 = vmax.f32 %v2210_v36, %v2211_v33  ;;  %v1405_v3 = vpop.f32.mrb[44].mxu0  ;;  %v2133_v27 = vpop.f32.mrb[44].mxu1 }
 0x2f9   : > { %v2212_v48 = vmax.f32 %v1405_v3, %v2133_v27  ;;  %v1407_v7 = vpop.f32.mrb[45].mxu0  ;;  %v2135_v56 = vpop.f32.mrb[45].mxu1  ;;  %2755 = vmatmul.mubr.f32.gmra.mrb[94].mxu0 %v9880_v47  ;;  %3483 = vmatmul.mubr.f32.gmra.mrb[94].mxu1 %v8160_v37  ;;  %v8162_v37 = vld [vmem:[%s8630_s9 + $0x1c8] sm:$0xff]  ;;  %v10146_v3 = vld [vmem:[%s8630_s9 + $0x2d0] sm:$0xff] }
 0x2fa   : > { %v2213_v1 = vmax.f32 %v1407_v7, %v2135_v56  ;;  %2760 = vmatprep.mubr.f32.mxu0 %v8161_v15  ;;  %3488 = vmatprep.mubr.f32.mxu1 %v10130_v49 }
 0x2fc   : > { %v10140_v57 = vmax.f32 %v2212_v48, %v2213_v1  ;;  %v1411_v40 = vpop.f32.mrb[46].mxu0  ;;  %v2139_v36 = vpop.f32.mrb[46].mxu1 }
 0x2fd   : > { %v2214_v26 = vmax.f32 %v1411_v40, %v2139_v36  ;;  %v1413_v20 = vpop.f32.mrb[47].mxu0  ;;  %v2141_v33 = vpop.f32.mrb[47].mxu1  ;;  %2761 = vmatmul.mubr.f32.gmra.mrb[96].mxu0 %v9887_v9  ;;  %3489 = vmatmul.mubr.f32.gmra.mrb[96].mxu1 %v8161_v15  ;;  %v8163_v15 = vld [vmem:[%s8630_s9 + $0x1d0] sm:$0xff]  ;;  %v10154_v36 = vld [vmem:[%s8630_s9 + $0x2d8] sm:$0xff] }
 0x2fe   : > { %11244 = vst [vmem:[#allocation103_spill] sm:$0xff] %v10140_v57  ;;  %v2215_v47 = vmax.f32 %v1413_v20, %v2141_v33  ;;  %2766 = vmatprep.mubr.f32.mxu0 %v8162_v37  ;;  %3494 = vmatprep.mubr.f32.mxu1 %v10138_v55  ;;  %v3921_v57 = vld [vmem:[#allocation7 + $0x58] sm:$0xff] }
 0x300   : > { %v10148_v27 = vmax.f32 %v2214_v26, %v2215_v47  ;;  %v1417_v48 = vpop.f32.mrb[48].mxu0  ;;  %v2145_v7 = vpop.f32.mrb[48].mxu1 }
 0x301   : > { %v2216_v56 = vmax.f32 %v1417_v48, %v2145_v7  ;;  %v1419_v1 = vpop.f32.mrb[49].mxu0  ;;  %v2147_v40 = vpop.f32.mrb[49].mxu1  ;;  %2767 = vmatmul.mubr.f32.gmra.mrb[98].mxu0 %v9894_v38  ;;  %3495 = vmatmul.mubr.f32.gmra.mrb[98].mxu1 %v8162_v37  ;;  %v8164_v37 = vld [vmem:[%s8630_s9 + $0x1d8] sm:$0xff] }
 0x302   : > { %11245 = vst [vmem:[#allocation24_spill] sm:$0xff] %v10148_v27  ;;  %v2217_v9 = vmax.f32 %v1419_v1, %v2147_v40  ;;  %2772 = vmatprep.mubr.f32.mxu0 %v8163_v15  ;;  %3500 = vmatprep.mubr.f32.mxu1 %v10146_v3  ;;  %v10162_v1 = vld [vmem:[%s8630_s9 + $0x2e0] sm:$0xff]  ;;  %v8167_v27 = vld [vmem:[%s8630_s9 + $0x1e8] sm:$0xff] }
 0x304   : > { %v10156_v20 = vmax.f32 %v2216_v56, %v2217_v9  ;;  %v1423_v26 = vpop.f32.mrb[50].mxu0  ;;  %v2151_v33 = vpop.f32.mrb[50].mxu1 }
 0x305   : > { %v2218_v47 = vmax.f32 %v1423_v26, %v2151_v33  ;;  %v1425_v48 = vpop.f32.mrb[51].mxu0  ;;  %v2153_v7 = vpop.f32.mrb[51].mxu1  ;;  %2773 = vmatmul.mubr.f32.gmra.mrb[100].mxu0 %v9901_v43  ;;  %3501 = vmatmul.mubr.f32.gmra.mrb[100].mxu1 %v8163_v15  ;;  %v8165_v15 = vld [vmem:[%s8630_s9 + $0x1e0] sm:$0xff] }
 0x306   : > { %11246 = vst [vmem:[#allocation25_spill] sm:$0xff] %v10156_v20  ;;  %v2219_v38 = vmax.f32 %v1425_v48, %v2153_v7  ;;  %2778 = vmatprep.mubr.f32.mxu0 %v8164_v37  ;;  %3506 = vmatprep.mubr.f32.mxu1 %v10154_v36  ;;  %v3911_v48 = vld [vmem:[#allocation7 + $0x8] sm:$0xff]  ;;  %v3913_v7 = vld [vmem:[#allocation7 + $0x18] sm:$0xff] }
 0x308   : > { %v10164_v40 = vmax.f32 %v2218_v47, %v2219_v38  ;;  %v1429_v56 = vpop.f32.mrb[52].mxu0  ;;  %v2157_v9 = vpop.f32.mrb[52].mxu1  ;;  %v10170_v47 = vld [vmem:[%s8630_s9 + $0x2e8] sm:$0xff]  ;;  %v6940_v38 = vpack.c.bf16 %v3913_v7, %v3911_v48  ;;  %v8169_v7 = vld [vmem:[%s8630_s9 + $0x1f0] sm:$0xff] }
 0x309   : > { %v2220_v32 = vmax.f32 %v1429_v56, %v2157_v9  ;;  %v1431_v26 = vpop.f32.mrb[53].mxu0  ;;  %v2159_v33 = vpop.f32.mrb[53].mxu1  ;;  %2779 = vmatmul.mubr.f32.gmra.mrb[102].mxu0 %v9908_v24  ;;  %3507 = vmatmul.mubr.f32.gmra.mrb[102].mxu1 %v8164_v37  ;;  %v8168_v48 = vld [vmem:[%s8630_s9 + $0xe8] sm:$0xff] }
 0x30a   : > { %11247 = vst [vmem:[#allocation26_spill] sm:$0xff] %v10164_v40  ;;  %v2221_v43 = vmax.f32 %v1431_v26, %v2159_v33  ;;  %2784 = vmatprep.mubr.f32.mxu0 %v8165_v15  ;;  %3512 = vmatprep.mubr.f32.mxu1 %v10162_v1  ;;  %v8166_v26 = vld [vmem:[%s8630_s9 + $0xe0] sm:$0xff] }
 0x30b   : > { %6941 = vmatprep.subr.bf16.mxu0 %v6940_v38  ;;  %7101 = vmatprep.subr.bf16.mxu1 %v6940_v38  ;;  %v3910_v38 = vld [vmem:[#allocation7] sm:$0xff] }
 0x30c   : > { %v10172_v40 = vmax.f32 %v2220_v32, %v2221_v43  ;;  %v1435_v56 = vpop.f32.mrb[54].mxu0  ;;  %v2163_v9 = vpop.f32.mrb[54].mxu1  ;;  %v10178_v32 = vld [vmem:[%s8630_s9 + $0x2f0] sm:$0xff] }
 0x30d   : > { %v2222_v24 = vmax.f32 %v1435_v56, %v2163_v9  ;;  %v1437_v20 = vpop.f32.mrb[55].mxu0  ;;  %v2165_v37 = vpop.f32.mrb[55].mxu1  ;;  %2785 = vmatmul.mubr.f32.gmra.mrb[104].mxu0 %v8166_v26  ;;  %3513 = vmatmul.mubr.f32.gmra.mrb[104].mxu1 %v8165_v15  ;;  %v8170_v15 = vld [vmem:[%s8630_s9 + $0xf0] sm:$0xff]  ;;  %v8171_v56 = vld [vmem:[%s8630_s9 + $0x1f8] sm:$0xff]  ;;  %v11250_v26 = vmov 0.0  }
 0x30e   : > { %11248 = vst [vmem:[#allocation27_spill] sm:$0xff] %v10172_v40  ;;  %v2223_v33 = vmax.f32 %v1437_v20, %v2165_v37  ;;  %2790 = vmatprep.mubr.f32.mxu0 %v8167_v27  ;;  %3518 = vmatprep.mubr.f32.mxu1 %v10170_v47  ;;  %v10186_v20 = vld [vmem:[%s8630_s9 + $0x2f8] sm:$0xff]  ;;  %v3912_v9 = vld [vmem:[#allocation7 + $0x10] sm:$0xff]  ;;  %v3919_v40 = vld [vmem:[#allocation7 + $0x48] sm:$0xff] }
 0x30f   : > { %v3917_v37 = vld [vmem:[#allocation7 + $0x38] sm:$0xff] }
 0x310   : > { %v10180_v43 = vmax.f32 %v2222_v24, %v2223_v33  ;;  %v8172_v24 = vld [vmem:[%s8630_s9 + $0xf8] sm:$0xff]  ;;  %v6058_v33 = vld [vmem:[%s8630_s9 + $0x320] sm:$0xff] }
 0x311   : > { %2791 = vmatmul.mubr.f32.gmra.mrb[106].mxu0 %v8168_v48  ;;  %3519 = vmatmul.mubr.f32.gmra.mrb[106].mxu1 %v8167_v27  ;;  %v3915_v27 = vld [vmem:[#allocation7 + $0x28] sm:$0xff]  ;;  %v6942_v48 = vpack.c.bf16 %v3912_v9, %v3910_v38  ;;  %v6948_v38 = vpack.c.bf16 %v3921_v57, %v3919_v40  ;;  %v3918_v9 = vld [vmem:[#allocation7 + $0x40] sm:$0xff]  ;;  %v3924_v40 = vld [vmem:[#allocation7 + $0x70] sm:$0xff] }
 0x312   : > { %11249 = vst [vmem:[#allocation28_spill] sm:$0xff] %v10180_v43  ;;  %2796 = vmatprep.mubr.f32.mxu0 %v8169_v7  ;;  %3524 = vmatprep.mubr.f32.mxu1 %v10178_v32  ;;  %v3916_v43 = vld [vmem:[#allocation7 + $0x30] sm:$0xff]  ;;  %v3922_v57 = vld [vmem:[#allocation7 + $0x60] sm:$0xff] }
 0x315   : > { %2797 = vmatmul.mubr.f32.gmra.mrb[108].mxu0 %v8170_v15  ;;  %3525 = vmatmul.mubr.f32.gmra.mrb[108].mxu1 %v8169_v7  ;;  %v6944_v15 = vpack.c.bf16 %v3917_v37, %v3915_v27  ;;  %v3914_v7 = vld [vmem:[#allocation7 + $0x20] sm:$0xff]  ;;  %v3920_v27 = vld [vmem:[#allocation7 + $0x50] sm:$0xff]  ;;  %v3925_v37 = vld [vmem:[#allocation7 + $0x78] sm:$0xff] }
 0x316   : > { %2802 = vmatprep.mubr.f32.mxu0 %v8171_v56  ;;  %3530 = vmatprep.mubr.f32.mxu1 %v10186_v20 }
 0x319   : > { %2803 = vmatmul.mubr.f32.gmra.mrb[110].mxu0 %v8172_v24  ;;  %3531 = vmatmul.mubr.f32.gmra.mrb[110].mxu1 %v8171_v56  ;;  %v6059_v56 = vld [vmem:[%s8630_s9 + $0x328] sm:$0xff]  ;;  %v6946_v24 = vpack.c.bf16 %v3916_v43, %v3914_v7  ;;  %v6061_v7 = vld [vmem:[%s8630_s9 + $0x338] sm:$0xff] }
 0x31a   : > { %2873 = vmatprep.mubr.f32.mxu0 %v11250_v26  ;;  %3601 = vmatprep.mubr.f32.mxu1 %v11250_v26 }
 0x31d   : > { %2874 = vmatmul.mubr.f32.vlgmr.msra.gmra.mrb[56].mxu0 %v9930_v63  ;;  %3602 = vmatmul.mubr.f32.vlgmr.msra.gmra.mrb[56].mxu1 %v6058_v33  ;;  %v3923_v63 = vld [vmem:[#allocation7 + $0x68] sm:$0xff]  ;;  %v6060_v33 = vld [vmem:[%s8630_s9 + $0x330] sm:$0xff] }
 0x31e   : > { %2879 = vmatprep.mubr.f32.mxu0 %v11250_v26  ;;  %3607 = vmatprep.mubr.f32.mxu1 %v11250_v26  ;;  %v6952_v43 = vpack.c.bf16 %v3925_v37, %v3923_v63  ;;  %v6062_v63 = vld [vmem:[%s8630_s9 + $0x340] sm:$0xff] }
 0x31f   : > { %6943 = vmatpush1.bf16.msra.mxu0 %v6942_v48  ;;  %7103 = vmatpush1.bf16.msra.mxu1 %v6942_v48  ;;  %v6950_v48 = vpack.c.bf16 %v3920_v27, %v3918_v9  ;;  %v3928_v9 = vld [vmem:[#allocation7 + $0x90] sm:$0xff]  ;;  %v3933_v27 = vld [vmem:[#allocation7 + $0xb8] sm:$0xff] }
 0x320   : > { %6945 = vmatprep.subr.bf16.mxu0 %v6944_v15  ;;  %7105 = vmatprep.subr.bf16.mxu1 %v6944_v15  ;;  %v3929_v15 = vld [vmem:[#allocation7 + $0x98] sm:$0xff] }
 0x321   : > { %2880 = vmatmul.mubr.f32.gmra.mrb[58].mxu0 %v9941_v12  ;;  %3608 = vmatmul.mubr.f32.gmra.mrb[58].mxu1 %v6059_v56  ;;  %v3927_v12 = vld [vmem:[#allocation7 + $0x88] sm:$0xff]  ;;  %v6954_v56 = vpack.c.bf16 %v3924_v40, %v3922_v57  ;;  %v3937_v57 = vld [vmem:[#allocation7 + $0xd8] sm:$0xff] }
 0x322   : > { %2885 = vmatprep.mubr.f32.mxu0 %v11250_v26  ;;  %3613 = vmatprep.mubr.f32.mxu1 %v11250_v26  ;;  %v6063_v40 = vld [vmem:[%s8630_s9 + $0x348] sm:$0xff] }
 0x323   : > { %6947 = vmatpush1.bf16.msra.mxu0 %v6946_v24  ;;  %7107 = vmatpush1.bf16.msra.mxu1 %v6946_v24  ;;  %v6956_v24 = vpack.c.bf16 %v3929_v15, %v3927_v12 }
 0x324   : > { %6949 = vmatprep.subr.bf16.mxu0 %v6948_v38  ;;  %7109 = vmatprep.subr.bf16.mxu1 %v6948_v38  ;;  %v3926_v38 = vld [vmem:[#allocation7 + $0x80] sm:$0xff] }
 0x325   : > { %2886 = vmatmul.mubr.f32.gmra.mrb[60].mxu0 %v9950_v44  ;;  %3614 = vmatmul.mubr.f32.gmra.mrb[60].mxu1 %v6060_v33  ;;  %v3931_v44 = vld [vmem:[#allocation7 + $0xa8] sm:$0xff]  ;;  %v6958_v37 = vpack.c.bf16 %v3928_v9, %v3926_v38  ;;  %v6064_v38 = vld [vmem:[%s8630_s9 + $0x350] sm:$0xff] }
 0x326   : > { %2891 = vmatprep.mubr.f32.mxu0 %v11250_v26  ;;  %3619 = vmatprep.mubr.f32.mxu1 %v11250_v26  ;;  %v6960_v33 = vpack.c.bf16 %v3933_v27, %v3931_v44  ;;  %v3938_v27 = vld [vmem:[#allocation7 + $0xe0] sm:$0xff] }
 0x327   : > { %6951 = vmatpush1.bf16.msra.mxu0 %v6950_v48  ;;  %7111 = vmatpush1.bf16.msra.mxu1 %v6950_v48  ;;  %v3930_v48 = vld [vmem:[#allocation7 + $0xa0] sm:$0xff] }
 0x328   : > { %6953 = vmatprep.subr.bf16.mxu0 %v6952_v43  ;;  %7113 = vmatprep.subr.bf16.mxu1 %v6952_v43  ;;  %v3932_v43 = vld [vmem:[#allocation7 + $0xb0] sm:$0xff] }
 0x329   : > { %2892 = vmatmul.mubr.f32.gmra.mrb[62].mxu0 %v9961_v39  ;;  %3620 = vmatmul.mubr.f32.gmra.mrb[62].mxu1 %v6061_v7  ;;  %v3935_v39 = vld [vmem:[#allocation7 + $0xc8] sm:$0xff]  ;;  %v6962_v12 = vpack.c.bf16 %v3932_v43, %v3930_v48  ;;  %v3934_v7 = vld [vmem:[#allocation7 + $0xc0] sm:$0xff] }
 0x32a   : > { %2897 = vmatprep.mubr.f32.mxu0 %v11250_v26  ;;  %3625 = vmatprep.mubr.f32.mxu1 %v11250_v26  ;;  %v6964_v15 = vpack.c.bf16 %v3937_v57, %v3935_v39  ;;  %v3942_v39 = vld [vmem:[#allocation7 + $0x100] sm:$0xff]  ;;  %v3944_v57 = vld [vmem:[#allocation7 + $0x110] sm:$0xff] }
 0x32b   : > { %6955 = vmatpush1.bf16.msra.mxu0 %v6954_v56  ;;  %7115 = vmatpush1.bf16.msra.mxu1 %v6954_v56  ;;  %v3936_v56 = vld [vmem:[#allocation7 + $0xd0] sm:$0xff] }
 0x32c   : > { %6957 = vmatprep.subr.bf16.mxu0 %v6956_v24  ;;  %7117 = vmatprep.subr.bf16.mxu1 %v6956_v24  ;;  %v3941_v24 = vld [vmem:[#allocation7 + $0xf8] sm:$0xff]  ;;  %v6966_v9 = vpack.c.bf16 %v3936_v56, %v3934_v7  ;;  %v3946_v56 = vld [vmem:[#allocation7 + $0x120] sm:$0xff] }
 0x32d   : > { %2898 = vmatmul.mubr.f32.gmra.mrb[64].mxu0 %v9974_v54  ;;  %3626 = vmatmul.mubr.f32.gmra.mrb[64].mxu1 %v6062_v63  ;;  %v3939_v54 = vld [vmem:[#allocation7 + $0xe8] sm:$0xff]  ;;  %v3940_v63 = vld [vmem:[#allocation7 + $0xf0] sm:$0xff] }
 0x32e   : > { %2903 = vmatprep.mubr.f32.mxu0 %v11250_v26  ;;  %3631 = vmatprep.mubr.f32.mxu1 %v11250_v26  ;;  %v6968_v44 = vpack.c.bf16 %v3941_v24, %v3939_v54  ;;  %v6970_v48 = vpack.c.bf16 %v3940_v63, %v3938_v27  ;;  %v3948_v54 = vld [vmem:[#allocation7 + $0x130] sm:$0xff]  ;;  %v3953_v24 = vld [vmem:[#allocation7 + $0x158] sm:$0xff]  ;;  %v3950_v27 = vld [vmem:[#allocation7 + $0x140] sm:$0xff] }
 0x32f   : > { %6959 = vmatpush1.bf16.msra.mxu0 %v6958_v37  ;;  %7119 = vmatpush1.bf16.msra.mxu1 %v6958_v37  ;;  %v3945_v37 = vld [vmem:[#allocation7 + $0x118] sm:$0xff]  ;;  %v3952_v63 = vld [vmem:[#allocation7 + $0x150] sm:$0xff] }
 0x330   : > { %6961 = vmatprep.subr.bf16.mxu0 %v6960_v33  ;;  %7121 = vmatprep.subr.bf16.mxu1 %v6960_v33  ;;  %v6065_v33 = vld [vmem:[%s8630_s9 + $0x358] sm:$0xff] }
 0x331   : > { %2904 = vmatmul.mubr.f32.gmra.mrb[66].mxu0 %v9987_v29  ;;  %3632 = vmatmul.mubr.f32.gmra.mrb[66].mxu1 %v6063_v40  ;;  %v3943_v29 = vld [vmem:[#allocation7 + $0x108] sm:$0xff]  ;;  %v3949_v40 = vld [vmem:[#allocation7 + $0x138] sm:$0xff] }
 0x332   : > { %2909 = vmatprep.mubr.f32.mxu0 %v11250_v26  ;;  %3637 = vmatprep.mubr.f32.mxu1 %v11250_v26  ;;  %v6972_v43 = vpack.c.bf16 %v3945_v37, %v3943_v29  ;;  %v3957_v29 = vld [vmem:[#allocation7 + $0x178] sm:$0xff]  ;;  %v6068_v37 = vld [vmem:[%s8630_s9 + $0x370] sm:$0xff] }
 0x333   : > { %6963 = vmatpush1.bf16.msra.mxu0 %v6962_v12  ;;  %7123 = vmatpush1.bf16.msra.mxu1 %v6962_v12  ;;  %v6066_v12 = vld [vmem:[%s8630_s9 + $0x360] sm:$0xff] }
 0x334   : > { %6965 = vmatprep.subr.bf16.mxu0 %v6964_v15  ;;  %7125 = vmatprep.subr.bf16.mxu1 %v6964_v15  ;;  %v6974_v15 = vpack.c.bf16 %v3944_v57, %v3942_v39  ;;  %v3956_v39 = vld [vmem:[#allocation7 + $0x170] sm:$0xff]  ;;  %v3961_v57 = vld [vmem:[#allocation7 + $0x198] sm:$0xff] }
 0x335   : > { %2910 = vmatmul.mubr.f32.gmra.mrb[68].mxu0 %v10000_v62  ;;  %3638 = vmatmul.mubr.f32.gmra.mrb[68].mxu1 %v6064_v38  ;;  %v3947_v62 = vld [vmem:[#allocation7 + $0x128] sm:$0xff] }
 0x336   : > { %2915 = vmatprep.mubr.f32.mxu0 %v11250_v26  ;;  %3643 = vmatprep.mubr.f32.mxu1 %v11250_v26  ;;  %v6976_v7 = vpack.c.bf16 %v3949_v40, %v3947_v62  ;;  %v6067_v38 = vld [vmem:[%s8630_s9 + $0x368] sm:$0xff]  ;;  %v6069_v62 = vld [vmem:[%s8630_s9 + $0x378] sm:$0xff] }
 0x337   : > { %6967 = vmatpush1.bf16.msra.mxu0 %v6966_v9  ;;  %7127 = vmatpush1.bf16.msra.mxu1 %v6966_v9  ;;  %v6978_v9 = vpack.c.bf16 %v3948_v54, %v3946_v56  ;;  %v3965_v56 = vld [vmem:[#allocation7 + $0x1b8] sm:$0xff]  ;;  %v6070_v54 = vld [vmem:[%s8630_s9 + $0x380] sm:$0xff] }
 0x338   : > { %6969 = vmatprep.subr.bf16.mxu0 %v6968_v44  ;;  %7129 = vmatprep.subr.bf16.mxu1 %v6968_v44 }
 0x339   : > { %2916 = vmatmul.mubr.f32.gmra.mrb[70].mxu0 %v10013_v13  ;;  %3644 = vmatmul.mubr.f32.gmra.mrb[70].mxu1 %v6065_v33  ;;  %v3951_v13 = vld [vmem:[#allocation7 + $0x148] sm:$0xff]  ;;  %v6982_v33 = vpack.c.bf16 %v3952_v63, %v3950_v27 }
 0x33a   : > { %2921 = vmatprep.mubr.f32.mxu0 %v11250_v26  ;;  %3649 = vmatprep.mubr.f32.mxu1 %v11250_v26  ;;  %v6980_v44 = vpack.c.bf16 %v3953_v24, %v3951_v13  ;;  %v6071_v27 = vld [vmem:[%s8630_s9 + $0x388] sm:$0xff] }
 0x33b   : > { %6971 = vmatpush1.bf16.msra.mxu0 %v6970_v48  ;;  %7131 = vmatpush1.bf16.msra.mxu1 %v6970_v48 }
 0x33c   : > { %6973 = vmatprep.subr.bf16.mxu0 %v6972_v43  ;;  %7133 = vmatprep.subr.bf16.mxu1 %v6972_v43  ;;  %v3954_v43 = vld [vmem:[#allocation7 + $0x160] sm:$0xff] }
 0x33d   : > { %2922 = vmatmul.mubr.f32.gmra.mrb[72].mxu0 %v10026_v46  ;;  %3650 = vmatmul.mubr.f32.gmra.mrb[72].mxu1 %v6066_v12  ;;  %v3955_v46 = vld [vmem:[#allocation7 + $0x168] sm:$0xff]  ;;  %v6986_v40 = vpack.c.bf16 %v3956_v39, %v3954_v43  ;;  %v3973_v39 = vld [vmem:[#allocation7 + $0x1f8] sm:$0xff] }
 0x33e   : > { %2927 = vmatprep.mubr.f32.mxu0 %v11250_v26  ;;  %3655 = vmatprep.mubr.f32.mxu1 %v11250_v26  ;;  %v6984_v48 = vpack.c.bf16 %v3957_v29, %v3955_v46  ;;  %v3966_v29 = vld [vmem:[#allocation7 + $0x1c0] sm:$0xff]  ;;  %v3971_v43 = vld [vmem:[#allocation7 + $0x1e8] sm:$0xff] }
 0x33f   : > { %6975 = vmatpush1.bf16.msra.mxu0 %v6974_v15  ;;  %7135 = vmatpush1.bf16.msra.mxu1 %v6974_v15  ;;  %v3958_v15 = vld [vmem:[#allocation7 + $0x180] sm:$0xff] }
 0x340   : > { %6977 = vmatprep.subr.bf16.mxu0 %v6976_v7  ;;  %7137 = vmatprep.subr.bf16.mxu1 %v6976_v7  ;;  %v3960_v7 = vld [vmem:[#allocation7 + $0x190] sm:$0xff] }
 0x341   : > { %2928 = vmatmul.mubr.f32.gmra.mrb[74].mxu0 %v10039_v50  ;;  %3656 = vmatmul.mubr.f32.gmra.mrb[74].mxu1 %v6067_v38  ;;  %v3959_v50 = vld [vmem:[#allocation7 + $0x188] sm:$0xff]  ;;  %v6990_v13 = vpack.c.bf16 %v3960_v7, %v3958_v15  ;;  %v3962_v38 = vld [vmem:[#allocation7 + $0x1a0] sm:$0xff] }
 0x342   : > { %2933 = vmatprep.mubr.f32.mxu0 %v11250_v26  ;;  %3661 = vmatprep.mubr.f32.mxu1 %v11250_v26  ;;  %v6988_v12 = vpack.c.bf16 %v3961_v57, %v3959_v50  ;;  %v7000_v50 = vpack.c.bf16 %v3973_v39, %v3971_v43  ;;  %v3970_v57 = vld [vmem:[#allocation7 + $0x1e0] sm:$0xff]  ;;  %v6083_v7 = vld [vmem:[%s8630_s9 + $0x3e8] sm:$0xff] }
 0x343   : > { %6979 = vmatpush1.bf16.msra.mxu0 %v6978_v9  ;;  %7139 = vmatpush1.bf16.msra.mxu1 %v6978_v9  ;;  %v3964_v9 = vld [vmem:[#allocation7 + $0x1b0] sm:$0xff] }
 0x344   : > { %6981 = vmatprep.subr.bf16.mxu0 %v6980_v44  ;;  %7141 = vmatprep.subr.bf16.mxu1 %v6980_v44  ;;  %v3969_v44 = vld [vmem:[#allocation7 + $0x1d8] sm:$0xff]  ;;  %v6994_v63 = vpack.c.bf16 %v3964_v9, %v3962_v38 }
 0x345   : > { %2934 = vmatmul.mubr.f32.gmra.mrb[76].mxu0 %v10050_v17  ;;  %3662 = vmatmul.mubr.f32.gmra.mrb[76].mxu1 %v6068_v37  ;;  %v3963_v17 = vld [vmem:[#allocation7 + $0x1a8] sm:$0xff]  ;;  %v3968_v37 = vld [vmem:[#allocation7 + $0x1d0] sm:$0xff] }
 0x346   : > { %2939 = vmatprep.mubr.f32.mxu0 %v11250_v26  ;;  %3667 = vmatprep.mubr.f32.mxu1 %v11250_v26  ;;  %v6992_v24 = vpack.c.bf16 %v3965_v56, %v3963_v17 }
 0x347   : > { %6983 = vmatpush1.bf16.msra.mxu0 %v6982_v33  ;;  %7143 = vmatpush1.bf16.msra.mxu1 %v6982_v33  ;;  %v6998_v33 = vpack.c.bf16 %v3968_v37, %v3966_v29  ;;  %v3974_v37 = vld [vmem:[#allocation7 + $0x200] sm:$0xff] }
 0x348   : > { %6985 = vmatprep.subr.bf16.mxu0 %v6984_v48  ;;  %7145 = vmatprep.subr.bf16.mxu1 %v6984_v48  ;;  %v6074_v48 = vld [vmem:[%s8630_s9 + $0x3a0] sm:$0xff] }
 0x349   : > { %2940 = vmatmul.mubr.f32.gmra.mrb[78].mxu0 %v10058_v52  ;;  %3668 = vmatmul.mubr.f32.gmra.mrb[78].mxu1 %v6069_v62  ;;  %v3967_v52 = vld [vmem:[#allocation7 + $0x1c8] sm:$0xff] }
 0x34a   : > { %2945 = vmatprep.mubr.f32.mxu0 %v11250_v26  ;;  %3673 = vmatprep.mubr.f32.mxu1 %v11250_v26  ;;  %v6996_v46 = vpack.c.bf16 %v3969_v44, %v3967_v52 }
 0x34b   : > { %6987 = vmatpush1.bf16.msra.mxu0 %v6986_v40  ;;  %7147 = vmatpush1.bf16.msra.mxu1 %v6986_v40  ;;  %v3975_v40 = vld [vmem:[#allocation7 + $0x208] sm:$0xff] }
 0x34c   : > { %6989 = vmatprep.subr.bf16.mxu0 %v6988_v12  ;;  %7149 = vmatprep.subr.bf16.mxu1 %v6988_v12  ;;  %v3977_v12 = vld [vmem:[#allocation7 + $0x218] sm:$0xff] }
 0x34d   : > { %2946 = vmatmul.mubr.f32.gmra.mrb[80].mxu0 %v10066_v51  ;;  %3674 = vmatmul.mubr.f32.gmra.mrb[80].mxu1 %v6070_v54  ;;  %v6072_v51 = vld [vmem:[%s8630_s9 + $0x390] sm:$0xff]  ;;  %v7004_v15 = vpack.c.bf16 %v3977_v12, %v3975_v40 }
 0x34e   : > { %2951 = vmatprep.mubr.f32.mxu0 %v11250_v26  ;;  %3679 = vmatprep.mubr.f32.mxu1 %v11250_v26 }
 0x34f   : > { %6991 = vmatpush1.bf16.msra.mxu0 %v6990_v13  ;;  %7151 = vmatpush1.bf16.msra.mxu1 %v6990_v13 }
 0x350   : > { %6993 = vmatprep.subr.bf16.mxu0 %v6992_v24  ;;  %7153 = vmatprep.subr.bf16.mxu1 %v6992_v24 }
 0x351   : > { %2952 = vmatmul.mubr.f32.gmra.mrb[82].mxu0 %v10074_v2  ;;  %3680 = vmatmul.mubr.f32.gmra.mrb[82].mxu1 %v6071_v27  ;;  %v6073_v2 = vld [vmem:[%s8630_s9 + $0x398] sm:$0xff] }
 0x352   : > { %2957 = vmatprep.mubr.f32.mxu0 %v11250_v26  ;;  %3685 = vmatprep.mubr.f32.mxu1 %v11250_v26 }
 0x353   : > { %6995 = vmatpush1.bf16.msra.mxu0 %v6994_v63  ;;  %7155 = vmatpush1.bf16.msra.mxu1 %v6994_v63 }
 0x354   : > { %6997 = vmatprep.subr.bf16.mxu0 %v6996_v46  ;;  %7157 = vmatprep.subr.bf16.mxu1 %v6996_v46 }
 0x355   : > { %2958 = vmatmul.mubr.f32.gmra.mrb[84].mxu0 %v10082_v22  ;;  %3686 = vmatmul.mubr.f32.gmra.mrb[84].mxu1 %v6072_v51  ;;  %v6075_v22 = vld [vmem:[%s8630_s9 + $0x3a8] sm:$0xff]  ;;  %v3976_v51 = vld [vmem:[#allocation7 + $0x210] sm:$0xff] }
 0x356   : > { %2963 = vmatprep.mubr.f32.mxu0 %v11250_v26  ;;  %3691 = vmatprep.mubr.f32.mxu1 %v11250_v26 }
 0x357   : > { %6999 = vmatpush1.bf16.msra.mxu0 %v6998_v33  ;;  %7159 = vmatpush1.bf16.msra.mxu1 %v6998_v33 }
 0x358   : > { %7001 = vmatprep.subr.bf16.mxu0 %v7000_v50  ;;  %7161 = vmatprep.subr.bf16.mxu1 %v7000_v50 }
 0x359   : > { %2964 = vmatmul.mubr.f32.gmra.mrb[86].mxu0 %v10090_v16  ;;  %3692 = vmatmul.mubr.f32.gmra.mrb[86].mxu1 %v6073_v2  ;;  %v6076_v16 = vld [vmem:[%s8630_s9 + $0x3b0] sm:$0xff] }
 0x35a   : > { %2969 = vmatprep.mubr.f32.mxu0 %v11250_v26  ;;  %3697 = vmatprep.mubr.f32.mxu1 %v11250_v26 }
 0x35d   : > { %2970 = vmatmul.mubr.f32.gmra.mrb[88].mxu0 %v10098_v53  ;;  %3698 = vmatmul.mubr.f32.gmra.mrb[88].mxu1 %v6074_v48  ;;  %v6077_v53 = vld [vmem:[%s8630_s9 + $0x3b8] sm:$0xff]  ;;  %v3979_v48 = vld [vmem:[#allocation7 + $0x228] sm:$0xff] }
 0x35e   : > { %2975 = vmatprep.mubr.f32.mxu0 %v11250_v26  ;;  %3703 = vmatprep.mubr.f32.mxu1 %v11250_v26 }
 0x361   : > { %2976 = vmatmul.mubr.f32.gmra.mrb[90].mxu0 %v10106_v34  ;;  %3704 = vmatmul.mubr.f32.gmra.mrb[90].mxu1 %v6075_v22  ;;  %v6078_v34 = vld [vmem:[%s8630_s9 + $0x3c0] sm:$0xff]  ;;  %v3981_v22 = vld [vmem:[#allocation7 + $0x238] sm:$0xff] }
 0x362   : > { %2981 = vmatprep.mubr.f32.mxu0 %v11250_v26  ;;  %3709 = vmatprep.mubr.f32.mxu1 %v11250_v26 }
 0x365   : > { %2982 = vmatmul.mubr.f32.gmra.mrb[92].mxu0 %v10114_v19  ;;  %3710 = vmatmul.mubr.f32.gmra.mrb[92].mxu1 %v6076_v16  ;;  %v6079_v19 = vld [vmem:[%s8630_s9 + $0x3c8] sm:$0xff] }
 0x366   : > { %2987 = vmatprep.mubr.f32.mxu0 %v11250_v26  ;;  %3715 = vmatprep.mubr.f32.mxu1 %v11250_v26 }
 0x369   : > { %2988 = vmatmul.mubr.f32.gmra.mrb[94].mxu0 %v10122_v31  ;;  %3716 = vmatmul.mubr.f32.gmra.mrb[94].mxu1 %v6077_v53  ;;  %v6080_v31 = vld [vmem:[%s8630_s9 + $0x3d0] sm:$0xff] }
 0x36a   : > { %2993 = vmatprep.mubr.f32.mxu0 %v11250_v26  ;;  %3721 = vmatprep.mubr.f32.mxu1 %v11250_v26 }
 0x36d   : > { %2994 = vmatmul.mubr.f32.gmra.mrb[96].mxu0 %v10130_v49  ;;  %3722 = vmatmul.mubr.f32.gmra.mrb[96].mxu1 %v6078_v34  ;;  %v3972_v49 = vld [vmem:[#allocation7 + $0x1f0] sm:$0xff] }
 0x36e   : > { %2999 = vmatprep.mubr.f32.mxu0 %v11250_v26  ;;  %3727 = vmatprep.mubr.f32.mxu1 %v11250_v26  ;;  %v7002_v62 = vpack.c.bf16 %v3972_v49, %v3970_v57 }
 0x370   : > { %7003 = vmatpush1.bf16.msra.mxu0 %v7002_v62  ;;  %7163 = vmatpush1.bf16.msra.mxu1 %v7002_v62  ;;  %v7008_v62 = vpack.c.bf16 %v3981_v22, %v3979_v48 }
 0x371   : > { %3000 = vmatmul.mubr.f32.gmra.mrb[98].mxu0 %v10138_v55  ;;  %3728 = vmatmul.mubr.f32.gmra.mrb[98].mxu1 %v6079_v19  ;;  %v6081_v55 = vld [vmem:[%s8630_s9 + $0x3d8] sm:$0xff] }
 0x372   : > { %3005 = vmatprep.mubr.f32.mxu0 %v11250_v26  ;;  %3733 = vmatprep.mubr.f32.mxu1 %v11250_v26 }
 0x373   : > { %7005 = vmatprep.subr.bf16.mxu0 %v7004_v15  ;;  %7165 = vmatprep.subr.bf16.mxu1 %v7004_v15  ;;  %v3983_v15 = vld [vmem:[#allocation7 + $0x248] sm:$0xff] }
 0x375   : > { %3006 = vmatmul.mubr.f32.gmra.mrb[100].mxu0 %v10146_v3  ;;  %3734 = vmatmul.mubr.f32.gmra.mrb[100].mxu1 %v6080_v31  ;;  %v6082_v3 = vld [vmem:[%s8630_s9 + $0x3e0] sm:$0xff]  ;;  %v7006_v31 = vpack.c.bf16 %v3976_v51, %v3974_v37 }
 0x376   : > { %3011 = vmatprep.mubr.f32.mxu0 %v11250_v26  ;;  %3739 = vmatprep.mubr.f32.mxu1 %v11250_v26 }
 0x379   : > { %3012 = vmatmul.mubr.f32.gmra.mrb[102].mxu0 %v10154_v36  ;;  %3740 = vmatmul.mubr.f32.gmra.mrb[102].mxu1 %v6081_v55  ;;  %v6084_v36 = vld [vmem:[%s8630_s9 + $0x3f0] sm:$0xff]  ;;  %v3978_v55 = vld [vmem:[#allocation7 + $0x220] sm:$0xff] }
 0x37a   : > { %3017 = vmatprep.mubr.f32.mxu0 %v11250_v26  ;;  %3745 = vmatprep.mubr.f32.mxu1 %v11250_v26 }
 0x37d   : > { %3018 = vmatmul.mubr.f32.gmra.mrb[104].mxu0 %v10162_v1  ;;  %3746 = vmatmul.mubr.f32.gmra.mrb[104].mxu1 %v6082_v3  ;;  %v10302_v1 = vld [vmem:[%s10834_s2] ss:$0 sm:$0xff]  ;;  %v3980_v3 = vld [vmem:[#allocation7 + $0x230] sm:$0xff] }
 0x37e   : > { %3023 = vmatprep.mubr.f32.mxu0 %v11250_v26  ;;  %3751 = vmatprep.mubr.f32.mxu1 %v11250_v26  ;;  %v2262_v17 = vadd.f32 %v10302_v1, %v9965_v30  ;;  %v2259_v43 = vadd.f32 %v10302_v1, %v9932_v45  ;;  %v2264_v49 = vadd.f32 %v10302_v1, %v9991_v4 }
 0x37f   : > { %v2260_v45 = vadd.f32 %v10302_v1, %v9938_v42  ;;  %v3982_v42 = vld [vmem:[#allocation7 + $0x240] sm:$0xff]  ;;  %v2261_v48 = vadd.f32 %v10302_v1, %v9952_v21  ;;  %v2266_v22 = vadd.f32 %v10302_v1, %v10017_v14  ;;  %v3993_v21 = vld [vmem:[#allocation7 + $0x298] sm:$0xff] }
 0x380   : > { %v10310_v56 = vmax.f32 %v2262_v17, 0.0 }
 0x381   : > { %3024 = vmatmul.mubr.f32.gmra.mrb[106].mxu0 %v10170_v47  ;;  %3752 = vmatmul.mubr.f32.gmra.mrb[106].mxu1 %v6083_v7  ;;  %v6085_v47 = vld [vmem:[%s8630_s9 + $0x3f8] sm:$0xff]  ;;  %s11260_s9 = sld [smem:[#allocation121_spill]] }
 0x382   : > { %3029 = vmatprep.mubr.f32.mxu0 %v11250_v26  ;;  %3757 = vmatprep.mubr.f32.mxu1 %v11250_v26  ;;  %v3985_v7 = vld [vmem:[#allocation7 + $0x258] sm:$0xff] }
 0x385   : > { %3030 = vmatmul.mubr.f32.gmra.mrb[108].mxu0 %v10178_v32  ;;  %3758 = vmatmul.mubr.f32.gmra.mrb[108].mxu1 %v6084_v36  ;;  %v2258_v32 = vadd.f32 %v10302_v1, %v9923_v59 }
 0x386   : > { %3035 = vmatprep.mubr.f32.mxu0 %v11250_v26  ;;  %3763 = vmatprep.mubr.f32.mxu1 %v11250_v26 }
 0x387   : > { %v2286_v16 = vmax.f32 %v2258_v32, 0.0  ;;  %v2265_v32 = vadd.f32 %v10302_v1, %v10004_v35  ;;  %s10788_s19 = scalar_lea.hbm %s11260_s9, %s6095_s26 }
 0x389   : > { %3036 = vmatmul.mubr.f32.gmra.mrb[110].mxu0 %v10186_v20  ;;  %3764 = vmatmul.mubr.f32.gmra.mrb[110].mxu1 %v6085_v47  ;;  %v2263_v20 = vadd.f32 %v10302_v1, %v9978_v23 }
 0x38a   : > { %4689 = vmatprep.mubr.f32.mxu1 %v10310_v56 }
 0x38b   : > { %v10321_v23 = vmax.f32 %v2263_v20, 0.0  ;;  %v2288_v20 = vmax.f32 %v2260_v45, 0.0 }
 0x3f0   : > { %v2875_v54 = vpop.f32.mrb[56].mxu0  ;;  %v3603_v13 = vpop.f32.mrb[56].mxu1 }
 0x3f1   : > { %v3770_v24 = vmax.f32 %v2875_v54, %v3603_v13  ;;  %v2877_v38 = vpop.f32.mrb[57].mxu0  ;;  %v3605_v30 = vpop.f32.mrb[57].mxu1  ;;  %v2287_v54 = vmax.f32 %v2259_v43, 0.0  ;;  %v7010_v13 = vpack.c.bf16 %v3980_v3, %v3978_v55  ;;  %v3988_v43 = vld [vmem:[#allocation7 + $0x270] sm:$0xff]  ;;  %v2289_v3 = vmax.f32 %v2261_v48, 0.0  ;;  %v4001_v48 = vld [vmem:[#allocation7 + $0x2d8] sm:$0xff] }
 0x3f2   : > { %v3771_v9 = vmax.f32 %v2877_v38, %v3605_v30 }
 0x3f4   : > { %v3826_v52 = vmax.f32 %v3770_v24, %v3771_v9  ;;  %v2881_v44 = vpop.f32.mrb[58].mxu0  ;;  %v3609_v27 = vpop.f32.mrb[58].mxu1  ;;  %v10329_v9 = vmax.f32 %v2264_v49, 0.0 }
 0x3f5   : > { %v3772_v63 = vmax.f32 %v2881_v44, %v3609_v27  ;;  %v2883_v46 = vpop.f32.mrb[59].mxu0  ;;  %v3611_v29 = vpop.f32.mrb[59].mxu1  ;;  %v3984_v44 = vld [vmem:[#allocation7 + $0x250] sm:$0xff] }
 0x3f6   : > { %v3773_v33 = vmax.f32 %v2883_v46, %v3611_v29  ;;  %v3854_v2 = vadd.f32 %v10302_v1, %v3826_v52  ;;  %v7012_v52 = vpack.c.bf16 %v3985_v7, %v3983_v15  ;;  %v3987_v46 = vld [vmem:[#allocation7 + $0x268] sm:$0xff]  ;;  %v3989_v29 = vld [vmem:[#allocation7 + $0x278] sm:$0xff]  ;;  %v2267_v15 = vadd.f32 %v10302_v1, %v10030_v61 }
 0x3f8   : > { %v3827_v53 = vmax.f32 %v3772_v63, %v3773_v33  ;;  %v2887_v34 = vpop.f32.mrb[60].mxu0  ;;  %v3615_v59 = vpop.f32.mrb[60].mxu1  ;;  %v3882_v19 = vmax.f32 %v3854_v2, 0.0  ;;  %v7014_v2 = vpack.c.bf16 %v3984_v44, %v3982_v42  ;;  %v10351_v44 = vmax.f32 %v2267_v15, 0.0 }
 0x3f9   : > { %v3774_v39 = vmax.f32 %v2887_v34, %v3615_v59  ;;  %v2889_v50 = vpop.f32.mrb[61].mxu0  ;;  %v3617_v57 = vpop.f32.mrb[61].mxu1  ;;  %v10339_v59 = vmax.f32 %v2265_v32, 0.0 }
 0x3fa   : > { %v3775_v40 = vmax.f32 %v2889_v50, %v3617_v57  ;;  %4134 = vmatprep.mubr.f32.mxu0 %v3882_v19  ;;  %4690 = vmatmul.mubr.f32.vlgmr.msra.gmra.mrb[112].mxu1 %v3882_v19  ;;  %v3855_v12 = vadd.f32 %v10302_v1, %v3827_v53  ;;  %v7016_v19 = vpack.c.bf16 %v3989_v29, %v3987_v46  ;;  %v3991_v57 = vld [vmem:[#allocation7 + $0x288] sm:$0xff] }
 0x3fb   : > { %4135 = vmatmul.mubr.f32.vlgmr.msra.gmra.mrb[112].mxu0 %v2286_v16  ;;  %4695 = vmatprep.mubr.f32.mxu1 %v10321_v23 }
 0x3fc   : > { %v3828_v36 = vmax.f32 %v3774_v39, %v3775_v40  ;;  %v2893_v17 = vpop.f32.mrb[62].mxu0  ;;  %v3621_v47 = vpop.f32.mrb[62].mxu1  ;;  %7007 = vmatpush1.bf16.msra.mxu0 %v7006_v31  ;;  %7167 = vmatpush1.bf16.msra.mxu1 %v7006_v31  ;;  %v3883_v4 = vmax.f32 %v3855_v12, 0.0  ;;  %v3986_v31 = vld [vmem:[#allocation7 + $0x260] sm:$0xff]  ;;  %v10343_v12 = vmax.f32 %v2266_v22, 0.0 }
 0x3fd   : > { %v3776_v24 = vmax.f32 %v2893_v17, %v3621_v47  ;;  %v2895_v38 = vpop.f32.mrb[63].mxu0  ;;  %v3623_v30 = vpop.f32.mrb[63].mxu1  ;;  %7009 = vmatprep.subr.bf16.mxu0 %v7008_v62  ;;  %7169 = vmatprep.subr.bf16.mxu1 %v7008_v62  ;;  %v7018_v40 = vpack.c.bf16 %v3988_v43, %v3986_v31  ;;  %v7020_v17 = vpack.c.bf16 %v3993_v21, %v3991_v57  ;;  %v3990_v47 = vld [vmem:[#allocation7 + $0x280] sm:$0xff] }
 0x3fe   : > { %v3777_v27 = vmax.f32 %v2895_v38, %v3623_v30  ;;  %4140 = vmatprep.mubr.f32.mxu0 %v3883_v4  ;;  %4696 = vmatmul.mubr.f32.gmra.mrb[114].mxu1 %v3883_v4  ;;  %v3856_v63 = vadd.f32 %v10302_v1, %v3828_v36  ;;  %v3992_v4 = vld [vmem:[#allocation7 + $0x290] sm:$0xff]  ;;  %v3997_v38 = vld [vmem:[#allocation7 + $0x2b8] sm:$0xff]  ;;  %v2269_v31 = vadd.f32 %v10302_v1, %v10052_v58  ;;  %v3998_v21 = vld [vmem:[#allocation7 + $0x2c0] sm:$0xff] }
 0x3ff   : > { %4141 = vmatmul.mubr.f32.gmra.mrb[114].mxu0 %v2287_v54  ;;  %4701 = vmatprep.mubr.f32.mxu1 %v10329_v9  ;;  %v7022_v42 = vpack.c.bf16 %v3992_v4, %v3990_v47 }
 0x400   : > { %v3829_v37 = vmax.f32 %v3776_v24, %v3777_v27  ;;  %v2899_v51 = vpop.f32.mrb[64].mxu0  ;;  %v3627_v33 = vpop.f32.mrb[64].mxu1  ;;  %7011 = vmatpush1.bf16.msra.mxu0 %v7010_v13  ;;  %7171 = vmatpush1.bf16.msra.mxu1 %v7010_v13  ;;  %v3884_v35 = vmax.f32 %v3856_v63, 0.0  ;;  %v3995_v24 = vld [vmem:[#allocation7 + $0x2a8] sm:$0xff]  ;;  %v2268_v27 = vadd.f32 %v10302_v1, %v10043_v10 }
 0x401   : > { %v3778_v16 = vmax.f32 %v2899_v51, %v3627_v33  ;;  %v2901_v53 = vpop.f32.mrb[65].mxu0  ;;  %v3629_v34 = vpop.f32.mrb[65].mxu1  ;;  %7013 = vmatprep.subr.bf16.mxu0 %v7012_v52  ;;  %7173 = vmatprep.subr.bf16.mxu1 %v7012_v52  ;;  %v3996_v51 = vld [vmem:[#allocation7 + $0x2b0] sm:$0xff] }
 0x402   : > { %v3779_v39 = vmax.f32 %v2901_v53, %v3629_v34  ;;  %4146 = vmatprep.mubr.f32.mxu0 %v3884_v35  ;;  %4702 = vmatmul.mubr.f32.gmra.mrb[116].mxu1 %v3884_v35  ;;  %v3857_v50 = vadd.f32 %v10302_v1, %v3829_v37  ;;  %v3994_v37 = vld [vmem:[#allocation7 + $0x2a0] sm:$0xff] }
 0x403   : > { %4147 = vmatmul.mubr.f32.gmra.mrb[116].mxu0 %v2288_v20  ;;  %4707 = vmatprep.mubr.f32.mxu1 %v10339_v59  ;;  %v7024_v20 = vpack.c.bf16 %v3997_v38, %v3995_v24  ;;  %v7026_v34 = vpack.c.bf16 %v3996_v51, %v3994_v37  ;;  %v4002_v24 = vld [vmem:[#allocation7 + $0x2e0] sm:$0xff]  ;;  %v4004_v38 = vld [vmem:[#allocation7 + $0x2f0] sm:$0xff]  ;;  %v2271_v37 = vadd.f32 %v10302_v1, %v10068_v8 }
 0x404   : > { %v3830_v14 = vmax.f32 %v3778_v16, %v3779_v39  ;;  %v2905_v49 = vpop.f32.mrb[66].mxu0  ;;  %v3633_v62 = vpop.f32.mrb[66].mxu1  ;;  %v3885_v55 = vmax.f32 %v3857_v50, 0.0  ;;  %7015 = vmatpush1.bf16.msra.mxu0 %v7014_v2  ;;  %7175 = vmatpush1.bf16.msra.mxu1 %v7014_v2  ;;  %v3999_v2 = vld [vmem:[#allocation7 + $0x2c8] sm:$0xff] }
 0x405   : > { %v3780_v7 = vmax.f32 %v2905_v49, %v3633_v62  ;;  %v2907_v45 = vpop.f32.mrb[67].mxu0  ;;  %v3635_v36 = vpop.f32.mrb[67].mxu1  ;;  %7017 = vmatprep.subr.bf16.mxu0 %v7016_v19  ;;  %7177 = vmatprep.subr.bf16.mxu1 %v7016_v19  ;;  %v10362_v19 = vmax.f32 %v2268_v27, 0.0  ;;  %v7028_v57 = vpack.c.bf16 %v4001_v48, %v3999_v2  ;;  %v4006_v48 = vld [vmem:[#allocation7 + $0x300] sm:$0xff] }
 0x406   : > { %v3858_v54 = vadd.f32 %v10302_v1, %v3830_v14  ;;  %v3781_v13 = vmax.f32 %v2907_v45, %v3635_v36  ;;  %4152 = vmatprep.mubr.f32.mxu0 %v3885_v55  ;;  %4708 = vmatmul.mubr.f32.gmra.mrb[118].mxu1 %v3885_v55  ;;  %v4000_v14 = vld [vmem:[#allocation7 + $0x2d0] sm:$0xff]  ;;  %v4003_v55 = vld [vmem:[#allocation7 + $0x2e8] sm:$0xff]  ;;  %v10373_v36 = vmax.f32 %v2269_v31, 0.0  ;;  %v4013_v31 = vld [vmem:[#allocation7 + $0x338] sm:$0xff] }
 0x407   : > { %4153 = vmatmul.mubr.f32.gmra.mrb[118].mxu0 %v2289_v3  ;;  %4713 = vmatprep.mubr.f32.mxu1 %v10343_v12  ;;  %v4005_v3 = vld [vmem:[#allocation7 + $0x2f8] sm:$0xff]  ;;  %v7030_v45 = vpack.c.bf16 %v4000_v14, %v3998_v21  ;;  %v10395_v21 = vmax.f32 %v2271_v37, 0.0  ;;  %v2272_v14 = vadd.f32 %v10302_v1, %v10076_v25 }
 0x408   : > { %v10349_v30 = vmax.f32 %v3858_v54, 0.0  ;;  %v3831_v61 = vmax.f32 %v3780_v7, %v3781_v13  ;;  %v2911_v32 = vpop.f32.mrb[68].mxu0  ;;  %v3639_v52 = vpop.f32.mrb[68].mxu1  ;;  %7019 = vmatpush1.bf16.msra.mxu0 %v7018_v40  ;;  %7179 = vmatpush1.bf16.msra.mxu1 %v7018_v40  ;;  %v7032_v13 = vpack.c.bf16 %v4005_v3, %v4003_v55 }
 0x409   : > { %v3782_v63 = vmax.f32 %v2911_v32, %v3639_v52  ;;  %v2913_v46 = vpop.f32.mrb[69].mxu0  ;;  %v3641_v29 = vpop.f32.mrb[69].mxu1  ;;  %7021 = vmatprep.subr.bf16.mxu0 %v7020_v17  ;;  %7181 = vmatprep.subr.bf16.mxu1 %v7020_v17  ;;  %v2270_v17 = vadd.f32 %v10302_v1, %v10060_v18  ;;  %v4007_v52 = vld [vmem:[#allocation7 + $0x308] sm:$0xff] }
 0x40a   : > { %v3859_v33 = vadd.f32 %v10302_v1, %v3831_v61  ;;  %v3783_v35 = vmax.f32 %v2913_v46, %v3641_v29  ;;  %4158 = vmatprep.mubr.f32.mxu0 %v10349_v30  ;;  %4714 = vmatmul.mubr.f32.gmra.mrb[120].mxu1 %v10349_v30  ;;  %v7034_v29 = vpack.c.bf16 %v4004_v38, %v4002_v24  ;;  %v10406_v38 = vmax.f32 %v2272_v14, 0.0 }
 0x40b   : > { %4159 = vmatmul.mubr.f32.gmra.mrb[120].mxu0 %v10310_v56  ;;  %4719 = vmatprep.mubr.f32.mxu1 %v10351_v44 }
 0x40c   : > { %v10360_v10 = vmax.f32 %v3859_v33, 0.0  ;;  %v3832_v22 = vmax.f32 %v3782_v63, %v3783_v35  ;;  %v2917_v16 = vpop.f32.mrb[70].mxu0  ;;  %v3645_v53 = vpop.f32.mrb[70].mxu1  ;;  %7023 = vmatpush1.bf16.msra.mxu0 %v7022_v42  ;;  %7183 = vmatpush1.bf16.msra.mxu1 %v7022_v42  ;;  %v4009_v42 = vld [vmem:[#allocation7 + $0x318] sm:$0xff] }
 0x40d   : > { %v3784_v43 = vmax.f32 %v2917_v16, %v3645_v53  ;;  %v2919_v39 = vpop.f32.mrb[71].mxu0  ;;  %v3647_v50 = vpop.f32.mrb[71].mxu1  ;;  %7025 = vmatprep.subr.bf16.mxu0 %v7024_v20  ;;  %7185 = vmatprep.subr.bf16.mxu1 %v7024_v20  ;;  %v10384_v20 = vmax.f32 %v2270_v17, 0.0  ;;  %v7036_v2 = vpack.c.bf16 %v4009_v42, %v4007_v52  ;;  %v4015_v17 = vld [vmem:[#allocation7 + $0x348] sm:$0xff] }
 0x40e   : > { %v3860_v49 = vadd.f32 %v10302_v1, %v3832_v22  ;;  %v3785_v62 = vmax.f32 %v2919_v39, %v3647_v50  ;;  %4164 = vmatprep.mubr.f32.mxu0 %v10360_v10  ;;  %4720 = vmatmul.mubr.f32.gmra.mrb[122].mxu1 %v10360_v10  ;;  %v4008_v22 = vld [vmem:[#allocation7 + $0x310] sm:$0xff] }
 0x40f   : > { %4165 = vmatmul.mubr.f32.gmra.mrb[122].mxu0 %v10321_v23  ;;  %4725 = vmatprep.mubr.f32.mxu1 %v10362_v19 }
 0x410   : > { %v10371_v58 = vmax.f32 %v3860_v49, 0.0  ;;  %v3833_v40 = vmax.f32 %v3784_v43, %v3785_v62  ;;  %v2923_v15 = vpop.f32.mrb[72].mxu0  ;;  %v3651_v7 = vpop.f32.mrb[72].mxu1  ;;  %7027 = vmatpush1.bf16.msra.mxu0 %v7026_v34  ;;  %7187 = vmatpush1.bf16.msra.mxu1 %v7026_v34  ;;  %v4011_v34 = vld [vmem:[#allocation7 + $0x328] sm:$0xff] }
 0x411   : > { %v3786_v47 = vmax.f32 %v2923_v15, %v3651_v7  ;;  %v2925_v4 = vpop.f32.mrb[73].mxu0  ;;  %v3653_v54 = vpop.f32.mrb[73].mxu1  ;;  %7029 = vmatprep.subr.bf16.mxu0 %v7028_v57  ;;  %7189 = vmatprep.subr.bf16.mxu1 %v7028_v57  ;;  %v7038_v57 = vpack.c.bf16 %v4008_v22, %v4006_v48  ;;  %v7040_v3 = vpack.c.bf16 %v4013_v31, %v4011_v34  ;;  %v4012_v15 = vld [vmem:[#allocation7 + $0x330] sm:$0xff] }
 0x412   : > { %v3861_v61 = vadd.f32 %v10302_v1, %v3833_v40  ;;  %v3787_v32 = vmax.f32 %v2925_v4, %v3653_v54  ;;  %4170 = vmatprep.mubr.f32.mxu0 %v10371_v58  ;;  %4726 = vmatmul.mubr.f32.gmra.mrb[124].mxu1 %v10371_v58  ;;  %v4010_v40 = vld [vmem:[#allocation7 + $0x320] sm:$0xff] }
 0x413   : > { %4171 = vmatmul.mubr.f32.gmra.mrb[124].mxu0 %v10329_v9  ;;  %4731 = vmatprep.mubr.f32.mxu1 %v10373_v36  ;;  %v7042_v24 = vpack.c.bf16 %v4012_v15, %v4010_v40 }
 0x414   : > { %v10382_v18 = vmax.f32 %v3861_v61, 0.0  ;;  %v3834_v27 = vmax.f32 %v3786_v47, %v3787_v32  ;;  %v2929_v63 = vpop.f32.mrb[74].mxu0  ;;  %v3657_v46 = vpop.f32.mrb[74].mxu1  ;;  %7031 = vmatpush1.bf16.msra.mxu0 %v7030_v45  ;;  %7191 = vmatpush1.bf16.msra.mxu1 %v7030_v45  ;;  %v4017_v47 = vld [vmem:[#allocation7 + $0x358] sm:$0xff]  ;;  %v2273_v61 = vadd.f32 %v10302_v1, %v10084_v0 }
 0x415   : > { %v3788_v51 = vmax.f32 %v2929_v63, %v3657_v46  ;;  %v2931_v33 = vpop.f32.mrb[75].mxu0  ;;  %v3659_v35 = vpop.f32.mrb[75].mxu1  ;;  %7033 = vmatprep.subr.bf16.mxu0 %v7032_v13  ;;  %7193 = vmatprep.subr.bf16.mxu1 %v7032_v13  ;;  %v4014_v63 = vld [vmem:[#allocation7 + $0x340] sm:$0xff]  ;;  %v4016_v46 = vld [vmem:[#allocation7 + $0x350] sm:$0xff] }
 0x416   : > { %v3862_v16 = vadd.f32 %v10302_v1, %v3834_v27  ;;  %v3789_v53 = vmax.f32 %v2931_v33, %v3659_v35  ;;  %4176 = vmatprep.mubr.f32.mxu0 %v10382_v18  ;;  %4732 = vmatmul.mubr.f32.gmra.mrb[126].mxu1 %v10382_v18  ;;  %v7044_v27 = vpack.c.bf16 %v4017_v47, %v4015_v17  ;;  %v4021_v33 = vld [vmem:[#allocation7 + $0x378] sm:$0xff] }
 0x417   : > { %4177 = vmatmul.mubr.f32.gmra.mrb[126].mxu0 %v10339_v59  ;;  %4737 = vmatprep.mubr.f32.mxu1 %v10384_v20  ;;  %v7046_v22 = vpack.c.bf16 %v4016_v46, %v4014_v63  ;;  %v2275_v17 = vadd.f32 %v10302_v1, %v10100_v6 }
 0x418   : > { %v10393_v8 = vmax.f32 %v3862_v16, 0.0  ;;  %v3835_v43 = vmax.f32 %v3788_v51, %v3789_v53  ;;  %v2935_v39 = vpop.f32.mrb[76].mxu0  ;;  %v3663_v50 = vpop.f32.mrb[76].mxu1  ;;  %7035 = vmatpush1.bf16.msra.mxu0 %v7034_v29  ;;  %7195 = vmatpush1.bf16.msra.mxu1 %v7034_v29  ;;  %v4019_v51 = vld [vmem:[#allocation7 + $0x368] sm:$0xff]  ;;  %v10417_v16 = vmax.f32 %v2273_v61, 0.0  ;;  %v2274_v53 = vadd.f32 %v10302_v1, %v10092_v60  ;;  %v4024_v61 = vld [vmem:[#allocation7 + $0x390] sm:$0xff] }
 0x419   : > { %v3790_v49 = vmax.f32 %v2935_v39, %v3663_v50  ;;  %v2937_v62 = vpop.f32.mrb[77].mxu0  ;;  %v3665_v55 = vpop.f32.mrb[77].mxu1  ;;  %7037 = vmatprep.subr.bf16.mxu0 %v7036_v2  ;;  %7197 = vmatprep.subr.bf16.mxu1 %v7036_v2  ;;  %v7048_v39 = vpack.c.bf16 %v4021_v33, %v4019_v51  ;;  %v4018_v50 = vld [vmem:[#allocation7 + $0x360] sm:$0xff]  ;;  %v10439_v51 = vmax.f32 %v2275_v17, 0.0  ;;  %v2276_v33 = vadd.f32 %v10302_v1, %v10108_v41 }
 0x41a   : > { %v3863_v7 = vadd.f32 %v10302_v1, %v3835_v43  ;;  %v3791_v45 = vmax.f32 %v2937_v62, %v3665_v55  ;;  %4182 = vmatprep.mubr.f32.mxu0 %v10393_v8  ;;  %4738 = vmatmul.mubr.f32.gmra.mrb[128].mxu1 %v10393_v8  ;;  %v4023_v62 = vld [vmem:[#allocation7 + $0x388] sm:$0xff]  ;;  %v4025_v55 = vld [vmem:[#allocation7 + $0x398] sm:$0xff] }
 0x41b   : > { %4183 = vmatmul.mubr.f32.gmra.mrb[128].mxu0 %v10343_v12  ;;  %4743 = vmatprep.mubr.f32.mxu1 %v10395_v21 }
 0x41c   : > { %v10404_v25 = vmax.f32 %v3863_v7, 0.0  ;;  %v3836_v4 = vmax.f32 %v3790_v49, %v3791_v45  ;;  %v2941_v54 = vpop.f32.mrb[78].mxu0  ;;  %v3669_v13 = vpop.f32.mrb[78].mxu1  ;;  %7039 = vmatpush1.bf16.msra.mxu0 %v7038_v57  ;;  %7199 = vmatpush1.bf16.msra.mxu1 %v7038_v57  ;;  %v4020_v57 = vld [vmem:[#allocation7 + $0x370] sm:$0xff]  ;;  %v10428_v45 = vmax.f32 %v2274_v53, 0.0  ;;  %v4026_v53 = vld [vmem:[#allocation7 + $0x3a0] sm:$0xff] }
 0x41d   : > { %v3792_v32 = vmax.f32 %v2941_v54, %v3669_v13  ;;  %v2943_v52 = vpop.f32.mrb[79].mxu0  ;;  %v3671_v42 = vpop.f32.mrb[79].mxu1  ;;  %7041 = vmatprep.subr.bf16.mxu0 %v7040_v3  ;;  %7201 = vmatprep.subr.bf16.mxu1 %v7040_v3  ;;  %v7050_v7 = vpack.c.bf16 %v4020_v57, %v4018_v50  ;;  %v7052_v13 = vpack.c.bf16 %v4025_v55, %v4023_v62  ;;  %v4033_v50 = vld [vmem:[#allocation7 + $0x3d8] sm:$0xff]  ;;  %v10450_v55 = vmax.f32 %v2276_v33, 0.0 }
 0x41e   : > { %v3864_v29 = vadd.f32 %v10302_v1, %v3836_v4  ;;  %v3793_v37 = vmax.f32 %v2943_v52, %v3671_v42  ;;  %4188 = vmatprep.mubr.f32.mxu0 %v10404_v25  ;;  %4744 = vmatmul.mubr.f32.gmra.mrb[130].mxu1 %v10404_v25  ;;  %v4027_v42 = vld [vmem:[#allocation7 + $0x3a8] sm:$0xff] }
 0x41f   : > { %4189 = vmatmul.mubr.f32.gmra.mrb[130].mxu0 %v10351_v44  ;;  %4749 = vmatprep.mubr.f32.mxu1 %v10406_v38 }
 0x420   : > { %v10415_v0 = vmax.f32 %v3864_v29, 0.0  ;;  %v3837_v35 = vmax.f32 %v3792_v32, %v3793_v37  ;;  %v2947_v2 = vpop.f32.mrb[80].mxu0  ;;  %v3675_v48 = vpop.f32.mrb[80].mxu1  ;;  %7043 = vmatpush1.bf16.msra.mxu0 %v7042_v24  ;;  %7203 = vmatpush1.bf16.msra.mxu1 %v7042_v24  ;;  %v4022_v24 = vld [vmem:[#allocation7 + $0x380] sm:$0xff] }
 0x421   : > { %v3794_v34 = vmax.f32 %v2947_v2, %v3675_v48  ;;  %v2949_v31 = vpop.f32.mrb[81].mxu0  ;;  %v3677_v43 = vpop.f32.mrb[81].mxu1  ;;  %7045 = vmatprep.subr.bf16.mxu0 %v7044_v27  ;;  %7205 = vmatprep.subr.bf16.mxu1 %v7044_v27  ;;  %v4029_v27 = vld [vmem:[#allocation7 + $0x3b8] sm:$0xff]  ;;  %v7054_v37 = vpack.c.bf16 %v4024_v61, %v4022_v24  ;;  %v4035_v24 = vld [vmem:[#allocation7 + $0x3e8] sm:$0xff] }
 0x422   : > { %v3865_v14 = vadd.f32 %v10302_v1, %v3837_v35  ;;  %v3795_v49 = vmax.f32 %v2949_v31, %v3677_v43  ;;  %4194 = vmatprep.mubr.f32.mxu0 %v10415_v0  ;;  %4750 = vmatmul.mubr.f32.gmra.mrb[132].mxu1 %v10415_v0  ;;  %v4037_v61 = vld [vmem:[#allocation7 + $0x3f8] sm:$0xff] }
 0x423   : > { %4195 = vmatmul.mubr.f32.gmra.mrb[132].mxu0 %v10362_v19  ;;  %4755 = vmatprep.mubr.f32.mxu1 %v10417_v16 }
 0x424   : > { %v10426_v60 = vmax.f32 %v3865_v14, 0.0  ;;  %v3838_v3 = vmax.f32 %v3794_v34, %v3795_v49  ;;  %v2953_v40 = vpop.f32.mrb[82].mxu0  ;;  %v3681_v15 = vpop.f32.mrb[82].mxu1  ;;  %7047 = vmatpush1.bf16.msra.mxu0 %v7046_v22  ;;  %7207 = vmatpush1.bf16.msra.mxu1 %v7046_v22  ;;  %v7056_v22 = vpack.c.bf16 %v4029_v27, %v4027_v42  ;;  %v4028_v34 = vld [vmem:[#allocation7 + $0x3b0] sm:$0xff] }
 0x425   : > { %v3796_v47 = vmax.f32 %v2953_v40, %v3681_v15  ;;  %v2955_v4 = vpop.f32.mrb[83].mxu0  ;;  %v3683_v54 = vpop.f32.mrb[83].mxu1  ;;  %7049 = vmatprep.subr.bf16.mxu0 %v7048_v39  ;;  %7209 = vmatprep.subr.bf16.mxu1 %v7048_v39  ;;  %v4031_v39 = vld [vmem:[#allocation7 + $0x3c8] sm:$0xff]  ;;  %v7058_v62 = vpack.c.bf16 %v4028_v34, %v4026_v53 }
 0x426   : > { %v3866_v32 = vadd.f32 %v10302_v1, %v3838_v3  ;;  %v3797_v52 = vmax.f32 %v2955_v4, %v3683_v54  ;;  %4200 = vmatprep.mubr.f32.mxu0 %v10426_v60  ;;  %4756 = vmatmul.mubr.f32.gmra.mrb[134].mxu1 %v10426_v60  ;;  %v2277_v3 = vadd.f32 %v10302_v1, %v10116_v5  ;;  %v4032_v4 = vld [vmem:[#allocation7 + $0x3d0] sm:$0xff]  ;;  %v4039_v34 = vld [vmem:[#allocation7 + $0x408] sm:$0xff] }
 0x427   : > { %4201 = vmatmul.mubr.f32.gmra.mrb[134].mxu0 %v10373_v36  ;;  %4761 = vmatprep.mubr.f32.mxu1 %v10428_v45  ;;  %v7060_v17 = vpack.c.bf16 %v4033_v50, %v4031_v39 }
 0x428   : > { %v10437_v6 = vmax.f32 %v3866_v32, 0.0  ;;  %v3839_v63 = vmax.f32 %v3796_v47, %v3797_v52  ;;  %v2959_v46 = vpop.f32.mrb[84].mxu0  ;;  %v3687_v29 = vpop.f32.mrb[84].mxu1  ;;  %7051 = vmatpush1.bf16.msra.mxu0 %v7050_v7  ;;  %7211 = vmatpush1.bf16.msra.mxu1 %v7050_v7  ;;  %v4030_v47 = vld [vmem:[#allocation7 + $0x3c0] sm:$0xff] }
 0x429   : > { %v3798_v35 = vmax.f32 %v2959_v46, %v3687_v29  ;;  %v2961_v2 = vpop.f32.mrb[85].mxu0  ;;  %v3689_v48 = vpop.f32.mrb[85].mxu1  ;;  %7053 = vmatprep.subr.bf16.mxu0 %v7052_v13  ;;  %7213 = vmatprep.subr.bf16.mxu1 %v7052_v13  ;;  %v7062_v27 = vpack.c.bf16 %v4032_v4, %v4030_v47  ;;  %v2278_v46 = vadd.f32 %v10302_v1, %v10124_v11 }
 0x42a   : > { %v3867_v31 = vadd.f32 %v10302_v1, %v3839_v63  ;;  %v3799_v43 = vmax.f32 %v2961_v2, %v3689_v48  ;;  %4206 = vmatprep.mubr.f32.mxu0 %v10437_v6  ;;  %4762 = vmatmul.mubr.f32.gmra.mrb[136].mxu1 %v10437_v6  ;;  %v10461_v63 = vmax.f32 %v2277_v3, 0.0  ;;  %v4034_v2 = vld [vmem:[#allocation7 + $0x3e0] sm:$0xff]  ;;  %v4036_v48 = vld [vmem:[#allocation7 + $0x3f0] sm:$0xff] }
 0x42b   : > { %4207 = vmatmul.mubr.f32.gmra.mrb[136].mxu0 %v10384_v20  ;;  %4767 = vmatprep.mubr.f32.mxu1 %v10439_v51 }
 0x42c   : > { %v10448_v41 = vmax.f32 %v3867_v31, 0.0  ;;  %v3840_v57 = vmax.f32 %v3798_v35, %v3799_v43  ;;  %v2965_v14 = vpop.f32.mrb[86].mxu0  ;;  %v3693_v49 = vpop.f32.mrb[86].mxu1  ;;  %7055 = vmatpush1.bf16.msra.mxu0 %v7054_v37  ;;  %7215 = vmatpush1.bf16.msra.mxu1 %v7054_v37  ;;  %v7064_v35 = vpack.c.bf16 %v4037_v61, %v4035_v24  ;;  %v4041_v31 = vld [vmem:[#allocation7 + $0x418] sm:$0xff] }
 0x42d   : > { %v3800_v40 = vmax.f32 %v2965_v14, %v3693_v49  ;;  %v2967_v15 = vpop.f32.mrb[87].mxu0  ;;  %v3695_v7 = vpop.f32.mrb[87].mxu1  ;;  %7057 = vmatprep.subr.bf16.mxu0 %v7056_v22  ;;  %7217 = vmatprep.subr.bf16.mxu1 %v7056_v22  ;;  %v10472_v14 = vmax.f32 %v2278_v46, 0.0  ;;  %v2279_v49 = vadd.f32 %v10302_v1, %v10132_v28  ;;  %v11251_v24 = vld [vmem:[#allocation103_spill] sm:$0xff] }
 0x42e   : > { %v3868_v54 = vadd.f32 %v10302_v1, %v3840_v57  ;;  %v3801_v13 = vmax.f32 %v2967_v15, %v3695_v7  ;;  %4212 = vmatprep.mubr.f32.mxu0 %v10448_v41  ;;  %4768 = vmatmul.mubr.f32.gmra.mrb[138].mxu1 %v10448_v41  ;;  %v7066_v57 = vpack.c.bf16 %v4036_v48, %v4034_v2  ;;  %v11252_v48 = vld [vmem:[#allocation24_spill] sm:$0xff] }
 0x42f   : > { %4213 = vmatmul.mubr.f32.gmra.mrb[138].mxu0 %v10395_v21  ;;  %4773 = vmatprep.mubr.f32.mxu1 %v10450_v55  ;;  %v7068_v15 = vpack.c.bf16 %v4041_v31, %v4039_v34  ;;  %v2280_v61 = vadd.f32 %v10302_v1, %v11251_v24 }
 0x430   : > { %v10459_v5 = vmax.f32 %v3868_v54, 0.0  ;;  %v3841_v32 = vmax.f32 %v3800_v40, %v3801_v13  ;;  %v2971_v52 = vpop.f32.mrb[88].mxu0  ;;  %v3699_v42 = vpop.f32.mrb[88].mxu1  ;;  %7059 = vmatpush1.bf16.msra.mxu0 %v7058_v62  ;;  %7219 = vmatpush1.bf16.msra.mxu1 %v7058_v62  ;;  %v10483_v13 = vmax.f32 %v2279_v49, 0.0 }
 0x431   : > { %v3802_v29 = vmax.f32 %v2971_v52, %v3699_v42  ;;  %v2973_v37 = vpop.f32.mrb[89].mxu0  ;;  %v3701_v33 = vpop.f32.mrb[89].mxu1  ;;  %7061 = vmatprep.subr.bf16.mxu0 %v7060_v17  ;;  %7221 = vmatprep.subr.bf16.mxu1 %v7060_v17  ;;  %v10494_v2 = vmax.f32 %v2280_v61, 0.0 }
 0x432   : > { %v3869_v22 = vadd.f32 %v10302_v1, %v3841_v32  ;;  %v3803_v53 = vmax.f32 %v2973_v37, %v3701_v33  ;;  %4218 = vmatprep.mubr.f32.mxu0 %v10459_v5  ;;  %4774 = vmatmul.mubr.f32.gmra.mrb[140].mxu1 %v10459_v5 }
 0x433   : > { %4219 = vmatmul.mubr.f32.gmra.mrb[140].mxu0 %v10406_v38  ;;  %4779 = vmatprep.mubr.f32.mxu1 %v10461_v63 }
 0x434   : > { %v10470_v11 = vmax.f32 %v3869_v22, 0.0  ;;  %v3842_v43 = vmax.f32 %v3802_v29, %v3803_v53  ;;  %v2977_v39 = vpop.f32.mrb[90].mxu0  ;;  %v3705_v50 = vpop.f32.mrb[90].mxu1  ;;  %7063 = vmatpush1.bf16.msra.mxu0 %v7062_v27  ;;  %7223 = vmatpush1.bf16.msra.mxu1 %v7062_v27  ;;  %v2281_v22 = vadd.f32 %v10302_v1, %v11252_v48 }
 0x435   : > { %v3804_v62 = vmax.f32 %v2977_v39, %v3705_v50  ;;  %v2979_v3 = vpop.f32.mrb[91].mxu0  ;;  %v3707_v40 = vpop.f32.mrb[91].mxu1  ;;  %7065 = vmatprep.subr.bf16.mxu0 %v7064_v35  ;;  %7225 = vmatprep.subr.bf16.mxu1 %v7064_v35 }
 0x436   : > { %v3870_v7 = vadd.f32 %v10302_v1, %v3842_v43  ;;  %v3805_v17 = vmax.f32 %v2979_v3, %v3707_v40  ;;  %4224 = vmatprep.mubr.f32.mxu0 %v10470_v11  ;;  %4780 = vmatmul.mubr.f32.gmra.mrb[142].mxu1 %v10470_v11  ;;  %v10505_v3 = vmax.f32 %v2281_v22, 0.0 }
 0x437   : > { %4225 = vmatmul.mubr.f32.gmra.mrb[142].mxu0 %v10417_v16  ;;  %4785 = vmatprep.mubr.f32.mxu1 %v10472_v14 }
 0x438   : > { %v10481_v47 = vmax.f32 %v3870_v7, 0.0  ;;  %v3843_v28 = vmax.f32 %v3804_v62, %v3805_v17  ;;  %v2983_v4 = vpop.f32.mrb[92].mxu0  ;;  %v3711_v54 = vpop.f32.mrb[92].mxu1  ;;  %7067 = vmatpush1.bf16.msra.mxu0 %v7066_v57  ;;  %7227 = vmatpush1.bf16.msra.mxu1 %v7066_v57 }
 0x439   : > { %v3806_v32 = vmax.f32 %v2983_v4, %v3711_v54  ;;  %v2985_v52 = vpop.f32.mrb[93].mxu0  ;;  %v3713_v42 = vpop.f32.mrb[93].mxu1  ;;  %7069 = vmatprep.subr.bf16.mxu0 %v7068_v15  ;;  %7229 = vmatprep.subr.bf16.mxu1 %v7068_v15 }
 0x43a   : > { %v3871_v27 = vadd.f32 %v10302_v1, %v3843_v28  ;;  %v3807_v46 = vmax.f32 %v2985_v52, %v3713_v42  ;;  %4230 = vmatprep.mubr.f32.mxu0 %v10481_v47  ;;  %4786 = vmatmul.mubr.f32.gmra.mrb[144].mxu1 %v10481_v47 }
 0x43b   : > { %4231 = vmatmul.mubr.f32.gmra.mrb[144].mxu0 %v10428_v45  ;;  %4791 = vmatprep.mubr.f32.mxu1 %v10483_v13 }
 0x43c   : > { %v10492_v29 = vmax.f32 %v3871_v27, 0.0  ;;  %v3844_v37 = vmax.f32 %v3806_v32, %v3807_v46  ;;  %v2989_v33 = vpop.f32.mrb[94].mxu0  ;;  %v3717_v35 = vpop.f32.mrb[94].mxu1  ;;  %v4038_v27 = vld [vmem:[#allocation7 + $0x400] sm:$0xff] }
 0x43d   : > { %v3808_v53 = vmax.f32 %v2989_v33, %v3717_v35  ;;  %v2991_v34 = vpop.f32.mrb[95].mxu0  ;;  %v3719_v31 = vpop.f32.mrb[95].mxu1  ;;  %v4045_v33 = vld [vmem:[#allocation7 + $0x438] sm:$0xff] }
 0x43e   : > { %v3872_v43 = vadd.f32 %v10302_v1, %v3844_v37  ;;  %v3809_v39 = vmax.f32 %v2991_v34, %v3719_v31  ;;  %4236 = vmatprep.mubr.f32.mxu0 %v10492_v29  ;;  %4792 = vmatmul.mubr.f32.gmra.mrb[146].mxu1 %v10492_v29  ;;  %v4043_v37 = vld [vmem:[#allocation7 + $0x428] sm:$0xff] }
 0x43f   : > { %4237 = vmatmul.mubr.f32.gmra.mrb[146].mxu0 %v10439_v51  ;;  %4797 = vmatprep.mubr.f32.mxu1 %v10494_v2 }
 0x440   : > { %v10503_v50 = vmax.f32 %v3872_v43, 0.0  ;;  %v3845_v57 = vmax.f32 %v3808_v53, %v3809_v39  ;;  %v2995_v49 = vpop.f32.mrb[96].mxu0  ;;  %v3723_v62 = vpop.f32.mrb[96].mxu1  ;;  %v7072_v39 = vpack.c.bf16 %v4045_v33, %v4043_v37 }
 0x441   : > { %v3810_v40 = vmax.f32 %v2995_v49, %v3723_v62  ;;  %v2997_v15 = vpop.f32.mrb[97].mxu0  ;;  %v3725_v7 = vpop.f32.mrb[97].mxu1  ;;  %v4044_v49 = vld [vmem:[#allocation7 + $0x430] sm:$0xff] }
 0x442   : > { %v3873_v17 = vadd.f32 %v10302_v1, %v3845_v57  ;;  %v3811_v28 = vmax.f32 %v2997_v15, %v3725_v7  ;;  %4242 = vmatprep.mubr.f32.mxu0 %v10503_v50  ;;  %4798 = vmatmul.mubr.f32.gmra.mrb[148].mxu1 %v10503_v50  ;;  %v4040_v1 = vld [vmem:[#allocation7 + $0x410] sm:$0xff]  ;;  %v4042_v57 = vld [vmem:[#allocation7 + $0x420] sm:$0xff]  ;;  %v4049_v15 = vld [vmem:[#allocation7 + $0x458] sm:$0xff] }
 0x443   : > { %4243 = vmatmul.mubr.f32.gmra.mrb[148].mxu0 %v10450_v55  ;;  %4803 = vmatprep.mubr.f32.mxu1 %v10505_v3  ;;  %v7070_v53 = vpack.c.bf16 %v4040_v1, %v4038_v27  ;;  %v4048_v27 = vld [vmem:[#allocation7 + $0x450] sm:$0xff] }
 0x444   : > { %v10512_v4 = vmax.f32 %v3873_v17, 0.0  ;;  %v10514_v54 = vmax.f32 %v3810_v40, %v3811_v28  ;;  %v3001_v24 = vpop.f32.mrb[98].mxu0  ;;  %v3729_v61 = vpop.f32.mrb[98].mxu1  ;;  %v4047_v40 = vld [vmem:[#allocation7 + $0x448] sm:$0xff] }
 0x445   : > { %v3812_v32 = vmax.f32 %v3001_v24, %v3729_v61  ;;  %v3003_v52 = vpop.f32.mrb[99].mxu0  ;;  %v3731_v42 = vpop.f32.mrb[99].mxu1  ;;  %v7074_v24 = vpack.c.bf16 %v4044_v49, %v4042_v57  ;;  %v4057_v49 = vld [vmem:[#allocation7 + $0x498] sm:$0xff] }
 0x446   : > { %v3813_v46 = vmax.f32 %v3003_v52, %v3731_v42  ;;  %4248 = vmatprep.mubr.f32.mxu0 %v10512_v4  ;;  %4804 = vmatmul.mubr.f32.gmra.mrb[150].mxu1 %v10512_v4  ;;  %v4046_v42 = vld [vmem:[#allocation7 + $0x440] sm:$0xff] }
 0x447   : > { %4249 = vmatmul.mubr.f32.gmra.mrb[150].mxu0 %v10461_v63  ;;  %4874 = vmatprep.mubr.f32.mxu1 %v10343_v12 }
 0x448   : > { %v10520_v35 = vmax.f32 %v3812_v32, %v3813_v46  ;;  %v3007_v48 = vpop.f32.mrb[100].mxu0  ;;  %v3735_v22 = vpop.f32.mrb[100].mxu1  ;;  %4319 = vmatprep.mubr.f32.mxu0 %v10349_v30  ;;  %v4053_v46 = vld [vmem:[#allocation7 + $0x478] sm:$0xff] }
 0x449   : > { %v3814_v34 = vmax.f32 %v3007_v48, %v3735_v22  ;;  %v3009_v31 = vpop.f32.mrb[101].mxu0  ;;  %v3737_v43 = vpop.f32.mrb[101].mxu1  ;;  %v7078_v22 = vpack.c.bf16 %v4048_v27, %v4046_v42  ;;  %v4061_v42 = vld [vmem:[#allocation7 + $0x4b8] sm:$0xff] }
 0x44a   : > { %v3815_v62 = vmax.f32 %v3009_v31, %v3737_v43  ;;  %4875 = vmatmul.mubr.f32.vlgmr.msra.gmra.mrb[112].mxu1 %v10349_v30  ;;  %v7076_v30 = vpack.c.bf16 %v4049_v15, %v4047_v40  ;;  %v4050_v43 = vld [vmem:[#allocation7 + $0x460] sm:$0xff] }
 0x44b   : > { %4320 = vmatmul.mubr.f32.vlgmr.msra.gmra.mrb[112].mxu0 %v10310_v56  ;;  %4880 = vmatprep.mubr.f32.mxu1 %v10351_v44  ;;  %v4051_v56 = vld [vmem:[#allocation7 + $0x468] sm:$0xff] }
 0x44c   : > { %v10526_v7 = vmax.f32 %v3814_v34, %v3815_v62  ;;  %v3013_v17 = vpop.f32.mrb[102].mxu0  ;;  %v3741_v28 = vpop.f32.mrb[102].mxu1  ;;  %4325 = vmatprep.mubr.f32.mxu0 %v10360_v10  ;;  %7071 = vmatpush1.bf16.msra.mxu0 %v7070_v53 }
 0x44d   : > { %v3816_v61 = vmax.f32 %v3013_v17, %v3741_v28  ;;  %7231 = vmatpush1.bf16.msra.mxu1 %v7070_v53  ;;  %v3015_v32 = vpop.f32.mrb[103].mxu0  ;;  %v3743_v52 = vpop.f32.mrb[103].mxu1  ;;  %7073 = vmatprep.subr.bf16.mxu0 %v7072_v39 }
 0x44e   : > { %v3817_v1 = vmax.f32 %v3015_v32, %v3743_v52  ;;  %4881 = vmatmul.mubr.f32.gmra.mrb[114].mxu1 %v10360_v10  ;;  %7233 = vmatprep.subr.bf16.mxu1 %v7072_v39  ;;  %v7080_v10 = vpack.c.bf16 %v4053_v46, %v4051_v56  ;;  %v4052_v39 = vld [vmem:[#allocation7 + $0x470] sm:$0xff]  ;;  %v4054_v32 = vld [vmem:[#allocation7 + $0x480] sm:$0xff] }
 0x44f   : > { %4326 = vmatmul.mubr.f32.gmra.mrb[114].mxu0 %v10321_v23  ;;  %4886 = vmatprep.mubr.f32.mxu1 %v10362_v19  ;;  %v4055_v23 = vld [vmem:[#allocation7 + $0x488] sm:$0xff]  ;;  %v7082_v17 = vpack.c.bf16 %v4052_v39, %v4050_v43  ;;  %v4056_v52 = vld [vmem:[#allocation7 + $0x490] sm:$0xff] }
 0x450   : > { %v10532_v37 = vmax.f32 %v3816_v61, %v3817_v1  ;;  %v3019_v33 = vpop.f32.mrb[104].mxu0  ;;  %v3747_v48 = vpop.f32.mrb[104].mxu1  ;;  %4331 = vmatprep.mubr.f32.mxu0 %v10371_v58  ;;  %7075 = vmatpush1.bf16.msra.mxu0 %v7074_v24  ;;  %v7086_v46 = vpack.c.bf16 %v4056_v52, %v4054_v32  ;;  %v4069_v32 = vld [vmem:[#allocation7 + $0x4f8] sm:$0xff] }
 0x451   : > { %v3818_v53 = vmax.f32 %v3019_v33, %v3747_v48  ;;  %v3021_v34 = vpop.f32.mrb[105].mxu0  ;;  %v3749_v31 = vpop.f32.mrb[105].mxu1  ;;  %7235 = vmatpush1.bf16.msra.mxu1 %v7074_v24  ;;  %7077 = vmatprep.subr.bf16.mxu0 %v7076_v30 }
 0x452   : > { %v3819_v57 = vmax.f32 %v3021_v34, %v3749_v31  ;;  %4887 = vmatmul.mubr.f32.gmra.mrb[116].mxu1 %v10371_v58  ;;  %7237 = vmatprep.subr.bf16.mxu1 %v7076_v30  ;;  %v7084_v58 = vpack.c.bf16 %v4057_v49, %v4055_v23  ;;  %v4060_v34 = vld [vmem:[#allocation7 + $0x4b0] sm:$0xff] }
 0x453   : > { %4332 = vmatmul.mubr.f32.gmra.mrb[116].mxu0 %v10329_v9  ;;  %4892 = vmatprep.mubr.f32.mxu1 %v10373_v36  ;;  %v4059_v9 = vld [vmem:[#allocation7 + $0x4a8] sm:$0xff] }
 0x454   : > { %v10538_v62 = vmax.f32 %v3818_v53, %v3819_v57  ;;  %v3025_v40 = vpop.f32.mrb[106].mxu0  ;;  %v3753_v15 = vpop.f32.mrb[106].mxu1  ;;  %4337 = vmatprep.mubr.f32.mxu0 %v10382_v18  ;;  %7079 = vmatpush1.bf16.msra.mxu0 %v7078_v22  ;;  %v4058_v53 = vld [vmem:[#allocation7 + $0x4a0] sm:$0xff] }
 0x455   : > { %v3820_v28 = vmax.f32 %v3025_v40, %v3753_v15  ;;  %v3027_v24 = vpop.f32.mrb[107].mxu0  ;;  %v3755_v61 = vpop.f32.mrb[107].mxu1  ;;  %7239 = vmatpush1.bf16.msra.mxu1 %v7078_v22  ;;  %7081 = vmatprep.subr.bf16.mxu0 %v7080_v10  ;;  %v7090_v23 = vpack.c.bf16 %v4060_v34, %v4058_v53  ;;  %v10594_v34 = vld [vmem:[%s10834_s2] ss:$0 sm:$0xff] }
 0x456   : > { %v3821_v30 = vmax.f32 %v3027_v24, %v3755_v61  ;;  %4893 = vmatmul.mubr.f32.gmra.mrb[118].mxu1 %v10382_v18  ;;  %7241 = vmatprep.subr.bf16.mxu1 %v7080_v10  ;;  %v7088_v18 = vpack.c.bf16 %v4061_v42, %v4059_v9  ;;  %v4065_v10 = vld [vmem:[#allocation7 + $0x4d8] sm:$0xff]  ;;  %v4064_v24 = vld [vmem:[#allocation7 + $0x4d0] sm:$0xff]  ;;  %v4066_v42 = vld [vmem:[#allocation7 + $0x4e0] sm:$0xff] }
 0x457   : > { %4338 = vmatmul.mubr.f32.gmra.mrb[118].mxu0 %v10339_v59  ;;  %4898 = vmatprep.mubr.f32.mxu1 %v10384_v20  ;;  %v4063_v59 = vld [vmem:[#allocation7 + $0x4c8] sm:$0xff] }
 0x458   : > { %v10544_v27 = vmax.f32 %v3820_v28, %v3821_v30  ;;  %v3031_v1 = vpop.f32.mrb[108].mxu0  ;;  %v3759_v56 = vpop.f32.mrb[108].mxu1  ;;  %4343 = vmatprep.mubr.f32.mxu0 %v10393_v8  ;;  %7083 = vmatpush1.bf16.msra.mxu0 %v7082_v17  ;;  %v4062_v28 = vld [vmem:[#allocation7 + $0x4c0] sm:$0xff] }
 0x459   : > { %v3822_v33 = vmax.f32 %v3031_v1, %v3759_v56  ;;  %v3033_v48 = vpop.f32.mrb[109].mxu0  ;;  %v3761_v22 = vpop.f32.mrb[109].mxu1  ;;  %7243 = vmatpush1.bf16.msra.mxu1 %v7082_v17  ;;  %7085 = vmatprep.subr.bf16.mxu0 %v7084_v58  ;;  %v7092_v17 = vpack.c.bf16 %v4065_v10, %v4063_v59  ;;  %v7094_v30 = vpack.c.bf16 %v4064_v24, %v4062_v28  ;;  %v4068_v1 = vld [vmem:[#allocation7 + $0x4f0] sm:$0xff] }
 0x45a   : > { %v3823_v31 = vmax.f32 %v3033_v48, %v3761_v22  ;;  %4899 = vmatmul.mubr.f32.gmra.mrb[120].mxu1 %v10393_v8  ;;  %7245 = vmatprep.subr.bf16.mxu1 %v7084_v58  ;;  %v4067_v58 = vld [vmem:[#allocation7 + $0x4e8] sm:$0xff]  ;;  %v7098_v56 = vpack.c.bf16 %v4068_v1, %v4066_v42  ;;  %v5335_v22 = vld [vmem:[#allocation8 + $0x180] sm:$0xff]  ;;  %v3874_v10 = vadd.f32 %v10594_v34, %v10514_v54  ;;  %v5305_v1 = vld [vmem:[#allocation8 + $0x90] sm:$0xff] }
 0x45b   : > { %4344 = vmatmul.mubr.f32.gmra.mrb[120].mxu0 %v10343_v12  ;;  %4904 = vmatprep.mubr.f32.mxu1 %v10395_v21  ;;  %v7096_v9 = vpack.c.bf16 %v4069_v32, %v4067_v58  ;;  %v5288_v42 = vld [vmem:[#allocation8 + $0x8] sm:$0xff] }
 0x45c   : > { %v10550_v43 = vmax.f32 %v3822_v33, %v3823_v31  ;;  %v3037_v39 = vpop.f32.mrb[110].mxu0  ;;  %v3765_v57 = vpop.f32.mrb[110].mxu1  ;;  %4349 = vmatprep.mubr.f32.mxu0 %v10404_v25  ;;  %7087 = vmatpush1.bf16.msra.mxu0 %v7086_v46  ;;  %v5304_v33 = vld [vmem:[#allocation8 + $0x88] sm:$0xff] }
 0x45d   : > { %v3824_v49 = vmax.f32 %v3037_v39, %v3765_v57  ;;  %v3039_v40 = vpop.f32.mrb[111].mxu0  ;;  %v3767_v15 = vpop.f32.mrb[111].mxu1  ;;  %7247 = vmatpush1.bf16.msra.mxu1 %v7086_v46  ;;  %7089 = vmatprep.subr.bf16.mxu0 %v7088_v18  ;;  %v5303_v46 = vld [vmem:[#allocation8 + $0x80] sm:$0xff]  ;;  %v11253_v31 = vld [vmem:[#allocation25_spill] sm:$0xff]  ;;  %v11254_v57 = vld [vmem:[#allocation26_spill] sm:$0xff] }
 0x45e   : > { %v3825_v61 = vmax.f32 %v3039_v40, %v3767_v15  ;;  %4905 = vmatmul.mubr.f32.gmra.mrb[122].mxu1 %v10404_v25  ;;  %7249 = vmatprep.subr.bf16.mxu1 %v7088_v18  ;;  %v7260_v48 = vpack.c.bf16 %v5304_v33, %v5303_v46  ;;  %v5336_v18 = vld [vmem:[#allocation8 + $0x188] sm:$0xff]  ;;  %v10598_v59 = vadd.f32 %v10594_v34, %v11253_v31  ;;  %v11255_v15 = vld [vmem:[#allocation27_spill] sm:$0xff]  ;;  %v5319_v46 = vld [vmem:[#allocation8 + $0x100] sm:$0xff] }
 0x45f   : > { %4350 = vmatmul.mubr.f32.gmra.mrb[122].mxu0 %v10351_v44  ;;  %4910 = vmatprep.mubr.f32.mxu1 %v10406_v38  ;;  %v7292_v53 = vpack.c.bf16 %v5336_v18, %v5335_v22  ;;  %v3875_v40 = vadd.f32 %v10594_v34, %v10520_v35  ;;  %v3876_v35 = vadd.f32 %v10594_v34, %v10526_v7  ;;  %v5320_v33 = vld [vmem:[#allocation8 + $0x108] sm:$0xff]  ;;  %v5289_v18 = vld [vmem:[#allocation8 + $0x10] sm:$0xff] }
 0x460   : > { %v10556_v52 = vmax.f32 %v3824_v49, %v3825_v61  ;;  %4355 = vmatprep.mubr.f32.mxu0 %v10415_v0  ;;  %7091 = vmatpush1.bf16.msra.mxu0 %v7090_v23  ;;  %v2310_v39 = vmax.f32 %v10598_v59, 0.0  ;;  %v10612_v49 = vmax.f32 %v3874_v10, 0.0  ;;  %v11256_v61 = vld [vmem:[#allocation28_spill] sm:$0xff]  ;;  %v3877_v7 = vadd.f32 %v10594_v34, %v10532_v37  ;;  %v5314_v59 = vld [vmem:[#allocation8 + $0xd8] sm:$0xff] }
 0x461   : > { %7251 = vmatpush1.bf16.msra.mxu1 %v7090_v23  ;;  %7093 = vmatprep.subr.bf16.mxu0 %v7092_v17  ;;  %v10609_v23 = vadd.f32 %v10594_v34, %v11254_v57  ;;  %v10626_v28 = vmax.f32 %v3875_v40, 0.0  ;;  %v10637_v58 = vadd.f32 %v10594_v34, %v11256_v61  ;;  %v10640_v32 = vmax.f32 %v3876_v35, 0.0  ;;  %v5287_v37 = vld [vmem:[#allocation8] sm:$0xff]  ;;  %v5308_v57 = vld [vmem:[#allocation8 + $0xa8] sm:$0xff] }
 0x462   : > { %4911 = vmatmul.mubr.f32.gmra.mrb[124].mxu1 %v10415_v0  ;;  %7253 = vmatprep.subr.bf16.mxu1 %v7092_v17  ;;  %v10623_v17 = vadd.f32 %v10594_v34, %v11255_v15  ;;  %v7294_v31 = vpack.c.bf16 %v5320_v33, %v5319_v46  ;;  %v5307_v10 = vld [vmem:[#allocation8 + $0xa0] sm:$0xff]  ;;  %v5292_v61 = vld [vmem:[#allocation8 + $0x28] sm:$0xff]  ;;  %v5341_v46 = vld [vmem:[#allocation8 + $0x1b0] sm:$0xff] }
 0x463   : > { %4356 = vmatmul.mubr.f32.gmra.mrb[124].mxu0 %v10362_v19  ;;  %4916 = vmatprep.mubr.f32.mxu1 %v10417_v16  ;;  %v2311_v54 = vmax.f32 %v10609_v23, 0.0  ;;  %v7268_v15 = vpack.c.bf16 %v5308_v57, %v5307_v10  ;;  %v5291_v35 = vld [vmem:[#allocation8 + $0x20] sm:$0xff]  ;;  %v5298_v23 = vld [vmem:[#allocation8 + $0x58] sm:$0xff]  ;;  %v5344_v10 = vld [vmem:[#allocation8 + $0x1c8] sm:$0xff] }
 0x464   : > { %4361 = vmatprep.mubr.f32.mxu0 %v10426_v60  ;;  %7095 = vmatpush1.bf16.msra.mxu0 %v7094_v30  ;;  %v2312_v24 = vmax.f32 %v10623_v17, 0.0  ;;  %v5315_v17 = vld [vmem:[#allocation8 + $0xe0] sm:$0xff]  ;;  %v5342_v33 = vld [vmem:[#allocation8 + $0x1b8] sm:$0xff] }
 0x465   : > { %7255 = vmatpush1.bf16.msra.mxu1 %v7094_v30  ;;  %7097 = vmatprep.subr.bf16.mxu0 %v7096_v9  ;;  %v2313_v30 = vmax.f32 %v10637_v58, 0.0  ;;  %v5299_v58 = vld [vmem:[#allocation8 + $0x60] sm:$0xff] }
 0x466   : > { %4917 = vmatmul.mubr.f32.gmra.mrb[126].mxu1 %v10426_v60  ;;  %7257 = vmatprep.subr.bf16.mxu1 %v7096_v9  ;;  %v10650_v9 = vmax.f32 %v3877_v7, 0.0 }
 0x467   : > { %4362 = vmatmul.mubr.f32.gmra.mrb[126].mxu0 %v10373_v36  ;;  %4922 = vmatprep.mubr.f32.mxu1 %v10428_v45 }
 0x468   : > { %4367 = vmatprep.mubr.f32.mxu0 %v10437_v6  ;;  %7099 = vmatpush1.bf16.msra.mxu0 %v7098_v56 }
 0x469   : > { %7259 = vmatpush1.bf16.msra.mxu1 %v7098_v56  ;;  %7261 = vmatprep.subr.bf16.mxu0 %v7260_v48  ;;  %v5306_v56 = vld [vmem:[#allocation8 + $0x98] sm:$0xff]  ;;  %v7262_v48 = vpack.c.bf16 %v5288_v42, %v5287_v37  ;;  %v5301_v42 = vld [vmem:[#allocation8 + $0x70] sm:$0xff] }
 0x46a   : > { %4923 = vmatmul.mubr.f32.gmra.mrb[128].mxu1 %v10437_v6  ;;  %7293 = vmatprep.subr.bf16.mxu1 %v7292_v53  ;;  %v7264_v22 = vpack.c.bf16 %v5306_v56, %v5305_v1  ;;  %v5290_v53 = vld [vmem:[#allocation8 + $0x18] sm:$0xff] }
 0x46b   : > { %4368 = vmatmul.mubr.f32.gmra.mrb[128].mxu0 %v10384_v20  ;;  %4928 = vmatprep.mubr.f32.mxu1 %v10439_v51  ;;  %v7266_v40 = vpack.c.bf16 %v5290_v53, %v5289_v18  ;;  %v5302_v1 = vld [vmem:[#allocation8 + $0x78] sm:$0xff] }
 0x46c   : > { %4373 = vmatprep.mubr.f32.mxu0 %v10448_v41  ;;  %v7290_v56 = vpack.c.bf16 %v5302_v1, %v5301_v42  ;;  %v5326_v18 = vld [vmem:[#allocation8 + $0x138] sm:$0xff] }
 0x46e   : > { %4929 = vmatmul.mubr.f32.gmra.mrb[130].mxu1 %v10448_v41 }
 0x46f   : > { %4374 = vmatmul.mubr.f32.gmra.mrb[130].mxu0 %v10395_v21  ;;  %4934 = vmatprep.mubr.f32.mxu1 %v10450_v55 }
 0x470   : > { %4379 = vmatprep.mubr.f32.mxu0 %v10459_v5 }
 0x472   : > { %4935 = vmatmul.mubr.f32.gmra.mrb[132].mxu1 %v10459_v5 }
 0x473   : > { %4380 = vmatmul.mubr.f32.gmra.mrb[132].mxu0 %v10406_v38  ;;  %4940 = vmatprep.mubr.f32.mxu1 %v10461_v63 }
 0x474   : > { %4385 = vmatprep.mubr.f32.mxu0 %v10470_v11 }
 0x476   : > { %4941 = vmatmul.mubr.f32.gmra.mrb[134].mxu1 %v10470_v11 }
 0x477   : > { %4386 = vmatmul.mubr.f32.gmra.mrb[134].mxu0 %v10417_v16  ;;  %4946 = vmatprep.mubr.f32.mxu1 %v10472_v14 }
 0x478   : > { %4391 = vmatprep.mubr.f32.mxu0 %v10481_v47 }
 0x47a   : > { %4947 = vmatmul.mubr.f32.gmra.mrb[136].mxu1 %v10481_v47 }
 0x47b   : > { %4392 = vmatmul.mubr.f32.gmra.mrb[136].mxu0 %v10428_v45  ;;  %4952 = vmatprep.mubr.f32.mxu1 %v10483_v13 }
 0x47c   : > { %4397 = vmatprep.mubr.f32.mxu0 %v10492_v29 }
 0x47e   : > { %4953 = vmatmul.mubr.f32.gmra.mrb[138].mxu1 %v10492_v29 }
 0x47f   : > { %4398 = vmatmul.mubr.f32.gmra.mrb[138].mxu0 %v10439_v51  ;;  %4958 = vmatprep.mubr.f32.mxu1 %v10494_v2 }
 0x480   : > { %4403 = vmatprep.mubr.f32.mxu0 %v10503_v50 }
 0x482   : > { %4959 = vmatmul.mubr.f32.gmra.mrb[140].mxu1 %v10503_v50 }
 0x483   : > { %4404 = vmatmul.mubr.f32.gmra.mrb[140].mxu0 %v10450_v55  ;;  %4964 = vmatprep.mubr.f32.mxu1 %v10505_v3 }
 0x484   : > { %4409 = vmatprep.mubr.f32.mxu0 %v10512_v4 }
 0x486   : > { %4965 = vmatmul.mubr.f32.gmra.mrb[142].mxu1 %v10512_v4 }
 0x487   : > { %4410 = vmatmul.mubr.f32.gmra.mrb[142].mxu0 %v10461_v63  ;;  %4970 = vmatprep.mubr.f32.mxu1 %v2310_v39 }
 0x488   : > { %4415 = vmatprep.mubr.f32.mxu0 %v10612_v49 }
 0x48a   : > { %4971 = vmatmul.mubr.f32.gmra.mrb[144].mxu1 %v10612_v49 }
 0x48b   : > { %4416 = vmatmul.mubr.f32.gmra.mrb[144].mxu0 %v10472_v14  ;;  %4976 = vmatprep.mubr.f32.mxu1 %v2311_v54 }
 0x48c   : > { %4421 = vmatprep.mubr.f32.mxu0 %v10626_v28 }
 0x48e   : > { %4977 = vmatmul.mubr.f32.gmra.mrb[146].mxu1 %v10626_v28 }
 0x48f   : > { %4422 = vmatmul.mubr.f32.gmra.mrb[146].mxu0 %v10483_v13  ;;  %4982 = vmatprep.mubr.f32.mxu1 %v2312_v24 }
 0x490   : > { %4427 = vmatprep.mubr.f32.mxu0 %v10640_v32 }
 0x492   : > { %4983 = vmatmul.mubr.f32.gmra.mrb[148].mxu1 %v10640_v32 }
 0x493   : > { %4428 = vmatmul.mubr.f32.gmra.mrb[148].mxu0 %v10494_v2  ;;  %4988 = vmatprep.mubr.f32.mxu1 %v2313_v30 }
 0x494   : > { %4433 = vmatprep.mubr.f32.mxu0 %v10650_v9 }
 0x496   : > { %4989 = vmatmul.mubr.f32.gmra.mrb[150].mxu1 %v10650_v9 }
 0x497   : > { %4434 = vmatmul.mubr.f32.gmra.mrb[150].mxu0 %v10505_v3  ;;  %5059 = vmatprep.mubr.f32.mxu1 %v11250_v26 }
 0x498   : > { %4504 = vmatprep.mubr.f32.mxu0 %v11250_v26 }
 0x49a   : > { %5060 = vmatmul.mubr.f32.vlgmr.msra.gmra.mrb[112].mxu1 %v10393_v8  ;;  %v3880_v8 = vadd.f32 %v10594_v34, %v10550_v43  ;;  %v5324_v43 = vld [vmem:[#allocation8 + $0x128] sm:$0xff] }
 0x49b   : > { %4505 = vmatmul.mubr.f32.vlgmr.msra.gmra.mrb[112].mxu0 %v10343_v12  ;;  %5065 = vmatprep.mubr.f32.mxu1 %v11250_v26  ;;  %v7270_v12 = vpack.c.bf16 %v5292_v61, %v5291_v35  ;;  %v5345_v61 = vld [vmem:[#allocation8 + $0x1d0] sm:$0xff] }
 0x49c   : > { %4510 = vmatprep.mubr.f32.mxu0 %v11250_v26  ;;  %7263 = vmatpush3.bf16.msra.mxu0 %v7262_v48  ;;  %v5325_v48 = vld [vmem:[#allocation8 + $0x130] sm:$0xff] }
 0x49d   : > { %7265 = vmatprep.subr.bf16.mxu0 %v7264_v22  ;;  %7295 = vmatpush3.bf16.msra.mxu1 %v7294_v31  ;;  %v7304_v22 = vpack.c.bf16 %v5342_v33, %v5341_v46  ;;  %v7306_v53 = vpack.c.bf16 %v5326_v18, %v5325_v48  ;;  %v5343_v31 = vld [vmem:[#allocation8 + $0x1c0] sm:$0xff] }
 0x49e   : > { %5066 = vmatmul.mubr.f32.gmra.mrb[114].mxu1 %v10404_v25  ;;  %v3881_v25 = vadd.f32 %v10594_v34, %v10556_v52  ;;  %v5313_v52 = vld [vmem:[#allocation8 + $0xd0] sm:$0xff]  ;;  %v7308_v57 = vpack.c.bf16 %v5344_v10, %v5343_v31  ;;  %v10752_v48 = vld [vmem:[%s10836_s4] ss:$0 sm:$0xff] }
 0x49f   : > { %4511 = vmatmul.mubr.f32.gmra.mrb[114].mxu0 %v10351_v44  ;;  %5071 = vmatprep.mubr.f32.mxu1 %v11250_v26  ;;  %v3878_v44 = vadd.f32 %v10594_v34, %v10538_v62 }
 0x4a0   : > { %4516 = vmatprep.mubr.f32.mxu0 %v11250_v26  ;;  %7267 = vmatpush3.bf16.msra.mxu0 %v7266_v40  ;;  %v5327_v40 = vld [vmem:[#allocation8 + $0x140] sm:$0xff] }
 0x4a1   : > { %7269 = vmatprep.subr.bf16.mxu0 %v7268_v15  ;;  %v5328_v15 = vld [vmem:[#allocation8 + $0x148] sm:$0xff] }
 0x4a2   : > { %5072 = vmatmul.mubr.f32.gmra.mrb[116].mxu1 %v10415_v0  ;;  %v5309_v0 = vld [vmem:[#allocation8 + $0xb0] sm:$0xff]  ;;  %v7310_v35 = vpack.c.bf16 %v5328_v15, %v5327_v40 }
 0x4a3   : > { %4517 = vmatmul.mubr.f32.gmra.mrb[116].mxu0 %v10362_v19  ;;  %5077 = vmatprep.mubr.f32.mxu1 %v11250_v26  ;;  %v3906_v19 = vmax.f32 %v3878_v44, 0.0  ;;  %v5329_v44 = vld [vmem:[#allocation8 + $0x150] sm:$0xff] }
 0x4a4   : > { %4522 = vmatprep.mubr.f32.mxu0 %v11250_v26  ;;  %7271 = vmatpush3.bf16.msra.mxu0 %v7270_v12  ;;  %v5346_v12 = vld [vmem:[#allocation8 + $0x1d8] sm:$0xff] }
 0x4a6   : > { %5078 = vmatmul.mubr.f32.gmra.mrb[118].mxu1 %v10426_v60 }
 0x4a7   : > { %4523 = vmatmul.mubr.f32.gmra.mrb[118].mxu0 %v10373_v36  ;;  %5083 = vmatprep.mubr.f32.mxu1 %v11250_v26  ;;  %v3879_v36 = vadd.f32 %v10594_v34, %v10544_v27  ;;  %v5323_v27 = vld [vmem:[#allocation8 + $0x120] sm:$0xff] }
 0x4a8   : > { %4528 = vmatprep.mubr.f32.mxu0 %v11250_v26  ;;  %v7302_v34 = vpack.c.bf16 %v5324_v43, %v5323_v27 }
 0x4aa   : > { %5084 = vmatmul.mubr.f32.gmra.mrb[120].mxu1 %v10437_v6  ;;  %v5294_v6 = vld [vmem:[#allocation8 + $0x38] sm:$0xff] }
 0x4ab   : > { %4529 = vmatmul.mubr.f32.gmra.mrb[120].mxu0 %v10384_v20  ;;  %5089 = vmatprep.mubr.f32.mxu1 %v11250_v26  ;;  %v3907_v20 = vmax.f32 %v3879_v36, 0.0  ;;  %v5330_v36 = vld [vmem:[#allocation8 + $0x158] sm:$0xff] }
 0x4ac   : > { %4534 = vmatprep.mubr.f32.mxu0 %v11250_v26 }
 0x4ae   : > { %5090 = vmatmul.mubr.f32.gmra.mrb[122].mxu1 %v10448_v41  ;;  %v5337_v41 = vld [vmem:[#allocation8 + $0x190] sm:$0xff] }
 0x4af   : > { %4535 = vmatmul.mubr.f32.gmra.mrb[122].mxu0 %v10395_v21  ;;  %5095 = vmatprep.mubr.f32.mxu1 %v11250_v26  ;;  %v3908_v21 = vmax.f32 %v3880_v8, 0.0  ;;  %v5352_v8 = vld [vmem:[#allocation8 + $0x208] sm:$0xff] }
 0x4b0   : > { %4540 = vmatprep.mubr.f32.mxu0 %v11250_v26 }
 0x4b2   : > { %5096 = vmatmul.mubr.f32.gmra.mrb[124].mxu1 %v10459_v5  ;;  %v5321_v5 = vld [vmem:[#allocation8 + $0x110] sm:$0xff] }
 0x4b3   : > { %4541 = vmatmul.mubr.f32.gmra.mrb[124].mxu0 %v10406_v38  ;;  %5101 = vmatprep.mubr.f32.mxu1 %v11250_v26  ;;  %v3909_v38 = vmax.f32 %v3881_v25, 0.0 }
 0x4b4   : > { %4546 = vmatprep.mubr.f32.mxu0 %v11250_v26 }
 0x4b6   : > { %5102 = vmatmul.mubr.f32.gmra.mrb[126].mxu1 %v10470_v11  ;;  %v5322_v11 = vld [vmem:[#allocation8 + $0x118] sm:$0xff] }
 0x4b7   : > { %4547 = vmatmul.mubr.f32.gmra.mrb[126].mxu0 %v10417_v16  ;;  %5107 = vmatprep.mubr.f32.mxu1 %v11250_v26  ;;  %v5310_v16 = vld [vmem:[#allocation8 + $0xb8] sm:$0xff] }
 0x4b8   : > { %4552 = vmatprep.mubr.f32.mxu0 %v11250_v26  ;;  %v7272_v60 = vpack.c.bf16 %v5310_v16, %v5309_v0  ;;  %v5348_v0 = vld [vmem:[#allocation8 + $0x1e8] sm:$0xff] }
 0x4ba   : > { %5108 = vmatmul.mubr.f32.gmra.mrb[128].mxu1 %v10481_v47  ;;  %7273 = vmatprep.subr.bf16.mxu0 %v7272_v60  ;;  %v7298_v47 = vpack.c.bf16 %v5322_v11, %v5321_v5  ;;  %v5331_v60 = vld [vmem:[#allocation8 + $0x160] sm:$0xff]  ;;  %v5333_v5 = vld [vmem:[#allocation8 + $0x170] sm:$0xff] }
 0x4bb   : > { %4553 = vmatmul.mubr.f32.gmra.mrb[128].mxu0 %v10428_v45  ;;  %5113 = vmatprep.mubr.f32.mxu1 %v11250_v26  ;;  %v5293_v45 = vld [vmem:[#allocation8 + $0x30] sm:$0xff] }
 0x4bc   : > { %4558 = vmatprep.mubr.f32.mxu0 %v11250_v26 }
 0x4be   : > { %5114 = vmatmul.mubr.f32.gmra.mrb[130].mxu1 %v10492_v29  ;;  %v5295_v29 = vld [vmem:[#allocation8 + $0x40] sm:$0xff] }
 0x4bf   : > { %4559 = vmatmul.mubr.f32.gmra.mrb[130].mxu0 %v10439_v51  ;;  %5119 = vmatprep.mubr.f32.mxu1 %v11250_v26  ;;  %v7274_v51 = vpack.c.bf16 %v5294_v6, %v5293_v45  ;;  %v5332_v45 = vld [vmem:[#allocation8 + $0x168] sm:$0xff] }
 0x4c0   : > { %4564 = vmatprep.mubr.f32.mxu0 %v11250_v26  ;;  %v7318_v6 = vpack.c.bf16 %v5332_v45, %v5331_v60 }
 0x4c1   : > { %7275 = vmatpush3.bf16.msra.mxu0 %v7274_v51  ;;  %v5349_v51 = vld [vmem:[#allocation8 + $0x1f0] sm:$0xff] }
 0x4c2   : > { %5120 = vmatmul.mubr.f32.gmra.mrb[132].mxu1 %v10503_v50 }
 0x4c3   : > { %4565 = vmatmul.mubr.f32.gmra.mrb[132].mxu0 %v10450_v55  ;;  %5125 = vmatprep.mubr.f32.mxu1 %v11250_v26  ;;  %v5338_v55 = vld [vmem:[#allocation8 + $0x198] sm:$0xff] }
 0x4c4   : > { %4570 = vmatprep.mubr.f32.mxu0 %v11250_v26 }
 0x4c6   : > { %5126 = vmatmul.mubr.f32.gmra.mrb[134].mxu1 %v10512_v4  ;;  %v5340_v4 = vld [vmem:[#allocation8 + $0x1a8] sm:$0xff] }
 0x4c7   : > { %4571 = vmatmul.mubr.f32.gmra.mrb[134].mxu0 %v10461_v63  ;;  %5131 = vmatprep.mubr.f32.mxu1 %v11250_v26  ;;  %v7296_v63 = vpack.c.bf16 %v5338_v55, %v5337_v41  ;;  %v5350_v41 = vld [vmem:[#allocation8 + $0x1f8] sm:$0xff] }
 0x4c8   : > { %4576 = vmatprep.mubr.f32.mxu0 %v11250_v26  ;;  %v7320_v55 = vpack.c.bf16 %v5350_v41, %v5349_v51  ;;  %v5355_v41 = vld [vmem:[#allocation8 + $0x220] sm:$0xff] }
 0x4c9   : > { %7297 = vmatprep.subr.bf16.mxu1 %v7296_v63  ;;  %v5334_v63 = vld [vmem:[#allocation8 + $0x178] sm:$0xff] }
 0x4ca   : > { %5132 = vmatmul.mubr.f32.gmra.mrb[136].mxu1 %v10612_v49  ;;  %v7280_v49 = vpack.c.bf16 %v5314_v59, %v5313_v52  ;;  %v7322_v11 = vpack.c.bf16 %v5334_v63, %v5333_v5 }
 0x4cb   : > { %4577 = vmatmul.mubr.f32.gmra.mrb[136].mxu0 %v10472_v14  ;;  %5137 = vmatprep.mubr.f32.mxu1 %v11250_v26  ;;  %v5311_v14 = vld [vmem:[#allocation8 + $0xc0] sm:$0xff] }
 0x4cc   : > { %4582 = vmatprep.mubr.f32.mxu0 %v11250_v26  ;;  %7299 = vmatpush3.bf16.msra.mxu1 %v7298_v47 }
 0x4ce   : > { %5138 = vmatmul.mubr.f32.gmra.mrb[138].mxu1 %v10626_v28  ;;  %v5316_v28 = vld [vmem:[#allocation8 + $0xe8] sm:$0xff] }
 0x4cf   : > { %4583 = vmatmul.mubr.f32.gmra.mrb[138].mxu0 %v10483_v13  ;;  %5143 = vmatprep.mubr.f32.mxu1 %v11250_v26 }
 0x4d0   : > { %4588 = vmatprep.mubr.f32.mxu0 %v11250_v26 }
 0x4d2   : > { %5144 = vmatmul.mubr.f32.gmra.mrb[140].mxu1 %v10640_v32  ;;  %v5300_v32 = vld [vmem:[#allocation8 + $0x68] sm:$0xff] }
 0x4d3   : > { %4589 = vmatmul.mubr.f32.gmra.mrb[140].mxu0 %v10494_v2  ;;  %5149 = vmatprep.mubr.f32.mxu1 %v11250_v26  ;;  %v5296_v2 = vld [vmem:[#allocation8 + $0x48] sm:$0xff]  ;;  %v7286_v7 = vpack.c.bf16 %v5300_v32, %v5299_v58 }
 0x4d4   : > { %4594 = vmatprep.mubr.f32.mxu0 %v11250_v26  ;;  %v7278_v50 = vpack.c.bf16 %v5296_v2, %v5295_v29 }
 0x4d6   : > { %5150 = vmatmul.mubr.f32.gmra.mrb[142].mxu1 %v10650_v9  ;;  %v5318_v9 = vld [vmem:[#allocation8 + $0xf8] sm:$0xff] }
 0x4d7   : > { %4595 = vmatmul.mubr.f32.gmra.mrb[142].mxu0 %v10505_v3  ;;  %5155 = vmatprep.mubr.f32.mxu1 %v11250_v26  ;;  %v5339_v3 = vld [vmem:[#allocation8 + $0x1a0] sm:$0xff] }
 0x4d8   : > { %4600 = vmatprep.mubr.f32.mxu0 %v11250_v26  ;;  %v7300_v62 = vpack.c.bf16 %v5340_v4, %v5339_v3 }
 0x4da   : > { %5156 = vmatmul.mubr.f32.gmra.mrb[144].mxu1 %v3906_v19  ;;  %7301 = vmatprep.subr.bf16.mxu1 %v7300_v62  ;;  %v7312_v19 = vpack.c.bf16 %v5346_v12, %v5345_v61  ;;  %v5353_v12 = vld [vmem:[#allocation8 + $0x210] sm:$0xff] }
 0x4db   : > { %4601 = vmatmul.mubr.f32.gmra.mrb[144].mxu0 %v2310_v39  ;;  %5161 = vmatprep.mubr.f32.mxu1 %v11250_v26  ;;  %v5297_v39 = vld [vmem:[#allocation8 + $0x50] sm:$0xff] }
 0x4dc   : > { %4606 = vmatprep.mubr.f32.mxu0 %v11250_v26  ;;  %7303 = vmatpush3.bf16.msra.mxu1 %v7302_v34 }
 0x4dd   : > { %7305 = vmatprep.subr.bf16.mxu1 %v7304_v22 }
 0x4de   : > { %5162 = vmatmul.mubr.f32.gmra.mrb[146].mxu1 %v3907_v20  ;;  %v5351_v20 = vld [vmem:[#allocation8 + $0x200] sm:$0xff] }
 0x4df   : > { %4607 = vmatmul.mubr.f32.gmra.mrb[146].mxu0 %v2311_v54  ;;  %5167 = vmatprep.mubr.f32.mxu1 %v11250_v26  ;;  %v7282_v54 = vpack.c.bf16 %v5298_v23, %v5297_v39  ;;  %v10746_v25 = vpack.c.bf16 %v5352_v8, %v5351_v20 }
 0x4e0   : > { %4612 = vmatprep.mubr.f32.mxu0 %v11250_v26  ;;  %7307 = vmatpush3.bf16.msra.mxu1 %v7306_v53 }
 0x4e1   : > { %7309 = vmatprep.subr.bf16.mxu1 %v7308_v57 }
 0x4e2   : > { %5168 = vmatmul.mubr.f32.gmra.mrb[148].mxu1 %v3908_v21  ;;  %v7314_v21 = vpack.c.bf16 %v5330_v36, %v5329_v44  ;;  %v5354_v44 = vld [vmem:[#allocation8 + $0x218] sm:$0xff] }
 0x4e3   : > { %4613 = vmatmul.mubr.f32.gmra.mrb[148].mxu0 %v2312_v24  ;;  %5173 = vmatprep.mubr.f32.mxu1 %v11250_v26  ;;  %v7284_v24 = vpack.c.bf16 %v5316_v28, %v5315_v17  ;;  %v7328_v45 = vpack.c.bf16 %v5354_v44, %v5353_v12  ;;  %v5363_v44 = vld [vmem:[#allocation8 + $0x260] sm:$0xff] }
 0x4e4   : > { %4618 = vmatprep.mubr.f32.mxu0 %v11250_v26  ;;  %v5312_v26 = vld [vmem:[#allocation8 + $0xc8] sm:$0xff]  ;;  %7311 = vmatpush3.bf16.msra.mxu1 %v7310_v35 }
 0x4e5   : > { %v7276_v13 = vpack.c.bf16 %v5312_v26, %v5311_v14  ;;  %7313 = vmatprep.subr.bf16.mxu1 %v7312_v19 }
 0x4e6   : > { %5174 = vmatmul.mubr.f32.gmra.mrb[150].mxu1 %v3909_v38  ;;  %v5347_v38 = vld [vmem:[#allocation8 + $0x1e0] sm:$0xff] }
 0x4e7   : > { %4619 = vmatmul.mubr.f32.gmra.mrb[150].mxu0 %v2313_v30  ;;  %7277 = vmatprep.subr.bf16.mxu0 %v7276_v13  ;;  %v5317_v30 = vld [vmem:[#allocation8 + $0xf0] sm:$0xff]  ;;  %v7316_v16 = vpack.c.bf16 %v5348_v0, %v5347_v38 }
 0x4e8   : > { %7279 = vmatpush3.bf16.msra.mxu0 %v7278_v50  ;;  %v7288_v37 = vpack.c.bf16 %v5318_v9, %v5317_v30  ;;  %7315 = vmatpush3.bf16.msra.mxu1 %v7314_v21 }
 0x4e9   : > { %7281 = vmatprep.subr.bf16.mxu0 %v7280_v49  ;;  %7317 = vmatprep.subr.bf16.mxu1 %v7316_v16 }
 0x4ec   : > { %7283 = vmatpush3.bf16.msra.mxu0 %v7282_v54  ;;  %7319 = vmatpush3.bf16.msra.mxu1 %v7318_v6 }
 0x4ed   : > { %7285 = vmatprep.subr.bf16.mxu0 %v7284_v24  ;;  %7321 = vmatprep.subr.bf16.mxu1 %v7320_v55  ;;  %v5356_v55 = vld [vmem:[#allocation8 + $0x228] sm:$0xff] }
 0x4f0   : > { %7287 = vmatpush3.bf16.msra.mxu0 %v7286_v7  ;;  %7323 = vmatpush3.bf16.msra.mxu1 %v7322_v11 }
 0x4f1   : > { %7289 = vmatprep.subr.bf16.mxu0 %v7288_v37 }
 0x4f4   : > { %7291 = vmatpush3.bf16.msra.mxu0 %v7290_v56 }
 0x4f5   : > { %7325 = vmatprep.subr.bf16.mxu0 %v10746_v25 }
 0x56d   : > { %v5061_v14 = vpop.f32.mrb[112].mxu1 }
 0x56e   : > { %v4506_v26 = vpop.f32.mrb[112].mxu0  ;;  %v5063_v47 = vpop.f32.mrb[113].mxu1 }
 0x56f   : > { %v5180_v13 = vmax.f32 %v4506_v26, %v5061_v14  ;;  %v4508_v29 = vpop.f32.mrb[113].mxu0 }
 0x570   : > { %v5181_v2 = vmax.f32 %v4508_v29, %v5063_v47 }
 0x571   : > { %v5067_v50 = vpop.f32.mrb[114].mxu1 }
 0x572   : > { %v5220_v3 = vmax.f32 %v5180_v13, %v5181_v2  ;;  %v4512_v4 = vpop.f32.mrb[114].mxu0  ;;  %v5069_v62 = vpop.f32.mrb[115].mxu1 }
 0x573   : > { %v5182_v27 = vmax.f32 %v4512_v4, %v5067_v50  ;;  %v4514_v43 = vpop.f32.mrb[115].mxu0  ;;  %v7332_v50 = vpack.c.bf16 %v5356_v55, %v5355_v41 }
 0x574   : > { %v5183_v52 = vmax.f32 %v4514_v43, %v5069_v62  ;;  %v5247_v57 = vadd.f32 %v10752_v48, %v5220_v3  ;;  %v5357_v62 = vld [vmem:[#allocation8 + $0x230] sm:$0xff] }
 0x575   : > { %v5073_v34 = vpop.f32.mrb[116].mxu1 }
 0x576   : > { %v5221_v59 = vmax.f32 %v5182_v27, %v5183_v52  ;;  %v4518_v39 = vpop.f32.mrb[116].mxu0  ;;  %v5075_v23 = vpop.f32.mrb[117].mxu1  ;;  %v5267_v38 = vmax.f32 %v5247_v57, 0.0  ;;  %v5358_v27 = vld [vmem:[#allocation8 + $0x238] sm:$0xff] }
 0x577   : > { %v5184_v49 = vmax.f32 %v4518_v39, %v5073_v34  ;;  %v4520_v54 = vpop.f32.mrb[117].mxu0 }
 0x578   : > { %v5185_v17 = vmax.f32 %v4520_v54, %v5075_v23  ;;  %v5248_v60 = vadd.f32 %v10752_v48, %v5221_v59 }
 0x579   : > { %v5079_v28 = vpop.f32.mrb[118].mxu1 }
 0x57a   : > { %v5222_v24 = vmax.f32 %v5184_v49, %v5185_v17  ;;  %v4524_v58 = vpop.f32.mrb[118].mxu0  ;;  %v5081_v32 = vpop.f32.mrb[119].mxu1  ;;  %v5268_v29 = vmax.f32 %v5248_v60, 0.0  ;;  %v7336_v17 = vpack.c.bf16 %v5358_v27, %v5357_v62 }
 0x57b   : > { %v5186_v7 = vmax.f32 %v4524_v58, %v5079_v28  ;;  %v4526_v30 = vpop.f32.mrb[119].mxu0  ;;  %v5359_v58 = vld [vmem:[#allocation8 + $0x240] sm:$0xff] }
 0x57c   : > { %v5187_v9 = vmax.f32 %v4526_v30, %v5081_v32  ;;  %v5249_v2 = vadd.f32 %v10752_v48, %v5222_v24  ;;  %v5360_v32 = vld [vmem:[#allocation8 + $0x248] sm:$0xff] }
 0x57d   : > { %v5085_v37 = vpop.f32.mrb[120].mxu1 }
 0x57e   : > { %v5223_v42 = vmax.f32 %v5186_v7, %v5187_v9  ;;  %v4530_v1 = vpop.f32.mrb[120].mxu0  ;;  %v5087_v56 = vpop.f32.mrb[121].mxu1  ;;  %v5269_v49 = vmax.f32 %v5249_v2, 0.0 }
 0x57f   : > { %v5188_v46 = vmax.f32 %v4530_v1, %v5085_v37  ;;  %v4532_v33 = vpop.f32.mrb[121].mxu0 }
 0x580   : > { %v5189_v22 = vmax.f32 %v4532_v33, %v5087_v56  ;;  %v5250_v54 = vadd.f32 %v10752_v48, %v5223_v42  ;;  %v7340_v42 = vpack.c.bf16 %v5360_v32, %v5359_v58 }
 0x581   : > { %v5091_v18 = vpop.f32.mrb[122].mxu1 }
 0x582   : > { %v5224_v53 = vmax.f32 %v5188_v46, %v5189_v22  ;;  %v4536_v31 = vpop.f32.mrb[122].mxu0  ;;  %v5093_v10 = vpop.f32.mrb[123].mxu1  ;;  %v5270_v33 = vmax.f32 %v5250_v54, 0.0 }
 0x583   : > { %v5190_v40 = vmax.f32 %v4536_v31, %v5091_v18  ;;  %v4538_v15 = vpop.f32.mrb[123].mxu0  ;;  %v5361_v18 = vld [vmem:[#allocation8 + $0x250] sm:$0xff] }
 0x584   : > { %v5191_v35 = vmax.f32 %v4538_v15, %v5093_v10  ;;  %v5251_v61 = vadd.f32 %v10752_v48, %v5224_v53  ;;  %v5362_v53 = vld [vmem:[#allocation8 + $0x258] sm:$0xff] }
 0x585   : > { %v5097_v19 = vpop.f32.mrb[124].mxu1 }
 0x586   : > { %v5225_v36 = vmax.f32 %v5190_v40, %v5191_v35  ;;  %v4542_v20 = vpop.f32.mrb[124].mxu0  ;;  %v5099_v8 = vpop.f32.mrb[125].mxu1  ;;  %v5271_v21 = vmax.f32 %v5251_v61, 0.0  ;;  %v7344_v61 = vpack.c.bf16 %v5362_v53, %v5361_v18 }
 0x587   : > { %v5192_v0 = vmax.f32 %v4542_v20, %v5097_v19  ;;  %v4544_v16 = vpop.f32.mrb[125].mxu0  ;;  %v5364_v19 = vld [vmem:[#allocation8 + $0x268] sm:$0xff] }
 0x588   : > { %v5193_v6 = vmax.f32 %v4544_v16, %v5099_v8  ;;  %5438 = vmatprep.mubr.f32.mxu0 %v5271_v21  ;;  %v5252_v51 = vadd.f32 %v10752_v48, %v5225_v36  ;;  %v7348_v16 = vpack.c.bf16 %v5364_v19, %v5363_v44 }
 0x589   : > { %v5103_v5 = vpop.f32.mrb[126].mxu1  ;;  %5439 = vmatmul.mubr.f32.vlgmr.msra.gmra.mrb[152].mxu0 %v5267_v38 }
 0x58a   : > { %v5226_v63 = vmax.f32 %v5192_v0, %v5193_v6  ;;  %v4548_v11 = vpop.f32.mrb[126].mxu0  ;;  %v5105_v14 = vpop.f32.mrb[127].mxu1  ;;  %v5272_v26 = vmax.f32 %v5252_v51, 0.0  ;;  %7327 = vmatpush3.bf16.msra.mxu0 %v10746_v25  ;;  %v5366_v6 = vld [vmem:[#allocation8 + $0x278] sm:$0xff] }
 0x58b   : > { %v5194_v47 = vmax.f32 %v4548_v11, %v5103_v5  ;;  %v4550_v13 = vpop.f32.mrb[127].mxu0  ;;  %7329 = vmatprep.subr.bf16.mxu0 %v7328_v45 }
 0x58c   : > { %v5195_v3 = vmax.f32 %v4550_v13, %v5105_v14  ;;  %5443 = vmatprep.mubr.f32.mxu0 %v5272_v26  ;;  %v5253_v4 = vadd.f32 %v10752_v48, %v5226_v63 }
 0x58d   : > { %v5109_v43 = vpop.f32.mrb[128].mxu1  ;;  %5444 = vmatmul.mubr.f32.gmra.mrb[154].mxu0 %v5268_v29 }
 0x58e   : > { %v5227_v52 = vmax.f32 %v5194_v47, %v5195_v3  ;;  %v4554_v34 = vpop.f32.mrb[128].mxu0  ;;  %v5111_v59 = vpop.f32.mrb[129].mxu1  ;;  %v5273_v39 = vmax.f32 %v5253_v4, 0.0  ;;  %7331 = vmatpush3.bf16.msra.mxu0 %v7328_v45  ;;  %v5365_v45 = vld [vmem:[#allocation8 + $0x270] sm:$0xff] }
 0x58f   : > { %v5196_v25 = vmax.f32 %v4554_v34, %v5109_v43  ;;  %v4556_v23 = vpop.f32.mrb[129].mxu0  ;;  %7333 = vmatprep.subr.bf16.mxu0 %v7332_v50  ;;  %v7352_v14 = vpack.c.bf16 %v5366_v6, %v5365_v45 }
 0x590   : > { %v5197_v28 = vmax.f32 %v4556_v23, %v5111_v59  ;;  %5448 = vmatprep.mubr.f32.mxu0 %v5273_v39  ;;  %v5254_v24 = vadd.f32 %v10752_v48, %v5227_v52 }
 0x591   : > { %v5115_v7 = vpop.f32.mrb[130].mxu1  ;;  %5449 = vmatmul.mubr.f32.gmra.mrb[156].mxu0 %v5269_v49 }
 0x592   : > { %v5228_v30 = vmax.f32 %v5196_v25, %v5197_v28  ;;  %v4560_v9 = vpop.f32.mrb[130].mxu0  ;;  %v5117_v37 = vpop.f32.mrb[131].mxu1  ;;  %v5274_v1 = vmax.f32 %v5254_v24, 0.0  ;;  %7335 = vmatpush3.bf16.msra.mxu0 %v7332_v50 }
 0x593   : > { %v5198_v56 = vmax.f32 %v4560_v9, %v5115_v7  ;;  %v4562_v46 = vpop.f32.mrb[131].mxu0  ;;  %7337 = vmatprep.subr.bf16.mxu0 %v7336_v17 }
 0x594   : > { %v5199_v22 = vmax.f32 %v4562_v46, %v5117_v37  ;;  %5453 = vmatprep.mubr.f32.mxu0 %v5274_v1  ;;  %v5255_v50 = vadd.f32 %v10752_v48, %v5228_v30 }
 0x595   : > { %v5121_v31 = vpop.f32.mrb[132].mxu1  ;;  %5454 = vmatmul.mubr.f32.gmra.mrb[158].mxu0 %v5270_v33 }
 0x596   : > { %v5229_v10 = vmax.f32 %v5198_v56, %v5199_v22  ;;  %v4566_v57 = vpop.f32.mrb[132].mxu0  ;;  %v5123_v40 = vpop.f32.mrb[133].mxu1  ;;  %7339 = vmatpush3.bf16.msra.mxu0 %v7336_v17  ;;  %v5275_v25 = vmax.f32 %v5255_v50, 0.0 }
 0x597   : > { %v5200_v15 = vmax.f32 %v4566_v57, %v5121_v31  ;;  %v4568_v35 = vpop.f32.mrb[133].mxu0  ;;  %7341 = vmatprep.subr.bf16.mxu0 %v7340_v42 }
 0x598   : > { %v5201_v12 = vmax.f32 %v4568_v35, %v5123_v40  ;;  %v5256_v54 = vadd.f32 %v10752_v48, %v5229_v10 }
 0x599   : > { %v5127_v36 = vpop.f32.mrb[134].mxu1 }
 0x59a   : > { %v5230_v20 = vmax.f32 %v5200_v15, %v5201_v12  ;;  %v4572_v8 = vpop.f32.mrb[134].mxu0  ;;  %v5129_v21 = vpop.f32.mrb[135].mxu1  ;;  %7343 = vmatpush3.bf16.msra.mxu0 %v7340_v42  ;;  %v5276_v1 = vmax.f32 %v5256_v54, 0.0  ;;  %v5637_v54 = vld [vmem:[#allocation10 + $0x20] sm:$0xff] }
 0x59b   : > { %v5202_v38 = vmax.f32 %v4572_v8, %v5127_v36  ;;  %v4574_v0 = vpop.f32.mrb[135].mxu0  ;;  %7345 = vmatprep.subr.bf16.mxu0 %v7344_v61 }
 0x59c   : > { %v5203_v60 = vmax.f32 %v4574_v0, %v5129_v21  ;;  %v5257_v56 = vadd.f32 %v10752_v48, %v5230_v20 }
 0x59d   : > { %v5133_v51 = vpop.f32.mrb[136].mxu1 }
 0x59e   : > { %v5231_v41 = vmax.f32 %v5202_v38, %v5203_v60  ;;  %v4578_v55 = vpop.f32.mrb[136].mxu0  ;;  %v5135_v5 = vpop.f32.mrb[137].mxu1  ;;  %7347 = vmatpush3.bf16.msra.mxu0 %v7344_v61  ;;  %v5277_v40 = vmax.f32 %v5257_v56, 0.0  ;;  %v5645_v56 = vld [vmem:[#allocation10 + $0x60] sm:$0xff] }
 0x59f   : > { %v5204_v63 = vmax.f32 %v4578_v55, %v5133_v51  ;;  %v4580_v11 = vpop.f32.mrb[137].mxu0  ;;  %7349 = vmatprep.subr.bf16.mxu0 %v7348_v16 }
 0x5a0   : > { %v5205_v26 = vmax.f32 %v4580_v11, %v5135_v5  ;;  %v5258_v15 = vadd.f32 %v10752_v48, %v5231_v41 }
 0x5a1   : > { %v5139_v47 = vpop.f32.mrb[138].mxu1 }
 0x5a2   : > { %v5232_v13 = vmax.f32 %v5204_v63, %v5205_v26  ;;  %v4584_v29 = vpop.f32.mrb[138].mxu0  ;;  %v5141_v2 = vpop.f32.mrb[139].mxu1  ;;  %7351 = vmatpush3.bf16.msra.mxu0 %v7348_v16  ;;  %v5278_v38 = vmax.f32 %v5258_v15, 0.0 }
 0x5a3   : > { %v5206_v3 = vmax.f32 %v4584_v29, %v5139_v47  ;;  %v4586_v4 = vpop.f32.mrb[139].mxu0  ;;  %7353 = vmatprep.subr.bf16.mxu0 %v7352_v14 }
 0x5a4   : > { %v5207_v62 = vmax.f32 %v4586_v4, %v5141_v2  ;;  %v5259_v27 = vadd.f32 %v10752_v48, %v5232_v13 }
 0x5a5   : > { %v5145_v43 = vpop.f32.mrb[140].mxu1 }
 0x5a6   : > { %v5233_v52 = vmax.f32 %v5206_v3, %v5207_v62  ;;  %v4590_v34 = vpop.f32.mrb[140].mxu0  ;;  %v5147_v59 = vpop.f32.mrb[141].mxu1  ;;  %v5279_v39 = vmax.f32 %v5259_v27, 0.0  ;;  %7355 = vmatpush3.bf16.msra.mxu0 %v7352_v14 }
 0x5a7   : > { %v5208_v23 = vmax.f32 %v4590_v34, %v5145_v43  ;;  %v4592_v49 = vpop.f32.mrb[141].mxu0  ;;  %v5633_v34 = vld [vmem:[#allocation10] sm:$0xff] }
 0x5a8   : > { %v5209_v17 = vmax.f32 %v4592_v49, %v5147_v59  ;;  %5523 = vmatprep.mubr.f32.mxu1 %v5279_v39  ;;  %v5260_v28 = vadd.f32 %v10752_v48, %v5233_v52  ;;  %v5634_v59 = vld [vmem:[#allocation10 + $0x8] sm:$0xff]  ;;  %v5635_v39 = vld [vmem:[#allocation10 + $0x10] sm:$0xff] }
 0x5a9   : > { %v5151_v24 = vpop.f32.mrb[142].mxu1  ;;  %5524 = vmatmul.mubr.f32.vlgmr.msra.gmra.mrb[152].mxu1 %v5275_v25  ;;  %v7356_v25 = vpack.c.bf16 %v5634_v59, %v5633_v34 }
 0x5aa   : > { %v5234_v58 = vmax.f32 %v5208_v23, %v5209_v17  ;;  %v4596_v32 = vpop.f32.mrb[142].mxu0  ;;  %v5153_v7 = vpop.f32.mrb[143].mxu1  ;;  %v5280_v30 = vmax.f32 %v5260_v28, 0.0  ;;  %v5636_v23 = vld [vmem:[#allocation10 + $0x18] sm:$0xff]  ;;  %v5638_v17 = vld [vmem:[#allocation10 + $0x28] sm:$0xff] }
 0x5ab   : > { %v5210_v9 = vmax.f32 %v4596_v32, %v5151_v24  ;;  %v4598_v37 = vpop.f32.mrb[143].mxu0  ;;  %v7360_v49 = vpack.c.bf16 %v5636_v23, %v5635_v39  ;;  %7357 = vmatprep.subr.bf16.mxu1 %v7356_v25  ;;  %v7364_v28 = vpack.c.bf16 %v5638_v17, %v5637_v54  ;;  %v5639_v24 = vld [vmem:[#allocation10 + $0x30] sm:$0xff]  ;;  %v5641_v32 = vld [vmem:[#allocation10 + $0x40] sm:$0xff] }
 0x5ac   : > { %v5211_v46 = vmax.f32 %v4598_v37, %v5153_v7  ;;  %5528 = vmatprep.mubr.f32.mxu1 %v5280_v30  ;;  %v5261_v33 = vadd.f32 %v10752_v48, %v5234_v58  ;;  %7359 = vmatpush3.bf16.msra.mxu1 %v7356_v25  ;;  %v5640_v58 = vld [vmem:[#allocation10 + $0x38] sm:$0xff]  ;;  %v5642_v7 = vld [vmem:[#allocation10 + $0x48] sm:$0xff] }
 0x5ad   : > { %v5157_v42 = vpop.f32.mrb[144].mxu1  ;;  %5529 = vmatmul.mubr.f32.gmra.mrb[154].mxu1 %v5276_v1  ;;  %7361 = vmatprep.subr.bf16.mxu1 %v7360_v49  ;;  %v7372_v30 = vpack.c.bf16 %v5642_v7, %v5641_v32  ;;  %v5644_v37 = vld [vmem:[#allocation10 + $0x58] sm:$0xff] }
 0x5ae   : > { %v5235_v22 = vmax.f32 %v5210_v9, %v5211_v46  ;;  %v4602_v18 = vpop.f32.mrb[144].mxu0  ;;  %v5159_v53 = vpop.f32.mrb[145].mxu1  ;;  %v5281_v31 = vmax.f32 %v5261_v33, 0.0  ;;  %v5643_v9 = vld [vmem:[#allocation10 + $0x50] sm:$0xff]  ;;  %v5646_v46 = vld [vmem:[#allocation10 + $0x68] sm:$0xff] }
 0x5af   : > { %v5212_v10 = vmax.f32 %v4602_v18, %v5157_v42  ;;  %v4604_v57 = vpop.f32.mrb[145].mxu0  ;;  %v7376_v1 = vpack.c.bf16 %v5644_v37, %v5643_v9  ;;  %v7380_v33 = vpack.c.bf16 %v5646_v46, %v5645_v56  ;;  %v5647_v42 = vld [vmem:[#allocation10 + $0x70] sm:$0xff] }
 0x5b0   : > { %v5213_v35 = vmax.f32 %v4604_v57, %v5159_v53  ;;  %5533 = vmatprep.mubr.f32.mxu1 %v5281_v31  ;;  %v5262_v61 = vadd.f32 %v10752_v48, %v5235_v22  ;;  %7363 = vmatpush3.bf16.msra.mxu1 %v7360_v49  ;;  %v5648_v22 = vld [vmem:[#allocation10 + $0x78] sm:$0xff]  ;;  %v6088_v49 = vld [vmem:[%s11258_s25] ss:$0 sm:$0xff] }
 0x5b1   : > { %v5163_v12 = vpop.f32.mrb[146].mxu1  ;;  %5534 = vmatmul.mubr.f32.gmra.mrb[156].mxu1 %v5277_v40  ;;  %7365 = vmatprep.subr.bf16.mxu1 %v7364_v28  ;;  %v7384_v18 = vpack.c.bf16 %v5648_v22, %v5647_v42 }
 0x5b2   : > { %v5236_v44 = vmax.f32 %v5212_v10, %v5213_v35  ;;  %v4608_v19 = vpop.f32.mrb[146].mxu0  ;;  %v5165_v36 = vpop.f32.mrb[147].mxu1  ;;  %v5282_v20 = vmax.f32 %v5262_v61, 0.0 }
 0x5b3   : > { %v5214_v8 = vmax.f32 %v4608_v19, %v5163_v12  ;;  %v4610_v21 = vpop.f32.mrb[147].mxu0 }
 0x5b4   : > { %v5215_v0 = vmax.f32 %v4610_v21, %v5165_v36  ;;  %5538 = vmatprep.mubr.f32.mxu1 %v5282_v20  ;;  %v5263_v16 = vadd.f32 %v10752_v48, %v5236_v44  ;;  %7367 = vmatpush3.bf16.msra.mxu1 %v7364_v28  ;;  %v6087_v20 = vld [vmem:[%s11257_s22] ss:$0 sm:$0xff] }
 0x5b5   : > { %v5169_v60 = vpop.f32.mrb[148].mxu1  ;;  %5539 = vmatmul.mubr.f32.gmra.mrb[158].mxu1 %v5278_v38 }
 0x5b6   : > { %v5237_v45 = vmax.f32 %v5214_v8, %v5215_v0  ;;  %v4614_v6 = vpop.f32.mrb[148].mxu0  ;;  %v5171_v51 = vpop.f32.mrb[149].mxu1  ;;  %v5283_v41 = vmax.f32 %v5263_v16, 0.0 }
 0x5b7   : > { %v5216_v55 = vmax.f32 %v4614_v6, %v5169_v60  ;;  %v4616_v5 = vpop.f32.mrb[149].mxu0 }
 0x5b8   : > { %v5264_v63 = vadd.f32 %v10752_v48, %v5237_v45  ;;  %v5217_v11 = vmax.f32 %v4616_v5, %v5171_v51  ;;  %6256 = vmatprep.mubr.f32.mxu0 %v5283_v41 }
 0x5b9   : > { %v5175_v14 = vpop.f32.mrb[150].mxu1 }
 0x5ba   : > { %v5284_v26 = vmax.f32 %v5264_v63, 0.0  ;;  %v5238_v47 = vmax.f32 %v5216_v55, %v5217_v11  ;;  %v4620_v13 = vpop.f32.mrb[150].mxu0  ;;  %v5177_v29 = vpop.f32.mrb[151].mxu1 }
 0x5bb   : > { %v5218_v2 = vmax.f32 %v4620_v13, %v5175_v14  ;;  %v4622_v50 = vpop.f32.mrb[151].mxu0 }
 0x5bc   : > { %v5219_v3 = vmax.f32 %v4622_v50, %v5177_v29  ;;  %6257 = vmatmul.mubr.f32.vlgmr.msra.gmra.mrb[160].mxu0 %v5284_v26  ;;  %v5265_v4 = vadd.f32 %v10752_v48, %v5238_v47 }
 0x5be   : > { %v5239_v62 = vmax.f32 %v5218_v2, %v5219_v3  ;;  %v5285_v27 = vmax.f32 %v5265_v4, 0.0 }
 0x5c0   : > { %6259 = vmatprep.mubr.f32.mxu0 %v5285_v27  ;;  %v5266_v43 = vadd.f32 %v10752_v48, %v5239_v62  ;;  %v7368_v48 = vpack.c.bf16 %v5640_v58, %v5639_v24 }
 0x5c2   : > { %v5286_v52 = vmax.f32 %v5266_v43, 0.0  ;;  %7369 = vmatprep.subr.bf16.mxu1 %v7368_v48 }
 0x5c3   : > { %7371 = vmatpush3.bf16.msra.mxu1 %v7368_v48 }
 0x5c4   : > { %6260 = vmatmul.mubr.f32.gmra.mrb[162].mxu0 %v5286_v52  ;;  %7373 = vmatprep.subr.bf16.mxu1 %v7372_v30 }
 0x5c7   : > { %7375 = vmatpush3.bf16.msra.mxu1 %v7372_v30 }
 0x5c8   : > { %7377 = vmatprep.subr.bf16.mxu1 %v7376_v1 }
 0x5cb   : > { %7379 = vmatpush3.bf16.msra.mxu1 %v7376_v1 }
 0x5cc   : > { %7381 = vmatprep.subr.bf16.mxu1 %v7380_v33 }
 0x5cf   : > { %7383 = vmatpush3.bf16.msra.mxu1 %v7380_v33 }
 0x5d0   : > { %7385 = vmatprep.subr.bf16.mxu1 %v7384_v18 }
 0x5d3   : > { %7387 = vmatpush3.bf16.msra.mxu1 %v7384_v18 }
 0x65c   : > { %v6128_v53 = vpop.f32.mrb[152].mxu0 }
 0x65d   : > { %v6129_v31 = vpop.f32.mrb[153].mxu0 }
 0x65e   : > { %v6130_v10 = vadd.f32 %v6129_v31, %v6128_v53 }
 0x660   : > { %v6131_v57 = vpop.f32.mrb[154].mxu0  ;;  %v5441_v38 = vadd.f32 %v6130_v10, %v6087_v20 }
 0x661   : > { %v6132_v40 = vpop.f32.mrb[155].mxu0 }
 0x662   : > { %v6133_v15 = vadd.f32 %v6132_v40, %v6131_v57 }
 0x664   : > { %v6134_v35 = vpop.f32.mrb[156].mxu0  ;;  %v5446_v6 = vadd.f32 %v6133_v15, %v6087_v20 }
 0x665   : > { %v6135_v61 = vpop.f32.mrb[157].mxu0 }
 0x666   : > { %v6136_v12 = vadd.f32 %v6135_v61, %v6134_v35 }
 0x668   : > { %v6137_v44 = vpop.f32.mrb[158].mxu0  ;;  %v5451_v63 = vadd.f32 %v6136_v12, %v6087_v20 }
 0x669   : > { %v6138_v19 = vpop.f32.mrb[159].mxu0 }
 0x66a   : > { %v6139_v36 = vadd.f32 %v6138_v19, %v6137_v44 }
 0x66c   : > { %v5456_v13 = vadd.f32 %v6139_v36, %v6087_v20 }
 0x67c   : > { %v6172_v8 = vpop.f32.mrb[152].mxu1 }
 0x67d   : > { %v6173_v21 = vpop.f32.mrb[153].mxu1 }
 0x67e   : > { %v6174_v0 = vadd.f32 %v6173_v21, %v6172_v8 }
 0x680   : > { %v6175_v16 = vpop.f32.mrb[154].mxu1  ;;  %v5526_v60 = vadd.f32 %v6174_v0, %v5441_v38 }
 0x681   : > { %v6176_v45 = vpop.f32.mrb[155].mxu1 }
 0x682   : > { %v6177_v51 = vadd.f32 %v6176_v45, %v6175_v16 }
 0x684   : > { %v6178_v41 = vpop.f32.mrb[156].mxu1  ;;  %v5531_v55 = vadd.f32 %v6177_v51, %v5446_v6 }
 0x685   : > { %v6179_v5 = vpop.f32.mrb[157].mxu1 }
 0x686   : > { %v6180_v11 = vadd.f32 %v6179_v5, %v6178_v41 }
 0x688   : > { %v6181_v14 = vpop.f32.mrb[158].mxu1  ;;  %v5536_v26 = vadd.f32 %v6180_v11, %v5451_v63 }
 0x689   : > { %v6182_v47 = vpop.f32.mrb[159].mxu1 }
 0x68a   : > { %v6183_v29 = vadd.f32 %v6182_v47, %v6181_v14 }
 0x68c   : > { %v5541_v2 = vadd.f32 %v6183_v29, %v5456_v13 }
 0x68f   : > { %v6258_v50 = vpop.f32.mrb[160].mxu0 }
 0x690   : > { %v5616_v3 = vadd.f32 %v6258_v50, %v5531_v55  ;;  %v5610_v4 = vpop.f32.mrb[161].mxu0 }
 0x691   : > { %v5611_v62 = vadd.f32 %v5610_v4, %v5526_v60 }
 0x692   : > { %v5630_v43 = vmax.f32 %v5616_v3, 0.0 }
 0x693   : > { %v5629_v27 = vmax.f32 %v5611_v62, 0.0 }
 0x695   : > { %6294 = vmatprep.mubr.f32.mxu1 %v5629_v27 }
 0x696   : > { %6295 = vmatmul.mubr.f32.vlgmr.msra.gmra.mrb[160].mxu1 %v5630_v43 }
 0x697   : > { %v6261_v52 = vpop.f32.mrb[162].mxu0 }
 0x698   : > { %v5626_v34 = vadd.f32 %v6261_v52, %v5541_v2  ;;  %v5620_v59 = vpop.f32.mrb[163].mxu0 }
 0x699   : > { %v5621_v39 = vadd.f32 %v5620_v59, %v5536_v26 }
 0x69a   : > { %v5632_v23 = vmax.f32 %v5626_v34, 0.0 }
 0x69b   : > { %v5631_v25 = vmax.f32 %v5621_v39, 0.0 }
 0x69d   : > { %6297 = vmatprep.mubr.f32.mxu1 %v5631_v25 }
 0x69e   : > { %6298 = vmatmul.mubr.f32.gmra.mrb[162].mxu1 %v5632_v23 }
 0x769   : > { %v6296_v54 = vpop.f32.mrb[160].mxu1 }
 0x76a   : > { %v5728_v17 = vadd.f32 %v6296_v54, %v6088_v49  ;;  %v5722_v28 = vpop.f32.mrb[161].mxu1 }
 0x76b   : > { %v5723_v24 = vadd.f32 %v6088_v49, %v5722_v28 }
 0x76c   : > { %5742 = vst [vmem:[%s433_s28 + $0x8] sm:$0xff] %v5728_v17 }
 0x76d   : > { %5741 = vst [vmem:[%s433_s28] sm:$0xff] %v5723_v24 }
 0x771   : > { %v6299_v58 = vpop.f32.mrb[162].mxu1 }
 0x772   : > { %v5738_v48 = vadd.f32 %v6299_v58, %v6088_v49  ;;  %v5732_v32 = vpop.f32.mrb[163].mxu1 }
 0x773   : > { %v5733_v7 = vadd.f32 %v6088_v49, %v5732_v32 }
 0x774   : > { %5744 = vst [vmem:[%s433_s28 + $0x18] sm:$0xff] %v5738_v48 }
 0x775   : > { %5743 = vst [vmem:[%s433_s28 + $0x10] sm:$0xff] %v5733_v7 }
 0x776   : > { %8299 = shalt.err (!%p8296_p3)
}
 0x777   : > { %s8300_s27 = scalar_lea.hbm %s10788_s19, 512  ;;  %s8304_s22 = scalar_lea.hbm %s11260_s9, 1024 }
 0x778   : > { %p8301_p5 = scmp.ne.s32.totalorder %s10788_s19, %s8300_s27  ;;  %p8305_p12 = scmp.lt.u32.totalorder %s10788_s19, %s11260_s9 }
 0x779   : > { %p8306_p13 = scmp.lt.u32.totalorder %s8304_s22, %s8300_s27  ;;  %p8308_p8 = scmp.lt.u32.totalorder %s8300_s27, %s10788_s19 }
 0x77a   : > { %p8302_p6 = pnand %p8301_p5, %p11261_p7 }
 0x77b   : > { %p8307_p0 = por %p8306_p13, %p8305_p12 }
 0x77c   : > { %p8303_p11 = pneg %p8302_p6 }
 0x77d   : > { %p8309_p9 = por %p8308_p8, %p8307_p0 }
 0x77f   : > { %p8310_p10 = pnand %p8309_p9, %p8303_p11 }
 0x781   : > { %8313 = shalt.err (!%p8310_p10)
}
 0x782   : > { %s8378_s29 = smov 128   ;;  %s8379_s25 = smov 8  }
 0x783   : > { %8021 = dma.vmem_to_hbm [thread:$0]  (%p11261_p7), %s10783_s1, 512, %s10788_s19, %s5746_s20, %s8378_s29, %s8378_s29, %s8379_s25  }
 0x784 PF: > { %s11262_s28 = sld [smem:[#allocation19_spill]]  ;;  %s11263_s26 = sld [smem:[#allocation23_spill]] }
 0x78a   : > { %s5774_s6 = sand.u32 1, %s11262_s28   ;;  %p11264_p1 = scmp.ne.s32.totalorder %s11263_s26, 0 }
 0x78b   : > { %s5775_s8 = scalar_lea.sflag [#allocation4], %s5774_s6 }
 0x78c   : > { %p8037_p2 = pnand %p5876_p4, %p11264_p1 }
 0x78e   : > { %8343 = dma.done.wait (!%p8037_p2), %s5775_s8, 512  }
 0x78f   : > { %8345 = vsyncadd (!%p8037_p2), %s5775_s8, 4294966784  ;;  %s11265_s12 = sld [smem:[#allocation20_spill]]  ;;  %s11266_s23 = sld [smem:[#allocation21_spill]] }
 0x790   : > { %s11267_s30 = smov %s8352_s10  ;;  %s11268_s10 = smov %s8356_s11 }
 0x795   : > { %p24_p3 = scmp.ge.s32.totalorder %s11265_s12, 4   ;;  %s11269_s11 = smov %s11266_s23 }
 0x797   :  { %26 = sbr.rel (!%p24_p3) target bundleno = 12 (0xc), region = 129 }
 0x79e   :  { %5780 = vsyncpa [#allocation3], 1 }
 0x79f   :  { %5782 = vsyncpa [#allocation3 + $0x1], 1 }
 0x7a0   :  { %5783 = vsyncpa [#allocation6], 1 }
 0x7a1   :  { %5784 = vsyncpa [#allocation9], 1 }
 0x7a2   :  { %5785 = vsyncpa [#allocation4], 1 }
 0x7a3   :  { %5787 = vsyncpa [#allocation4 + $0x1], 1 }

</bundles_post_ra>
